<compile_context>
chip_gen: v6e
topology: v6e:2x2x1
jax: 0.10.0
libtpu: 0.0.40
codegen_flags: <defaults>
</compile_context>

<pallas_src>
from functools import partial

import jax
import jax.numpy as jnp
from jax.experimental import pallas as pl
from jax.experimental.pallas import tpu as pltpu

EPS = 5.960464477539063e-08  # CustomNorm eps (2**-24)


# ----------------------------- Pallas kernel ---------------------------------

def _custom_norm_kernel(x_ref, gamma_ref, o_ref, *, dim):
    x = x_ref[...]                                   # (TILE_R, D) f32
    gamma = gamma_ref[...]                           # (1, D)      f32

    ss = jnp.sum(x * x, axis=-1, keepdims=True)      # (TILE_R, 1)
    l2 = jnp.sqrt(ss)
    denom = jnp.maximum(l2, jnp.float32(EPS))

    # EUP approximate reciprocal (idle slot -> effectively free) + one Newton
    # refinement step on the VPU to recover full f32 accuracy.
    inv = pl.reciprocal(denom, approx=True)
    inv = inv * (jnp.float32(2.0) - denom * inv)

    scale = jnp.float32(dim ** 0.5)
    o_ref[...] = (x * inv) * (gamma * scale)


# ----------------------------- wrapper ----------------------------------------

def _choose_tile_rows(rows, dim, block_bytes_budget=4 * 1024 * 1024):
    """Largest sublane-aligned row tile whose f32 block fits the per-block budget."""
    if rows * dim * 4 <= block_bytes_budget:
        return rows                                   # whole array in one block
    t = (block_bytes_budget // (dim * 4)) // 8 * 8    # multiple of 8 sublanes
    t = min(t, (rows // 8) * 8)
    return max(8, t)


def custom_norm(x, gamma, *, tile_rows=None):
    """CustomNorm over the last dim of x. gamma has shape (dim,)."""
    orig_shape = x.shape
    orig_dtype = x.dtype
    dim = orig_shape[-1]

    rows = 1
    for s in orig_shape[:-1]:
        rows *= s

    x2 = x.reshape(rows, dim).astype(jnp.float32)
    g2 = gamma.reshape(1, dim).astype(jnp.float32)

    if tile_rows is None:
        tile_rows = _choose_tile_rows(rows, dim)
    # (8,128) constraint: second-minor block dim must be a multiple of 8 or the full extent.
    if tile_rows != rows:
        tile_rows = max(8, (tile_rows // 8) * 8)

    grid = (pl.cdiv(rows, tile_rows),)
    kern = partial(_custom_norm_kernel, dim=dim)

    out = pl.pallas_call(
        kern,
        out_shape=jax.ShapeDtypeStruct((rows, dim), jnp.float32),
        grid=grid,
        in_specs=[
            pl.BlockSpec((tile_rows, dim), lambda r: (r, 0)),
            pl.BlockSpec((1, dim), lambda r: (0, 0)),     # gamma resident across steps
        ],
        out_specs=pl.BlockSpec((tile_rows, dim), lambda r: (r, 0)),
        compiler_params=pltpu.CompilerParams(
            dimension_semantics=("parallel",)),           # shard row tiles across TCs
    )(x2, g2)

    return out.reshape(orig_shape).astype(orig_dtype)


# ----------------------------- pure-JAX reference ------------------------------

def custom_norm_reference(x, gamma):
    dim = x.shape[-1]
    l2 = jnp.sqrt(jnp.sum(x * x, axis=-1, keepdims=True))
    denom = jnp.maximum(l2, jnp.float32(EPS))
    return x / denom * (dim ** 0.5) * gamma


# ----------------------------- main --------------------------------------------

if __name__ == "__main__":
    # Small but lane-dense shapes: last dim a multiple of 128 so every tile is an
    # unmasked, fully occupied vreg layout (per the perf review).
    B, N, D = 4, 256, 256

    key = jax.random.PRNGKey(0)
    kx, kg = jax.random.split(key)
    x = jax.random.normal(kx, (B, N, D), jnp.float32)
    gamma = 1.0 + 0.05 * jax.random.normal(kg, (D,), jnp.float32)

    out = custom_norm(x, gamma)
    out = jax.block_until_ready(out)

    ref = custom_norm_reference(x, gamma)
    assert out.shape == x.shape
    assert bool(jnp.allclose(out, ref, rtol=1e-3, atol=1e-3)), "mismatch vs pure-JAX reference"

    print("KERNEL_OK")
</pallas_src>

<mosaic_0001>
module attributes {stable_mosaic.version = 11 : i64} {
  func.func @_custom_norm_kernel(%arg0: i32, %arg1: memref<1024x256xf32, #tpu.memory_space<vmem>>, %arg2: memref<1x256xf32, #tpu.memory_space<vmem>>, %arg3: memref<1024x256xf32, #tpu.memory_space<vmem>>) attributes {dimension_semantics = [#tpu.dimension_semantics<parallel>], iteration_bounds = array<i64: 1>, scalar_prefetch = 0 : i64, scratch_operands = 0 : i64, tpu.core_type = #tpu.core_type<tc>, window_params = [{transform_indices = @transform_0, window_bounds = array<i64: 1024, 256>}, {pipeline_mode = #tpu.pipeline_mode<synchronous>, transform_indices = @transform_1, window_bounds = array<i64: 1, 256>}, {transform_indices = @transform_2, window_bounds = array<i64: 1024, 256>}]} {
    %c0 = arith.constant 0 : index
    %c0_0 = arith.constant 0 : index
    %0 = vector.load %arg1[%c0, %c0_0] : memref<1024x256xf32, #tpu.memory_space<vmem>>, vector<1024x256xf32>
    %c0_1 = arith.constant 0 : index
    %c0_2 = arith.constant 0 : index
    %1 = vector.load %arg2[%c0_1, %c0_2] : memref<1x256xf32, #tpu.memory_space<vmem>>, vector<1x256xf32>
    %2 = arith.mulf %0, %0 : vector<1024x256xf32>
    %cst = arith.constant dense<0.000000e+00> : vector<1024xf32>
    %3 = vector.multi_reduction <add>, %2, %cst [1] : vector<1024x256xf32> to vector<1024xf32>
    %4 = vector.shape_cast %3 : vector<1024xf32> to vector<1024x1xf32>
    %5 = math.sqrt %4 : vector<1024x1xf32>
    %cst_3 = arith.constant 5.96046448E-8 : f32
    %6 = vector.broadcast %cst_3 : f32 to vector<1024x1xf32>
    %7 = arith.maximumf %5, %6 : vector<1024x1xf32>
    %8 = tpu.reciprocal %7 {approx = true} : vector<1024x1xf32> -> vector<1024x1xf32>
    %9 = arith.mulf %7, %8 : vector<1024x1xf32>
    %cst_4 = arith.constant 2.000000e+00 : f32
    %10 = vector.broadcast %cst_4 : f32 to vector<1024x1xf32>
    %11 = arith.subf %10, %9 : vector<1024x1xf32>
    %12 = arith.mulf %8, %11 : vector<1024x1xf32>
    %13 = vector.broadcast %12 : vector<1024x1xf32> to vector<1024x256xf32>
    %14 = arith.mulf %0, %13 : vector<1024x256xf32>
    %cst_5 = arith.constant 1.600000e+01 : f32
    %15 = vector.broadcast %cst_5 : f32 to vector<1x256xf32>
    %16 = arith.mulf %1, %15 : vector<1x256xf32>
    %17 = vector.broadcast %16 : vector<1x256xf32> to vector<1024x256xf32>
    %18 = arith.mulf %14, %17 : vector<1024x256xf32>
    %c0_6 = arith.constant 0 : index
    %c0_7 = arith.constant 0 : index
    %19 = vector.load %arg3[%c0_6, %c0_7] : memref<1024x256xf32, #tpu.memory_space<vmem>>, vector<1024x256xf32>
    tpu.vector_store %arg3[%c0_6, %c0_7], %18 {strides = array<i32>} : memref<1024x256xf32, #tpu.memory_space<vmem>>, vector<1024x256xf32>,
    return
  }
  func.func @transform_0(%arg0: i32) -> (i32, i32) {
    %c0_i32 = arith.constant 0 : i32
    %c0_i32_0 = arith.constant 0 : i32
    return %arg0, %c0_i32 : i32, i32
  }
  func.func @transform_1(%arg0: i32) -> (i32, i32) {
    %c0_i32 = arith.constant 0 : i32
    %c0_i32_0 = arith.constant 0 : i32
    %c0_i32_1 = arith.constant 0 : i32
    return %c0_i32, %c0_i32_0 : i32, i32
  }
  func.func @transform_2(%arg0: i32) -> (i32, i32) {
    %c0_i32 = arith.constant 0 : i32
    %c0_i32_0 = arith.constant 0 : i32
    return %arg0, %c0_i32 : i32, i32
  }
}

</mosaic_0001>

<bundles_post_ra>
// kernel: tpu_custom_call.1
= control target key start
LH: loop header
LB: loop body
LE: loop exit
PB: predicated region body
PF: predicated region fallthrough
CT: control target
= control target key end

     0   :  { %7 = vsyncpa [#allocation3], 0  ;;  %s7132_s0 = inlined_call_operand.hbm [shape: f32[1024,256], index: 0, kind: input, shape index: {}]   ;;  %s7133_s1 = inlined_call_operand.hbm [shape: f32[1,256], index: 1, kind: input, shape index: {}]   ;;  %s7134_s2 = inlined_call_operand.hbm [shape: f32[1024,256], index: 2, kind: output, shape index: {}]  }
   0x1   :  { %8 = vsyncpa [#allocation6], 0 }
   0x2   :  { %9 = vsyncpa [#allocation4], 0  ;;  %s4108_s9 = smov [#allocation2]  }
   0x3   :  { %s15_s10 = sshll.u32 %s4108_s9, 4  ;;  %s16_s10 = int_to_ptr.vmem [resolvable:$true] %s15_s10 }
   0x4   :  { %s4050_s11 = scalar_lea.vmem %s16_s10, 32768  ;;  %p4055_p1 = scmp.lt.s32.totalorder %s16_s10, %s16_s10 }
   0x5   :  { %p4051_p0 = scmp.ne.s32.totalorder %s16_s10, %s4050_s11  ;;  %p4056_p2 = scmp.lt.s32.totalorder %s4050_s11, %s4050_s11 }
   0x7   :  { %p4057_p3 = por %p4056_p2, %p4055_p1 }
   0x9   :  { %p4058_p4 = pnand %p4057_p3, %p4051_p0 }
   0xb   :  { %4061 = shalt.err (!%p4058_p4)
}
   0xc   :  { %s4109_s12 = smov 256   ;;  %s4110_s13 = smov 16  }
   0xd   :  { %21 = dma.hbm_to_vmem [thread:$0]  %s7132_s0, 32768, %s16_s10, [#allocation3], %s4109_s12, %s4109_s12, %s4110_s13  }
   0xe   :  { %s4111_s16 = smov [#allocation5]  }
   0xf   :  { %s28_s17 = sshll.u32 %s4111_s16, 4  ;;  %s29_s17 = int_to_ptr.vmem [resolvable:$true] %s28_s17 }
  0x10   :  { %s4070_s18 = scalar_lea.vmem %s29_s17, 32  ;;  %p4075_p6 = scmp.lt.s32.totalorder %s29_s17, %s29_s17 }
  0x11   :  { %p4071_p5 = scmp.ne.s32.totalorder %s29_s17, %s4070_s18  ;;  %p4076_p7 = scmp.lt.s32.totalorder %s4070_s18, %s4070_s18 }
  0x13   :  { %p4077_p8 = por %p4076_p7, %p4075_p6 }
  0x15   :  { %p4078_p9 = pnand %p4077_p8, %p4071_p5 }
  0x17   :  { %4081 = shalt.err (!%p4078_p9)
}
  0x18   :  { %31 = dma.hbm_to_vmem [thread:$0]  %s7133_s1, 32, %s29_s17, [#allocation6]  }
  0x19   :  { %4102 = dma.done.wait [#allocation3], 32768  }
  0x1a   :  { %4103 = vsyncadd [#allocation3], 4294934528 }
  0x1b   :  { %4104 = dma.done.wait [#allocation6], 32  }
  0x1c   :  { %4105 = vsyncadd [#allocation6], 4294967264  ;;  %v42_v0 = vld [vmem:[#allocation2 + $0x20] sm:$0xff]  ;;  %v43_v1 = vld [vmem:[#allocation2 + $0x28] sm:$0xff]  ;;  %s4112_s0 = smov [#allocation7]  }
  0x1d   :  { %v38_v2 = vld [vmem:[#allocation2] sm:$0xff]  ;;  %v299_v3 = vmul.f32 %v42_v0, %v42_v0  ;;  %v300_v4 = vmul.f32 %v43_v1, %v43_v1  ;;  %v39_v5 = vld [vmem:[#allocation2 + $0x8] sm:$0xff]  ;;  %v44_v7 = vld [vmem:[#allocation2 + $0x30] sm:$0xff]  ;;  %s3256_s1 = sshll.u32 %s4112_s0, 4  ;;  %s3257_s1 = int_to_ptr.vmem [resolvable:$true] %s3256_s1 }
  0x1e   :  { %v295_v6 = vmul.f32 %v38_v2, %v38_v2  ;;  %v45_v8 = vld [vmem:[#allocation2 + $0x38] sm:$0xff]  ;;  %v296_v9 = vmul.f32 %v39_v5, %v39_v5  ;;  %v301_v10 = vmul.f32 %v44_v7, %v44_v7  ;;  %v40_v12 = vld [vmem:[#allocation2 + $0x10] sm:$0xff]  ;;  %v46_v19 = vld [vmem:[#allocation2 + $0x40] sm:$0xff]  ;;  %s4082_s21 = scalar_lea.vmem %s3257_s1, 32768  ;;  %p4087_p11 = scmp.lt.s32.totalorder %s3257_s1, %s3257_s1 }
  0x1f   :  { %v302_v11 = vmul.f32 %v45_v8, %v45_v8  ;;  %v41_v13 = vld [vmem:[#allocation2 + $0x18] sm:$0xff]  ;;  %v48_v14 = vld [vmem:[#allocation2 + $0x50] sm:$0xff]  ;;  %v557_v15 = vadd.f32 %v300_v4, %v299_v3  ;;  %v297_v16 = vmul.f32 %v40_v12, %v40_v12  ;;  %v47_v20 = vld [vmem:[#allocation2 + $0x48] sm:$0xff]  ;;  %v303_v26 = vmul.f32 %v46_v19, %v46_v19  ;;  %p4083_p10 = scmp.ne.s32.totalorder %s3257_s1, %s4082_s21  ;;  %p4088_p12 = scmp.lt.s32.totalorder %s4082_s21, %s4082_s21 }
  0x20   :  { %v298_v17 = vmul.f32 %v41_v13, %v41_v13  ;;  %v49_v18 = vld [vmem:[#allocation2 + $0x58] sm:$0xff]  ;;  %v551_v21 = vadd.f32 %v296_v9, %v295_v6  ;;  %v305_v23 = vmul.f32 %v48_v14, %v48_v14  ;;  %v304_v27 = vmul.f32 %v47_v20, %v47_v20  ;;  %v52_v28 = vld [vmem:[#allocation2 + $0x70] sm:$0xff]  ;;  %v50_v30 = vld [vmem:[#allocation2 + $0x60] sm:$0xff] }
  0x21   :  { %558 = vadd.xlane.f32.xlu1 %v557_v15  ;;  %v560_v22 = vadd.f32 %v302_v11, %v301_v10  ;;  %v306_v24 = vmul.f32 %v49_v18, %v49_v18  ;;  %v53_v29 = vld [vmem:[#allocation2 + $0x78] sm:$0xff]  ;;  %v51_v31 = vld [vmem:[#allocation2 + $0x68] sm:$0xff]  ;;  %v309_v33 = vmul.f32 %v52_v28, %v52_v28  ;;  %v307_v36 = vmul.f32 %v50_v30, %v50_v30  ;;  %v56_v38 = vld [vmem:[#allocation2 + $0x90] sm:$0xff]  ;;  %p4089_p13 = por %p4088_p12, %p4087_p11 }
  0x22   :  { %552 = vadd.xlane.f32.xlu0 %v551_v21  ;;  %v554_v25 = vadd.f32 %v298_v17, %v297_v16  ;;  %v310_v34 = vmul.f32 %v53_v29, %v53_v29  ;;  %v563_v35 = vadd.f32 %v304_v27, %v303_v26  ;;  %v308_v37 = vmul.f32 %v51_v31, %v51_v31  ;;  %v57_v39 = vld [vmem:[#allocation2 + $0x98] sm:$0xff]  ;;  %v54_v40 = vld [vmem:[#allocation2 + $0x80] sm:$0xff]  ;;  %v55_v41 = vld [vmem:[#allocation2 + $0x88] sm:$0xff] }
  0x23   :  { %v566_v32 = vadd.f32 %v306_v24, %v305_v23  ;;  %v313_v43 = vmul.f32 %v56_v38, %v56_v38  ;;  %v314_v44 = vmul.f32 %v57_v39, %v57_v39  ;;  %v311_v46 = vmul.f32 %v54_v40, %v54_v40  ;;  %v60_v48 = vld [vmem:[#allocation2 + $0xb0] sm:$0xff]  ;;  %v61_v49 = vld [vmem:[#allocation2 + $0xb8] sm:$0xff]  ;;  %v58_v50 = vld [vmem:[#allocation2 + $0xa0] sm:$0xff]  ;;  %p4090_p0 = pnand %p4089_p13, %p4083_p10 }
  0x24   :  { %v572_v42 = vadd.f32 %v310_v34, %v309_v33  ;;  %v569_v45 = vadd.f32 %v308_v37, %v307_v36  ;;  %v312_v47 = vmul.f32 %v55_v41, %v55_v41  ;;  %v59_v51 = vld [vmem:[#allocation2 + $0xa8] sm:$0xff]  ;;  %v317_v53 = vmul.f32 %v60_v48, %v60_v48  ;;  %v64_v58 = vld [vmem:[#allocation2 + $0xd0] sm:$0xff]  ;;  %v65_v59 = vld [vmem:[#allocation2 + $0xd8] sm:$0xff] }
  0x25   :  { %561 = vadd.xlane.f32.xlu1 %v560_v22  ;;  %v578_v52 = vadd.f32 %v314_v44, %v313_v43  ;;  %v318_v54 = vmul.f32 %v61_v49, %v61_v49  ;;  %v315_v56 = vmul.f32 %v58_v50, %v58_v50  ;;  %v316_v57 = vmul.f32 %v59_v51, %v59_v51  ;;  %v62_v60 = vld [vmem:[#allocation2 + $0xc0] sm:$0xff]  ;;  %v63_v61 = vld [vmem:[#allocation2 + $0xc8] sm:$0xff]  ;;  %v68_v4 = vld [vmem:[#allocation2 + $0xf0] sm:$0xff] }
  0x26   :  { %555 = vadd.xlane.f32.xlu0 %v554_v25  ;;  %v575_v55 = vadd.f32 %v312_v47, %v311_v46  ;;  %v321_v63 = vmul.f32 %v64_v58, %v64_v58  ;;  %v322_v0 = vmul.f32 %v65_v59, %v65_v59  ;;  %v319_v2 = vmul.f32 %v62_v60, %v62_v60  ;;  %v69_v5 = vld [vmem:[#allocation2 + $0xf8] sm:$0xff]  ;;  %v66_v6 = vld [vmem:[#allocation2 + $0xe0] sm:$0xff]  ;;  %v67_v7 = vld [vmem:[#allocation2 + $0xe8] sm:$0xff] }
  0x27   :  { %v584_v62 = vadd.f32 %v318_v54, %v317_v53  ;;  %v581_v1 = vadd.f32 %v316_v57, %v315_v56  ;;  %v320_v3 = vmul.f32 %v63_v61, %v63_v61  ;;  %v325_v9 = vmul.f32 %v68_v4, %v68_v4  ;;  %v72_v14 = vld [vmem:[#allocation2 + $0x110] sm:$0xff]  ;;  %v73_v15 = vld [vmem:[#allocation2 + $0x118] sm:$0xff]  ;;  %v70_v16 = vld [vmem:[#allocation2 + $0x100] sm:$0xff] }
  0x28   :  { %v590_v8 = vadd.f32 %v322_v0, %v321_v63  ;;  %v326_v10 = vmul.f32 %v69_v5, %v69_v5  ;;  %v323_v12 = vmul.f32 %v66_v6, %v66_v6  ;;  %v324_v13 = vmul.f32 %v67_v7, %v67_v7  ;;  %v71_v17 = vld [vmem:[#allocation2 + $0x108] sm:$0xff]  ;;  %v76_v24 = vld [vmem:[#allocation2 + $0x130] sm:$0xff]  ;;  %v77_v25 = vld [vmem:[#allocation2 + $0x138] sm:$0xff] }
  0x29   :  { %567 = vadd.xlane.f32.xlu1 %v566_v32  ;;  %v587_v11 = vadd.f32 %v320_v3, %v319_v2  ;;  %v329_v19 = vmul.f32 %v72_v14, %v72_v14  ;;  %v330_v20 = vmul.f32 %v73_v15, %v73_v15  ;;  %v327_v22 = vmul.f32 %v70_v16, %v70_v16  ;;  %v74_v26 = vld [vmem:[#allocation2 + $0x120] sm:$0xff]  ;;  %v75_v27 = vld [vmem:[#allocation2 + $0x128] sm:$0xff]  ;;  %v80_v34 = vld [vmem:[#allocation2 + $0x150] sm:$0xff] }
  0x2a   :  { %564 = vadd.xlane.f32.xlu0 %v563_v35  ;;  %v596_v18 = vadd.f32 %v326_v10, %v325_v9  ;;  %v593_v21 = vadd.f32 %v324_v13, %v323_v12  ;;  %v328_v23 = vmul.f32 %v71_v17, %v71_v17  ;;  %v333_v29 = vmul.f32 %v76_v24, %v76_v24  ;;  %v81_v35 = vld [vmem:[#allocation2 + $0x158] sm:$0xff]  ;;  %v78_v36 = vld [vmem:[#allocation2 + $0x140] sm:$0xff]  ;;  %v79_v37 = vld [vmem:[#allocation2 + $0x148] sm:$0xff] }
  0x2b   :  { %v602_v28 = vadd.f32 %v330_v20, %v329_v19  ;;  %v334_v30 = vmul.f32 %v77_v25, %v77_v25  ;;  %v331_v32 = vmul.f32 %v74_v26, %v74_v26  ;;  %v332_v33 = vmul.f32 %v75_v27, %v75_v27  ;;  %v84_v44 = vld [vmem:[#allocation2 + $0x170] sm:$0xff]  ;;  %v82_v46 = vld [vmem:[#allocation2 + $0x160] sm:$0xff]  ;;  %v83_v47 = vld [vmem:[#allocation2 + $0x168] sm:$0xff] }
  0x2c   :  { %v599_v31 = vadd.f32 %v328_v23, %v327_v22  ;;  %v337_v39 = vmul.f32 %v80_v34, %v80_v34  ;;  %v338_v40 = vmul.f32 %v81_v35, %v81_v35  ;;  %v336_v43 = vmul.f32 %v79_v37, %v79_v37  ;;  %v88_v54 = vld [vmem:[#allocation2 + $0x190] sm:$0xff]  ;;  %v86_v56 = vld [vmem:[#allocation2 + $0x180] sm:$0xff]  ;;  %v87_v57 = vld [vmem:[#allocation2 + $0x188] sm:$0xff] }
  0x2d   :  { %573 = vadd.xlane.f32.xlu1 %v572_v42  ;;  %v608_v38 = vadd.f32 %v334_v30, %v333_v29  ;;  %v605_v41 = vadd.f32 %v332_v33, %v331_v32  ;;  %v335_v42 = vmul.f32 %v78_v36, %v78_v36  ;;  %v341_v49 = vmul.f32 %v84_v44, %v84_v44  ;;  %v92_v0 = vld [vmem:[#allocation2 + $0x1b0] sm:$0xff]  ;;  %v90_v2 = vld [vmem:[#allocation2 + $0x1a0] sm:$0xff]  ;;  %v91_v3 = vld [vmem:[#allocation2 + $0x1a8] sm:$0xff] }
  0x2e   :  { %570 = vadd.xlane.f32.xlu0 %v569_v45  ;;  %v85_v45 = vld [vmem:[#allocation2 + $0x178] sm:$0xff]  ;;  %v614_v48 = vadd.f32 %v338_v40, %v337_v39  ;;  %v340_v53 = vmul.f32 %v83_v47, %v83_v47  ;;  %v345_v59 = vmul.f32 %v88_v54, %v88_v54  ;;  %v344_v63 = vmul.f32 %v87_v57, %v87_v57  ;;  %v96_v10 = vld [vmem:[#allocation2 + $0x1d0] sm:$0xff]  ;;  %v94_v12 = vld [vmem:[#allocation2 + $0x1c0] sm:$0xff] }
  0x2f   :  { %v342_v50 = vmul.f32 %v85_v45, %v85_v45  ;;  %v611_v51 = vadd.f32 %v336_v43, %v335_v42  ;;  %v349_v5 = vmul.f32 %v92_v0, %v92_v0  ;;  %v348_v9 = vmul.f32 %v91_v3, %v91_v3  ;;  %v95_v13 = vld [vmem:[#allocation2 + $0x1c8] sm:$0xff]  ;;  %v100_v20 = vld [vmem:[#allocation2 + $0x1f0] sm:$0xff]  ;;  %v98_v22 = vld [vmem:[#allocation2 + $0x1e0] sm:$0xff] }
  0x30   :  { %v353_v15 = vmul.f32 %v96_v10, %v96_v10  ;;  %v352_v19 = vmul.f32 %v95_v13, %v95_v13  ;;  %v99_v23 = vld [vmem:[#allocation2 + $0x1e8] sm:$0xff]  ;;  %v357_v25 = vmul.f32 %v100_v20, %v100_v20  ;;  %v104_v30 = vld [vmem:[#allocation2 + $0x210] sm:$0xff]  ;;  %v102_v32 = vld [vmem:[#allocation2 + $0x200] sm:$0xff] }
  0x31   :  { %579 = vadd.xlane.f32.xlu1 %v578_v52  ;;  %v339_v52 = vmul.f32 %v82_v46, %v82_v46  ;;  %v620_v58 = vadd.f32 %v342_v50, %v341_v49  ;;  %v356_v29 = vmul.f32 %v99_v23, %v99_v23  ;;  %v103_v33 = vld [vmem:[#allocation2 + $0x208] sm:$0xff]  ;;  %v361_v35 = vmul.f32 %v104_v30, %v104_v30  ;;  %v108_v40 = vld [vmem:[#allocation2 + $0x230] sm:$0xff]  ;;  %v106_v42 = vld [vmem:[#allocation2 + $0x220] sm:$0xff] }
  0x32   :  { %576 = vadd.xlane.f32.xlu0 %v575_v55  ;;  %v89_v55 = vld [vmem:[#allocation2 + $0x198] sm:$0xff]  ;;  %v360_v39 = vmul.f32 %v103_v33, %v103_v33  ;;  %v107_v43 = vld [vmem:[#allocation2 + $0x228] sm:$0xff]  ;;  %v365_v45 = vmul.f32 %v108_v40, %v108_v40  ;;  %v112_v50 = vld [vmem:[#allocation2 + $0x250] sm:$0xff] }
  0x33   :  { %v346_v60 = vmul.f32 %v89_v55, %v89_v55  ;;  %v617_v61 = vadd.f32 %v340_v53, %v339_v52  ;;  %v364_v49 = vmul.f32 %v107_v43, %v107_v43  ;;  %v110_v52 = vld [vmem:[#allocation2 + $0x240] sm:$0xff]  ;;  %v111_v53 = vld [vmem:[#allocation2 + $0x248] sm:$0xff]  ;;  %v369_v55 = vmul.f32 %v112_v50, %v112_v50 }
  0x35   :  { %585 = vadd.xlane.f32.xlu1 %v584_v62  ;;  %v343_v62 = vmul.f32 %v86_v56, %v86_v56  ;;  %v626_v4 = vadd.f32 %v346_v60, %v345_v59  ;;  %v368_v59 = vmul.f32 %v111_v53, %v111_v53  ;;  %v116_v60 = vld [vmem:[#allocation2 + $0x270] sm:$0xff] }
  0x36   :  { %582 = vadd.xlane.f32.xlu0 %v581_v1  ;;  %v93_v1 = vld [vmem:[#allocation2 + $0x1b8] sm:$0xff] }
  0x37   :  { %v350_v6 = vmul.f32 %v93_v1, %v93_v1  ;;  %v623_v7 = vadd.f32 %v344_v63, %v343_v62  ;;  %v114_v62 = vld [vmem:[#allocation2 + $0x260] sm:$0xff]  ;;  %v115_v63 = vld [vmem:[#allocation2 + $0x268] sm:$0xff]  ;;  %v373_v1 = vmul.f32 %v116_v60, %v116_v60 }
  0x39   :  { %591 = vadd.xlane.f32.xlu1 %v590_v8  ;;  %v347_v8 = vmul.f32 %v90_v2, %v90_v2  ;;  %v632_v14 = vadd.f32 %v350_v6, %v349_v5  ;;  %v372_v5 = vmul.f32 %v115_v63, %v115_v63  ;;  %v120_v6 = vld [vmem:[#allocation2 + $0x290] sm:$0xff] }
  0x3a   :  { %588 = vadd.xlane.f32.xlu0 %v587_v11  ;;  %v97_v11 = vld [vmem:[#allocation2 + $0x1d8] sm:$0xff] }
  0x3b   :  { %v354_v16 = vmul.f32 %v97_v11, %v97_v11  ;;  %v629_v17 = vadd.f32 %v348_v9, %v347_v8  ;;  %v118_v8 = vld [vmem:[#allocation2 + $0x280] sm:$0xff]  ;;  %v119_v9 = vld [vmem:[#allocation2 + $0x288] sm:$0xff]  ;;  %v377_v11 = vmul.f32 %v120_v6, %v120_v6 }
  0x3d   :  { %597 = vadd.xlane.f32.xlu1 %v596_v18  ;;  %v351_v18 = vmul.f32 %v94_v12, %v94_v12  ;;  %v638_v24 = vadd.f32 %v354_v16, %v353_v15  ;;  %v376_v15 = vmul.f32 %v119_v9, %v119_v9  ;;  %v124_v16 = vld [vmem:[#allocation2 + $0x2b0] sm:$0xff] }
  0x3e   :  { %594 = vadd.xlane.f32.xlu0 %v593_v21  ;;  %v101_v21 = vld [vmem:[#allocation2 + $0x1f8] sm:$0xff] }
  0x3f   :  { %v358_v26 = vmul.f32 %v101_v21, %v101_v21  ;;  %v635_v27 = vadd.f32 %v352_v19, %v351_v18  ;;  %v122_v18 = vld [vmem:[#allocation2 + $0x2a0] sm:$0xff]  ;;  %v123_v19 = vld [vmem:[#allocation2 + $0x2a8] sm:$0xff]  ;;  %v381_v21 = vmul.f32 %v124_v16, %v124_v16 }
  0x41   :  { %603 = vadd.xlane.f32.xlu1 %v602_v28  ;;  %v355_v28 = vmul.f32 %v98_v22, %v98_v22  ;;  %v644_v34 = vadd.f32 %v358_v26, %v357_v25  ;;  %v380_v25 = vmul.f32 %v123_v19, %v123_v19  ;;  %v128_v26 = vld [vmem:[#allocation2 + $0x2d0] sm:$0xff] }
  0x42   :  { %600 = vadd.xlane.f32.xlu0 %v599_v31  ;;  %v105_v31 = vld [vmem:[#allocation2 + $0x218] sm:$0xff] }
  0x43   :  { %v362_v36 = vmul.f32 %v105_v31, %v105_v31  ;;  %v641_v37 = vadd.f32 %v356_v29, %v355_v28  ;;  %v126_v28 = vld [vmem:[#allocation2 + $0x2c0] sm:$0xff]  ;;  %v127_v29 = vld [vmem:[#allocation2 + $0x2c8] sm:$0xff]  ;;  %v385_v31 = vmul.f32 %v128_v26, %v128_v26 }
  0x45   :  { %609 = vadd.xlane.f32.xlu1 %v608_v38  ;;  %v359_v38 = vmul.f32 %v102_v32, %v102_v32  ;;  %v650_v44 = vadd.f32 %v362_v36, %v361_v35  ;;  %v384_v35 = vmul.f32 %v127_v29, %v127_v29  ;;  %v132_v36 = vld [vmem:[#allocation2 + $0x2f0] sm:$0xff] }
  0x46   :  { %606 = vadd.xlane.f32.xlu0 %v605_v41  ;;  %v109_v41 = vld [vmem:[#allocation2 + $0x238] sm:$0xff]  ;;  %v156_v29 = vld [vmem:[#allocation2 + $0x3b0] sm:$0xff] }
  0x47   :  { %v366_v46 = vmul.f32 %v109_v41, %v109_v41  ;;  %v647_v47 = vadd.f32 %v360_v39, %v359_v38  ;;  %v130_v38 = vld [vmem:[#allocation2 + $0x2e0] sm:$0xff]  ;;  %v131_v39 = vld [vmem:[#allocation2 + $0x2e8] sm:$0xff]  ;;  %v389_v41 = vmul.f32 %v132_v36, %v132_v36  ;;  %v413_v36 = vmul.f32 %v156_v29, %v156_v29 }
  0x49   :  { %615 = vadd.xlane.f32.xlu1 %v614_v48  ;;  %v363_v48 = vmul.f32 %v106_v42, %v106_v42  ;;  %v656_v54 = vadd.f32 %v366_v46, %v365_v45  ;;  %v388_v45 = vmul.f32 %v131_v39, %v131_v39  ;;  %v136_v46 = vld [vmem:[#allocation2 + $0x310] sm:$0xff] }
  0x4a   :  { %612 = vadd.xlane.f32.xlu0 %v611_v51  ;;  %v113_v51 = vld [vmem:[#allocation2 + $0x258] sm:$0xff] }
  0x4b   :  { %v370_v56 = vmul.f32 %v113_v51, %v113_v51  ;;  %v653_v57 = vadd.f32 %v364_v49, %v363_v48  ;;  %v134_v48 = vld [vmem:[#allocation2 + $0x300] sm:$0xff]  ;;  %v135_v49 = vld [vmem:[#allocation2 + $0x308] sm:$0xff]  ;;  %v393_v51 = vmul.f32 %v136_v46, %v136_v46  ;;  %v164_v46 = vld [vmem:[#allocation2 + $0x3f0] sm:$0xff] }
  0x4d   :  { %621 = vadd.xlane.f32.xlu1 %v620_v58  ;;  %v367_v58 = vmul.f32 %v110_v52, %v110_v52  ;;  %v662_v0 = vadd.f32 %v370_v56, %v369_v55  ;;  %v392_v55 = vmul.f32 %v135_v49, %v135_v49  ;;  %v140_v56 = vld [vmem:[#allocation2 + $0x330] sm:$0xff]  ;;  %v163_v49 = vld [vmem:[#allocation2 + $0x3e8] sm:$0xff] }
  0x4e   :  { %618 = vadd.xlane.f32.xlu0 %v617_v61  ;;  %v117_v61 = vld [vmem:[#allocation2 + $0x278] sm:$0xff] }
  0x4f   :  { %v374_v2 = vmul.f32 %v117_v61, %v117_v61  ;;  %v659_v3 = vadd.f32 %v368_v59, %v367_v58  ;;  %v138_v58 = vld [vmem:[#allocation2 + $0x320] sm:$0xff]  ;;  %v139_v59 = vld [vmem:[#allocation2 + $0x328] sm:$0xff]  ;;  %v397_v61 = vmul.f32 %v140_v56, %v140_v56 }
  0x51   :  { %627 = vadd.xlane.f32.xlu1 %v626_v4  ;;  %v371_v4 = vmul.f32 %v114_v62, %v114_v62  ;;  %v668_v10 = vadd.f32 %v374_v2, %v373_v1  ;;  %v396_v1 = vmul.f32 %v139_v59, %v139_v59  ;;  %v144_v2 = vld [vmem:[#allocation2 + $0x350] sm:$0xff]  ;;  %v167_v59 = vld [vmem:[#allocation2 + $0x408] sm:$0xff] }
  0x52   :  { %624 = vadd.xlane.f32.xlu0 %v623_v7  ;;  %v121_v7 = vld [vmem:[#allocation2 + $0x298] sm:$0xff] }
  0x53   :  { %v378_v12 = vmul.f32 %v121_v7, %v121_v7  ;;  %v665_v13 = vadd.f32 %v372_v5, %v371_v4  ;;  %v142_v4 = vld [vmem:[#allocation2 + $0x340] sm:$0xff]  ;;  %v143_v5 = vld [vmem:[#allocation2 + $0x348] sm:$0xff]  ;;  %v401_v7 = vmul.f32 %v144_v2, %v144_v2  ;;  %v172_v2 = vld [vmem:[#allocation2 + $0x430] sm:$0xff] }
  0x55   :  { %633 = vadd.xlane.f32.xlu1 %v632_v14  ;;  %v375_v14 = vmul.f32 %v118_v8, %v118_v8  ;;  %v674_v20 = vadd.f32 %v378_v12, %v377_v11  ;;  %v400_v11 = vmul.f32 %v143_v5, %v143_v5  ;;  %v148_v12 = vld [vmem:[#allocation2 + $0x370] sm:$0xff] }
  0x56   :  { %630 = vadd.xlane.f32.xlu0 %v629_v17  ;;  %v125_v17 = vld [vmem:[#allocation2 + $0x2b8] sm:$0xff] }
  0x57   :  { %v382_v22 = vmul.f32 %v125_v17, %v125_v17  ;;  %v671_v23 = vadd.f32 %v376_v15, %v375_v14  ;;  %v146_v14 = vld [vmem:[#allocation2 + $0x360] sm:$0xff]  ;;  %v147_v15 = vld [vmem:[#allocation2 + $0x368] sm:$0xff]  ;;  %v405_v17 = vmul.f32 %v148_v12, %v148_v12 }
  0x58   :  { %v174_v12 = vld [vmem:[#allocation2 + $0x440] sm:$0xff] }
  0x59   :  { %639 = vadd.xlane.f32.xlu1 %v638_v24  ;;  %v379_v24 = vmul.f32 %v122_v18, %v122_v18  ;;  %v680_v30 = vadd.f32 %v382_v22, %v381_v21  ;;  %v404_v21 = vmul.f32 %v147_v15, %v147_v15  ;;  %v152_v22 = vld [vmem:[#allocation2 + $0x390] sm:$0xff] }
  0x5a   :  { %636 = vadd.xlane.f32.xlu0 %v635_v27  ;;  %v129_v27 = vld [vmem:[#allocation2 + $0x2d8] sm:$0xff] }
  0x5b   :  { %v386_v32 = vmul.f32 %v129_v27, %v129_v27  ;;  %v677_v33 = vadd.f32 %v380_v25, %v379_v24  ;;  %v150_v24 = vld [vmem:[#allocation2 + $0x380] sm:$0xff]  ;;  %v151_v25 = vld [vmem:[#allocation2 + $0x388] sm:$0xff]  ;;  %v409_v27 = vmul.f32 %v152_v22, %v152_v22 }
  0x5d   :  { %645 = vadd.xlane.f32.xlu1 %v644_v34  ;;  %v383_v34 = vmul.f32 %v126_v28, %v126_v28  ;;  %v686_v40 = vadd.f32 %v386_v32, %v385_v31  ;;  %v407_v32 = vmul.f32 %v150_v24, %v150_v24 }
  0x5e   :  { %642 = vadd.xlane.f32.xlu0 %v641_v37  ;;  %v133_v37 = vld [vmem:[#allocation2 + $0x2f8] sm:$0xff] }
  0x5f   :  { %v390_v42 = vmul.f32 %v133_v37, %v133_v37  ;;  %v683_v43 = vadd.f32 %v384_v35, %v383_v34  ;;  %v154_v34 = vld [vmem:[#allocation2 + $0x3a0] sm:$0xff]  ;;  %v155_v35 = vld [vmem:[#allocation2 + $0x3a8] sm:$0xff] }
  0x60   :  { %v411_v39 = vmul.f32 %v154_v34, %v154_v34  ;;  %v183_v34 = vld [vmem:[#allocation2 + $0x488] sm:$0xff] }
  0x61   :  { %651 = vadd.xlane.f32.xlu1 %v650_v44  ;;  %v387_v44 = vmul.f32 %v130_v38, %v130_v38  ;;  %v692_v50 = vadd.f32 %v390_v42, %v389_v41  ;;  %v160_v41 = vld [vmem:[#allocation2 + $0x3d0] sm:$0xff]  ;;  %v161_v42 = vld [vmem:[#allocation2 + $0x3d8] sm:$0xff] }
  0x62   :  { %648 = vadd.xlane.f32.xlu0 %v647_v47  ;;  %v137_v47 = vld [vmem:[#allocation2 + $0x318] sm:$0xff] }
  0x63   :  { %v394_v52 = vmul.f32 %v137_v47, %v137_v47  ;;  %v689_v53 = vadd.f32 %v388_v45, %v387_v44  ;;  %v158_v44 = vld [vmem:[#allocation2 + $0x3c0] sm:$0xff]  ;;  %v159_v45 = vld [vmem:[#allocation2 + $0x3c8] sm:$0xff]  ;;  %v165_v47 = vld [vmem:[#allocation2 + $0x3f8] sm:$0xff] }
  0x64   :  { %v415_v56 = vmul.f32 %v158_v44, %v158_v44 }
  0x65   :  { %657 = vadd.xlane.f32.xlu1 %v656_v54  ;;  %v391_v54 = vmul.f32 %v134_v48, %v134_v48  ;;  %v698_v60 = vadd.f32 %v394_v52, %v393_v51  ;;  %v162_v48 = vld [vmem:[#allocation2 + $0x3e0] sm:$0xff]  ;;  %v417_v51 = vmul.f32 %v160_v41, %v160_v41  ;;  %v168_v52 = vld [vmem:[#allocation2 + $0x410] sm:$0xff] }
  0x66   :  { %654 = vadd.xlane.f32.xlu0 %v653_v57  ;;  %v141_v57 = vld [vmem:[#allocation2 + $0x338] sm:$0xff] }
  0x67   :  { %v398_v62 = vmul.f32 %v141_v57, %v141_v57  ;;  %v695_v63 = vadd.f32 %v392_v55, %v391_v54  ;;  %v418_v55 = vmul.f32 %v161_v42, %v161_v42  ;;  %v416_v57 = vmul.f32 %v159_v45, %v159_v45  ;;  %v186_v45 = vld [vmem:[#allocation2 + $0x4a0] sm:$0xff] }
  0x69   :  { %663 = vadd.xlane.f32.xlu1 %v662_v0  ;;  %v395_v0 = vmul.f32 %v138_v58, %v138_v58  ;;  %v704_v6 = vadd.f32 %v398_v62, %v397_v61  ;;  %v166_v58 = vld [vmem:[#allocation2 + $0x400] sm:$0xff]  ;;  %v422_v61 = vmul.f32 %v165_v47, %v165_v47  ;;  %v419_v62 = vmul.f32 %v162_v48, %v162_v48 }
  0x6a   :  { %660 = vadd.xlane.f32.xlu0 %v659_v3  ;;  %v145_v3 = vld [vmem:[#allocation2 + $0x358] sm:$0xff]  ;;  %v423_v5 = vmul.f32 %v166_v58, %v166_v58  ;;  %v191_v58 = vld [vmem:[#allocation2 + $0x4c8] sm:$0xff] }
  0x6b   :  { %v402_v8 = vmul.f32 %v145_v3, %v145_v3  ;;  %v701_v9 = vadd.f32 %v396_v1, %v395_v0  ;;  %v425_v0 = vmul.f32 %v168_v52, %v168_v52  ;;  %v173_v3 = vld [vmem:[#allocation2 + $0x438] sm:$0xff] }
  0x6c   :  { %v430_v22 = vmul.f32 %v173_v3, %v173_v3  ;;  %v193_v52 = vld [vmem:[#allocation2 + $0x4d8] sm:$0xff] }
  0x6d   :  { %669 = vadd.xlane.f32.xlu1 %v668_v10  ;;  %v399_v10 = vmul.f32 %v142_v4, %v142_v4  ;;  %v710_v16 = vadd.f32 %v402_v8, %v401_v7  ;;  %v2729_v4 = vlaneseq  ;;  %v170_v7 = vld [vmem:[#allocation2 + $0x420] sm:$0xff]  ;;  %v171_v8 = vld [vmem:[#allocation2 + $0x428] sm:$0xff] }
  0x6e   :  { %666 = vadd.xlane.f32.xlu0 %v665_v13  ;;  %v149_v13 = vld [vmem:[#allocation2 + $0x378] sm:$0xff]  ;;  %v428_v29 = vmul.f32 %v171_v8, %v171_v8 }
  0x6f   :  { %v406_v18 = vmul.f32 %v149_v13, %v149_v13  ;;  %v707_v19 = vadd.f32 %v400_v11, %v399_v10  ;;  %v734_v10 = vadd.f32 %v418_v55, %v417_v51  ;;  %v177_v11 = vld [vmem:[#allocation2 + $0x458] sm:$0xff]  ;;  %v175_v13 = vld [vmem:[#allocation2 + $0x448] sm:$0xff]  ;;  %v2730_v24 = vshrl.u32 %v2729_v4, 7  ;;  %v192_v51 = vld [vmem:[#allocation2 + $0x4d0] sm:$0xff] }
  0x70   :  { %v201_v8 = vld [vmem:[#allocation2 + $0x518] sm:$0xff] }
  0x71   :  { %675 = vadd.xlane.f32.xlu1 %v674_v20  ;;  %v403_v20 = vmul.f32 %v146_v14, %v146_v14  ;;  %v716_v26 = vadd.f32 %v406_v18, %v405_v17  ;;  %v731_v14 = vadd.f32 %v416_v57, %v415_v56  ;;  %v429_v17 = vmul.f32 %v172_v2, %v172_v2  ;;  %v294_v18 = vld [vmem:[#allocation5] sm:$0x3]  ;;  %v195_v2 = vld [vmem:[#allocation2 + $0x4e8] sm:$0xff] }
  0x72   :  { %672 = vadd.xlane.f32.xlu0 %v671_v23  ;;  %v153_v23 = vld [vmem:[#allocation2 + $0x398] sm:$0xff]  ;;  %v2731_v47 = vsub.s32 0, %v2730_v24  ;;  %v190_v57 = vld [vmem:[#allocation2 + $0x4c0] sm:$0xff] }
  0x73   :  { %v410_v28 = vmul.f32 %v153_v23, %v153_v23  ;;  %v713_v31 = vadd.f32 %v404_v21, %v403_v20  ;;  %v181_v20 = vld [vmem:[#allocation2 + $0x478] sm:$0xff]  ;;  %v427_v23 = vmul.f32 %v170_v7, %v170_v7  ;;  %v200_v7 = vld [vmem:[#allocation2 + $0x510] sm:$0xff] }
  0x74   :  { %v438_v41 = vmul.f32 %v181_v20, %v181_v20  ;;  %v448_v20 = vmul.f32 %v191_v58, %v191_v58 }
  0x75   :  { %681 = vadd.xlane.f32.xlu1 %v680_v30  ;;  %v157_v30 = vld [vmem:[#allocation2 + $0x3b8] sm:$0xff]  ;;  %v722_v38 = vadd.f32 %v410_v28, %v409_v27  ;;  %v184_v27 = vld [vmem:[#allocation2 + $0x490] sm:$0xff] }
  0x76   :  { %678 = vadd.xlane.f32.xlu0 %v677_v33  ;;  %v408_v33 = vmul.f32 %v151_v25, %v151_v25  ;;  %v414_v37 = vmul.f32 %v157_v30, %v157_v30  ;;  %v178_v25 = vld [vmem:[#allocation2 + $0x460] sm:$0xff]  ;;  %v441_v44 = vmul.f32 %v184_v27, %v184_v27 }
  0x77   :  { %v435_v42 = vmul.f32 %v178_v25, %v178_v25 }
  0x79   :  { %687 = vadd.xlane.f32.xlu1 %v686_v40  ;;  %v412_v40 = vmul.f32 %v155_v35, %v155_v35  ;;  %v431_v35 = vmul.f32 %v174_v12, %v174_v12 }
  0x7a   :  { %684 = vadd.xlane.f32.xlu0 %v683_v43  ;;  %v719_v43 = vadd.f32 %v408_v33, %v407_v32  ;;  %v185_v32 = vld [vmem:[#allocation2 + $0x498] sm:$0xff]  ;;  %v182_v33 = vld [vmem:[#allocation2 + $0x480] sm:$0xff] }
  0x7b   :  { %v725_v54 = vadd.f32 %v412_v40, %v411_v39  ;;  %v188_v39 = vld [vmem:[#allocation2 + $0x4b0] sm:$0xff]  ;;  %v189_v40 = vld [vmem:[#allocation2 + $0x4b8] sm:$0xff]  ;;  %v442_v48 = vmul.f32 %v185_v32, %v185_v32  ;;  %v207_v32 = vld [vmem:[#allocation2 + $0x548] sm:$0xff] }
  0x7c   :  { %v445_v55 = vmul.f32 %v188_v39, %v188_v39  ;;  %v446_v56 = vmul.f32 %v189_v40, %v189_v40  ;;  %v210_v39 = vld [vmem:[#allocation2 + $0x560] sm:$0xff] }
  0x7d   :  { %693 = vadd.xlane.f32.xlu1 %v692_v50  ;;  %v728_v50 = vadd.f32 %v414_v37, %v413_v36  ;;  %v432_v36 = vmul.f32 %v175_v13, %v175_v13  ;;  %v2727_v37 = vmul.f32 16.0, %v294_v18  ;;  %v4155_v12 = vadd.f32 %v442_v48, %v441_v44  ;;  %v216_v44 = vld [vmem:[#allocation2 + $0x590] sm:$0xff] }
  0x7e   :  { %690 = vadd.xlane.f32.xlu0 %v689_v53  ;;  %v169_v53 = vld [vmem:[#allocation2 + $0x418] sm:$0xff]  ;;  %v4161_v18 = vadd.f32 %v446_v56, %v445_v55  ;;  %v220_v56 = vld [vmem:[#allocation2 + $0x5b0] sm:$0xff]  ;;  %v467_v58 = vmul.f32 %v210_v39, %v210_v39 }
  0x7f   :  { %v426_v1 = vmul.f32 %v169_v53, %v169_v53  ;;  %v4141_v53 = vadd.f32 %v430_v22, %v429_v17  ;;  %v4147_v3 = vadd.f32 %v432_v36, %v431_v35  ;;  %v202_v22 = vld [vmem:[#allocation2 + $0x520] sm:$0xff]  ;;  %v457_v35 = vmul.f32 %v200_v7, %v200_v7  ;;  %v232_v39 = vld [vmem:[#allocation2 + $0x610] sm:$0xff] }
  0x80   :  { %v458_v36 = vmul.f32 %v201_v8, %v201_v8  ;;  %v477_v8 = vmul.f32 %v220_v56, %v220_v56 }
  0x81   :  { %699 = vadd.xlane.f32.xlu1 %v698_v60  ;;  %v421_v60 = vmul.f32 %v164_v46, %v164_v46  ;;  %v4137_v21 = vadd.f32 %v426_v1, %v425_v0  ;;  %v187_v46 = vld [vmem:[#allocation2 + $0x4a8] sm:$0xff]  ;;  %v197_v0 = vld [vmem:[#allocation2 + $0x4f8] sm:$0xff]  ;;  %v194_v1 = vld [vmem:[#allocation2 + $0x4e0] sm:$0xff] }
  0x82   :  { %696 = vadd.xlane.f32.xlu0 %v695_v63  ;;  %v420_v63 = vmul.f32 %v163_v49, %v163_v49  ;;  %v439_v49 = vmul.f32 %v182_v33, %v182_v33  ;;  %v454_v27 = vmul.f32 %v197_v0, %v197_v0  ;;  %v4177_v7 = vadd.f32 %v458_v36, %v457_v35  ;;  %v227_v35 = vld [vmem:[#allocation2 + $0x5e8] sm:$0xff] }
  0x83   :  { %v740_v15 = vadd.f32 %v422_v61, %v421_v60  ;;  %v4143_v60 = vadd.f32 %v428_v29, %v427_v23  ;;  %v203_v23 = vld [vmem:[#allocation2 + $0x528] sm:$0xff]  ;;  %v451_v29 = vmul.f32 %v194_v1, %v194_v1  ;;  %v484_v56 = vmul.f32 %v227_v35, %v227_v35 }
  0x85   :  { %705 = vadd.xlane.f32.xlu1 %v704_v6  ;;  %v424_v6 = vmul.f32 %v167_v59, %v167_v59  ;;  %v196_v59 = vld [vmem:[#allocation2 + $0x4f0] sm:$0xff] }
  0x86   :  { %702 = vadd.xlane.f32.xlu0 %v701_v9  ;;  %v176_v9 = vld [vmem:[#allocation2 + $0x450] sm:$0xff] }
  0x87   :  { %v4139_v28 = vadd.f32 %v424_v6, %v423_v5  ;;  %v433_v30 = vmul.f32 %v176_v9, %v176_v9  ;;  %v449_v5 = vmul.f32 %v192_v51, %v192_v51  ;;  %v450_v6 = vmul.f32 %v193_v52, %v193_v52  ;;  %v198_v9 = vld [vmem:[#allocation2 + $0x500] sm:$0xff] }
  0x88   :  { %v455_v40 = vmul.f32 %v198_v9, %v198_v9  ;;  %v464_v52 = vmul.f32 %v207_v32, %v207_v32  ;;  %v229_v32 = vld [vmem:[#allocation2 + $0x5f8] sm:$0xff] }
  0x89   :  { %711 = vadd.xlane.f32.xlu1 %v710_v16  ;;  %v737_v16 = vadd.f32 %v420_v63, %v419_v62  ;;  %v443_v62 = vmul.f32 %v186_v45, %v186_v45  ;;  %v444_v63 = vmul.f32 %v187_v46, %v187_v46  ;;  %v4167_v33 = vadd.f32 %v450_v6, %v449_v5  ;;  %v217_v45 = vld [vmem:[#allocation2 + $0x598] sm:$0xff]  ;;  %v218_v6 = vld [vmem:[#allocation2 + $0x5a0] sm:$0xff] }
  0x8a   :  { %708 = vadd.xlane.f32.xlu0 %v707_v19  ;;  %v180_v19 = vld [vmem:[#allocation2 + $0x470] sm:$0xff]  ;;  %v459_v46 = vmul.f32 %v202_v22, %v202_v22 }
  0x8b   :  { %v4164_v25 = vadd.f32 %v444_v63, %v443_v62  ;;  %v473_v62 = vmul.f32 %v216_v44, %v216_v44  ;;  %v474_v63 = vmul.f32 %v217_v45, %v217_v45  ;;  %v231_v44 = vld [vmem:[#allocation2 + $0x608] sm:$0xff]  ;;  %v236_v45 = vld [vmem:[#allocation2 + $0x630] sm:$0xff] }
  0x8d   :  { %717 = vadd.xlane.f32.xlu1 %v716_v26  ;;  %v179_v26 = vld [vmem:[#allocation2 + $0x468] sm:$0xff] }
  0x8e   :  { %714 = vadd.xlane.f32.xlu0 %v713_v31  ;;  %v434_v31 = vmul.f32 %v177_v11, %v177_v11 }
  0x90   :  { %v4145_v61 = vadd.f32 %v434_v31, %v433_v30  ;;  %v209_v30 = vld [vmem:[#allocation2 + $0x558] sm:$0xff]  ;;  %v206_v31 = vld [vmem:[#allocation2 + $0x540] sm:$0xff] }
  0x91   :  { %723 = vadd.xlane.f32.xlu1 %v722_v38  ;;  %v437_v38 = vmul.f32 %v180_v19, %v180_v19  ;;  %v447_v19 = vmul.f32 %v190_v57, %v190_v57  ;;  %v463_v51 = vmul.f32 %v206_v31, %v206_v31  ;;  %v221_v57 = vld [vmem:[#allocation2 + $0x5b8] sm:$0xff]  ;;  %v4197_v31 = vadd.f32 %v474_v63, %v473_v62  ;;  %v238_v62 = vld [vmem:[#allocation2 + $0x640] sm:$0xff]  ;;  %v239_v63 = vld [vmem:[#allocation2 + $0x648] sm:$0xff] }
  0x92   :  { %720 = vadd.xlane.f32.xlu0 %v719_v43  ;;  %v436_v43 = vmul.f32 %v179_v26, %v179_v26  ;;  %v453_v26 = vmul.f32 %v196_v59, %v196_v59  ;;  %v478_v9 = vmul.f32 %v221_v57, %v221_v57  ;;  %v489_v57 = vmul.f32 %v232_v39, %v232_v39 }
  0x93   :  { %v4149_v4 = vadd.f32 %v438_v41, %v437_v38  ;;  %v213_v38 = vld [vmem:[#allocation2 + $0x578] sm:$0xff]  ;;  %v4171_v0 = vadd.f32 %v448_v20, %v447_v19 }
  0x94   :  { %v4153_v11 = vadd.f32 %v436_v43, %v435_v42  ;;  %v211_v43 = vld [vmem:[#allocation2 + $0x568] sm:$0xff]  ;;  %v470_v55 = vmul.f32 %v213_v38, %v213_v38  ;;  %v4173_v1 = vadd.f32 %v454_v27, %v453_v26  ;;  %v228_v26 = vld [vmem:[#allocation2 + $0x5f0] sm:$0xff] }
  0x95   :  { %729 = vadd.xlane.f32.xlu1 %v728_v50  ;;  %v440_v50 = vmul.f32 %v183_v34, %v183_v34  ;;  %v452_v34 = vmul.f32 %v195_v2, %v195_v2  ;;  %v468_v59 = vmul.f32 %v211_v43, %v211_v43 }
  0x96   :  { %726 = vadd.xlane.f32.xlu0 %v725_v54  ;;  %v2735_v54 = vsub.s32 1, %v2730_v24  ;;  %v208_v24 = vld [vmem:[#allocation2 + $0x550] sm:$0xff] }
  0x97   :  { %v4157_v13 = vadd.f32 %v440_v50, %v439_v49  ;;  %v465_v48 = vmul.f32 %v208_v24, %v208_v24  ;;  %v466_v49 = vmul.f32 %v209_v30, %v209_v30  ;;  %v215_v50 = vld [vmem:[#allocation2 + $0x588] sm:$0xff] }
  0x98   :  { %v4159_v17 = vrot.slane %v2727_v37, %v2735_v54  ;;  %v472_v5 = vmul.f32 %v215_v50, %v215_v50  ;;  %v223_v24 = vld [vmem:[#allocation2 + $0x5c8] sm:$0xff]  ;;  %v234_v50 = vld [vmem:[#allocation2 + $0x620] sm:$0xff] }
  0x99   :  { %735 = vadd.xlane.f32.xlu1 %v734_v10  ;;  %v4151_v10 = vrot.slane %v2727_v37, %v2731_v47  ;;  %v212_v37 = vld [vmem:[#allocation2 + $0x570] sm:$0xff]  ;;  %v460_v47 = vmul.f32 %v203_v23, %v203_v23  ;;  %v4186_v22 = vadd.f32 %v466_v49, %v465_v48  ;;  %v222_v23 = vld [vmem:[#allocation2 + $0x5c0] sm:$0xff]  ;;  %v480_v48 = vmul.f32 %v223_v24, %v223_v24 }
  0x9a   :  { %732 = vadd.xlane.f32.xlu0 %v731_v14  ;;  %v199_v14 = vld [vmem:[#allocation2 + $0x508] sm:$0xff]  ;;  %v469_v54 = vmul.f32 %v212_v37, %v212_v37  ;;  %v485_v49 = vmul.f32 %v228_v26, %v228_v26  ;;  %v244_v24 = vld [vmem:[#allocation2 + $0x670] sm:$0xff]  ;;  %v245_v26 = vld [vmem:[#allocation2 + $0x678] sm:$0xff] }
  0x9b   :  { %v4184_v20 = vadd.f32 %v460_v47, %v459_v46  ;;  %v237_v46 = vld [vmem:[#allocation2 + $0x638] sm:$0xff]  ;;  %v479_v47 = vmul.f32 %v222_v23, %v222_v23  ;;  %v496_v23 = vmul.f32 %v239_v63, %v239_v63 }
  0x9c   :  { %v4193_v30 = vadd.f32 %v470_v55, %v469_v54 }
  0x9d   :  { %741 = vadd.xlane.f32.xlu1 %v740_v15  ;;  %v204_v15 = vld [vmem:[#allocation2 + $0x530] sm:$0xff]  ;;  %v4223_v39 = vadd.f32 %v480_v48, %v479_v47 }
  0x9e   :  { %738 = vadd.xlane.f32.xlu0 %v737_v16  ;;  %v205_v16 = vld [vmem:[#allocation2 + $0x538] sm:$0xff]  ;;  %v461_v41 = vmul.f32 %v204_v15, %v204_v15  ;;  %v224_v15 = vld [vmem:[#allocation2 + $0x5d0] sm:$0xff] }
  0x9f   :  { %v462_v42 = vmul.f32 %v205_v16, %v205_v16 }
  0xa1   :  { %747 = vadd.xlane.f32.xlu1 %v4137_v21  ;;  %v456_v21 = vmul.f32 %v199_v14, %v199_v14  ;;  %v219_v14 = vld [vmem:[#allocation2 + $0x5a8] sm:$0xff]  ;;  %v4182_v19 = vadd.f32 %v462_v42, %v461_v41  ;;  %v4205_v41 = vadd.f32 %v478_v9, %v477_v8  ;;  %v481_v42 = vmul.f32 %v224_v15, %v224_v15 }
  0xa2   :  { %744 = vadd.xlane.f32.xlu0 %v4139_v28  ;;  %v214_v28 = vld [vmem:[#allocation2 + $0x580] sm:$0xff]  ;;  %v476_v38 = vmul.f32 %v219_v14, %v219_v14  ;;  %v494_v8 = vmul.f32 %v237_v46, %v237_v46  ;;  %v243_v46 = vld [vmem:[#allocation2 + $0x668] sm:$0xff] }
  0xa3   :  { %v471_v2 = vmul.f32 %v214_v28, %v214_v28  ;;  %v4180_v16 = vadd.f32 %v456_v21, %v455_v40  ;;  %v233_v40 = vld [vmem:[#allocation2 + $0x618] sm:$0xff]  ;;  %v230_v21 = vld [vmem:[#allocation2 + $0x600] sm:$0xff]  ;;  %v486_v28 = vmul.f32 %v229_v32, %v229_v32 }
  0xa5   :  { %753 = vadd.xlane.f32.xlu1 %v4141_v53  ;;  %v4175_v53 = vadd.f32 %v452_v34, %v451_v29  ;;  %v4191_v29 = vadd.f32 %v464_v52, %v463_v51  ;;  %v226_v34 = vld [vmem:[#allocation2 + $0x5e0] sm:$0xff]  ;;  %v4202_v37 = vadd.f32 %v472_v5, %v471_v2  ;;  %v235_v51 = vld [vmem:[#allocation2 + $0x628] sm:$0xff]  ;;  %v240_v52 = vld [vmem:[#allocation2 + $0x650] sm:$0xff]  ;;  %v487_v2 = vmul.f32 %v230_v21, %v230_v21 }
  0xa6   :  { %750 = vadd.xlane.f32.xlu0 %v4143_v60  ;;  %v225_v60 = vld [vmem:[#allocation2 + $0x5d8] sm:$0xff]  ;;  %v483_v55 = vmul.f32 %v226_v34, %v226_v34  ;;  %v488_v5 = vmul.f32 %v231_v44, %v231_v44  ;;  %v492_v9 = vmul.f32 %v235_v51, %v235_v51  ;;  %v497_v14 = vmul.f32 %v240_v52, %v240_v52  ;;  %v242_v21 = vld [vmem:[#allocation2 + $0x660] sm:$0xff] }
  0xa7   :  { %v482_v43 = vmul.f32 %v225_v60, %v225_v60  ;;  %v495_v60 = vmul.f32 %v238_v62, %v238_v62  ;;  %v500_v51 = vmul.f32 %v243_v46, %v243_v46 }
  0xa8   :  { %v4230_v44 = vadd.f32 %v484_v56, %v483_v55 }
  0xa9   :  { %759 = vadd.xlane.f32.xlu1 %v4145_v61  ;;  %v4195_v61 = vadd.f32 %v468_v59, %v467_v58  ;;  %v490_v58 = vmul.f32 %v233_v40, %v233_v40  ;;  %v241_v59 = vld [vmem:[#allocation2 + $0x658] sm:$0xff]  ;;  %v4221_v35 = vadd.f32 %v482_v43, %v481_v42  ;;  %v4225_v40 = vadd.f32 %v486_v28, %v485_v49 }
  0xaa   :  { %756 = vadd.xlane.f32.xlu0 %v4147_v3  ;;  %v4189_v27 = vpop.xlane.xlu1 %558  ;;  %v475_v3 = vmul.f32 %v218_v6, %v218_v6  ;;  %v493_v6 = vmul.f32 %v236_v45, %v236_v45  ;;  %v498_v15 = vmul.f32 %v241_v59, %v241_v59  ;;  %v502_v42 = vmul.f32 %v245_v26, %v245_v26 }
  0xab   :  { %3274 = vrsqrt.f32 %v4189_v27  ;;  %v4200_v36 = vpop.xlane.xlu0 %552  ;;  %v4232_v45 = vadd.f32 %v490_v58, %v489_v57  ;;  %v4244_v48 = vadd.f32 %v496_v23, %v495_v60  ;;  %v499_v49 = vmul.f32 %v242_v21, %v242_v21 }
  0xac   :  { %3276 = vrsqrt.f32 %v4200_v36  ;;  %v4219_v34 = vadd.f32 %v476_v38, %v475_v3  ;;  %v4237_v3 = vadd.f32 %v494_v8, %v493_v6  ;;  %v501_v38 = vmul.f32 %v244_v24, %v244_v24  ;;  %v248_v8 = vld [vmem:[#allocation2 + $0x690] sm:$0xff] }
  0xad   :  { %765 = vadd.xlane.f32.xlu1 %v4149_v4  ;;  %v4242_v47 = vadd.f32 %v498_v15, %v497_v14  ;;  %vm951_vm0 = vcmp.eq.f32.partialorder %v4189_v27, inf  ;;  %vm953_vm1 = vcmp.eq.f32.partialorder %v4189_v27, 0.0  ;;  %v954_v28 = vand.u32 2147483648, %v4189_v27 }
  0xae   :  { %762 = vadd.xlane.f32.xlu0 %v4153_v11  ;;  %v4209_v54 = vpop.xlane.xlu1 %561  ;;  %v491_v11 = vmul.f32 %v234_v50, %v234_v50  ;;  %vm937_vm2 = vcmp.eq.f32.partialorder %v4200_v36, inf  ;;  %vm939_vm3 = vcmp.eq.f32.partialorder %v4200_v36, 0.0 }
  0xaf   :  { %3278 = vrsqrt.f32 %v4209_v54  ;;  %v4212_v4 = vpop.xlane.xlu0 %555  ;;  %vm958_vm4 = vcmp.eq.f32.partialorder %v4209_v54, inf  ;;  %vm960_vm5 = vcmp.eq.f32.partialorder %v4209_v54, 0.0  ;;  %v961_v58 = vand.u32 2147483648, %v4209_v54 }
  0xb0   :  { %3280 = vrsqrt.f32 %v4212_v4  ;;  %v4240_v43 = vadd.f32 %v492_v9, %v491_v11  ;;  %vm944_vm6 = vcmp.eq.f32.partialorder %v4212_v4, inf  ;;  %vm946_vm7 = vcmp.eq.f32.partialorder %v4212_v4, 0.0 }
  0xb1   :  { %771 = vadd.xlane.f32.xlu1 %v4155_v12  ;;  %v947_v62 = vand.u32 2147483648, %v4212_v4 }
  0xb2   :  { %768 = vadd.xlane.f32.xlu0 %v4157_v13  ;;  %v4217_v32 = vpop.xlane.xlu1 %567  ;;  %v4234_v13 = vadd.f32 %v488_v5, %v487_v2  ;;  %v4274_v2 = vadd.f32 %v500_v51, %v499_v49 }
  0xb3   :  { %3282 = vrsqrt.f32 %v4217_v32  ;;  %v4228_v12 = vpop.xlane.xlu0 %564  ;;  %vm972_vm8 = vcmp.eq.f32.partialorder %v4217_v32, inf  ;;  %vm974_vm9 = vcmp.eq.f32.partialorder %v4217_v32, 0.0 }
  0xb4   :  { %3284 = vrsqrt.f32 %v4228_v12  ;;  %vm965_vm10 = vcmp.eq.f32.partialorder %v4228_v12, inf  ;;  %vm967_vm11 = vcmp.eq.f32.partialorder %v4228_v12, 0.0 }
  0xb5   :  { %777 = vadd.xlane.f32.xlu1 %v4161_v18  ;;  %v940_v18 = vand.u32 2147483648, %v4200_v36 }
  0xb6   :  { %774 = vadd.xlane.f32.xlu0 %v4164_v25  ;;  %v4250_v50 = vpop.xlane.xlu1 %573  ;;  %v4261_v25 = vadd.f32 %v502_v42, %v501_v38  ;;  %v4307_v38 = vmul.f32 %v248_v8, %v248_v8 }
  0xb7   :  { %3286 = vrsqrt.f32 %v4250_v50  ;;  %v4256_v52 = vpop.xlane.xlu0 %570  ;;  %vm986_vm12 = vcmp.eq.f32.partialorder %v4250_v50, inf  ;;  %vm988_vm13 = vcmp.eq.f32.partialorder %v4250_v50, 0.0  ;;  %v989_v51 = vand.u32 2147483648, %v4250_v50 }
  0xb8   :  { %v3275_v55 = vpop.eup %3274  ;;  %3288 = vrsqrt.f32 %v4256_v52  ;;  %vm979_vm14 = vcmp.eq.f32.partialorder %v4256_v52, inf  ;;  %vm981_vm15 = vcmp.eq.f32.partialorder %v4256_v52, 0.0 }
  0xb9   :  { %v3277_v56 = vpop.eup %3276  ;;  %v950_v57 = vmul.f32 %v3275_v55, %v4189_v27  ;;  %783 = vadd.xlane.f32.xlu1 %v4167_v33  ;;  %v975_v33 = vand.u32 2147483648, %v4217_v32 }
  0xba   :  { %v936_v59 = vmul.f32 %v3277_v56, %v4200_v36  ;;  %780 = vadd.xlane.f32.xlu0 %v4171_v0  ;;  %v4272_v63 = vpop.xlane.xlu1 %579  ;;  %v249_v0 = vld [vmem:[#allocation2 + $0x698] sm:$0xff] }
  0xbb   :  { %v952_v5 = vsel %vm951_vm0, %v4189_v27, %v950_v57  ;;  %3290 = vrsqrt.f32 %v4272_v63  ;;  %v4283_v6 = vpop.xlane.xlu0 %576  ;;  %v968_v27 = vand.u32 2147483648, %v4228_v12  ;;  %v4309_v42 = vmul.f32 %v249_v0, %v249_v0 }
  0xbc   :  { %v3279_v11 = vpop.eup %3278  ;;  %v4287_v9 = vsel %vm953_vm1, %v954_v28, %v952_v5  ;;  %v938_v14 = vsel %vm937_vm2, %v4200_v36, %v936_v59  ;;  %3292 = vrsqrt.f32 %v4283_v6  ;;  %vm1000_vm0 = vcmp.eq.f32.partialorder %v4272_v63, inf }
  0xbd   :  { %v3281_v15 = vpop.eup %3280  ;;  %v1833_v60 = vmax.f32 %v4287_v9, 5.9604645e-08  ;;  %v4297_v23 = vsel %vm939_vm3, %v940_v18, %v938_v14  ;;  %v957_v24 = vmul.f32 %v3279_v11, %v4209_v54  ;;  %789 = vadd.xlane.f32.xlu1 %v4173_v1  ;;  %vm1002_vm1 = vcmp.eq.f32.partialorder %v4272_v63, 0.0 }
  0xbe   :  { %v1831_v26 = vmax.f32 %v4297_v23, 5.9604645e-08  ;;  %v943_v21 = vmul.f32 %v3281_v15, %v4212_v4  ;;  %786 = vadd.xlane.f32.xlu0 %v4175_v53  ;;  %v4305_v46 = vpop.xlane.xlu1 %585  ;;  %vm993_vm2 = vcmp.eq.f32.partialorder %v4283_v6, inf  ;;  %vm995_vm3 = vcmp.eq.f32.partialorder %v4283_v6, 0.0 }
  0xbf   :  { %3294 = vrcp.f32 %v1833_v60  ;;  %v959_v36 = vsel %vm958_vm4, %v4209_v54, %v957_v24  ;;  %v4318_v1 = vpop.xlane.xlu0 %582  ;;  %v1003_v24 = vand.u32 2147483648, %v4272_v63  ;;  %vm1014_vm4 = vcmp.eq.f32.partialorder %v4305_v46, inf }
  0xc0   :  { %v3283_v53 = vpop.eup %3282  ;;  %3296 = vrcp.f32 %v1831_v26  ;;  %v4324_v49 = vsel %vm960_vm5, %v961_v58, %v959_v36  ;;  %v945_v28 = vsel %vm944_vm6, %v4212_v4, %v943_v21  ;;  %v1017_v36 = vand.u32 2147483648, %v4305_v46 }
  0xc1   :  { %v3285_v18 = vpop.eup %3284  ;;  %v1834_v55 = vmax.f32 %v4324_v49, 5.9604645e-08  ;;  %v4333_v56 = vsel %vm946_vm7, %v947_v62, %v945_v28  ;;  %v971_v57 = vmul.f32 %v3283_v53, %v4217_v32  ;;  %3298 = vrsqrt.f32 %v4305_v46  ;;  %795 = vadd.xlane.f32.xlu1 %v4177_v7 }
  0xc2   :  { %v1832_v54 = vmax.f32 %v4333_v56, 5.9604645e-08  ;;  %v964_v58 = vmul.f32 %v3285_v18, %v4228_v12  ;;  %3300 = vrsqrt.f32 %v4318_v1  ;;  %792 = vadd.xlane.f32.xlu0 %v4180_v16  ;;  %v4343_v59 = vpop.xlane.xlu1 %591  ;;  %v982_v7 = vand.u32 2147483648, %v4256_v52  ;;  %v3788_v56 = vld [vmem:[#allocation2] sm:$0xff] }
  0xc3   :  { %3302 = vrcp.f32 %v1834_v55  ;;  %v973_v4 = vsel %vm972_vm8, %v4217_v32, %v971_v57  ;;  %v4369_v32 = vpop.xlane.xlu0 %588  ;;  %vm1016_vm5 = vcmp.eq.f32.partialorder %v4305_v46, 0.0  ;;  %vm1007_vm6 = vcmp.eq.f32.partialorder %v4318_v1, inf }
  0xc4   :  { %v3287_v62 = vpop.eup %3286  ;;  %3304 = vrcp.f32 %v1832_v54  ;;  %v4356_v16 = vsel %vm974_vm9, %v975_v33, %v973_v4  ;;  %v966_v5 = vsel %vm965_vm10, %v4228_v12, %v964_v58  ;;  %vm1009_vm7 = vcmp.eq.f32.partialorder %v4318_v1, 0.0 }
  0xc5   :  { %v3289_v8 = vpop.eup %3288  ;;  %v1836_v0 = vmax.f32 %v4356_v16, 5.9604645e-08  ;;  %v4365_v11 = vsel %vm967_vm11, %v968_v27, %v966_v5  ;;  %v985_v14 = vmul.f32 %v3287_v62, %v4250_v50  ;;  %801 = vadd.xlane.f32.xlu1 %v4182_v19  ;;  %v996_v19 = vand.u32 2147483648, %v4283_v6  ;;  %v3790_v16 = vld [vmem:[#allocation2 + $0x30] sm:$0xff] }
  0xc6   :  { %v1835_v33 = vmax.f32 %v4365_v11, 5.9604645e-08  ;;  %v978_v15 = vmul.f32 %v3289_v8, %v4256_v52  ;;  %798 = vadd.xlane.f32.xlu0 %v4184_v20  ;;  %v4395_v53 = vpop.xlane.xlu1 %597  ;;  %v1031_v5 = vand.u32 2147483648, %v4343_v59  ;;  %vm1028_vm8 = vcmp.eq.f32.partialorder %v4343_v59, inf }
  0xc7   :  { %3306 = vrcp.f32 %v1836_v0  ;;  %v987_v12 = vsel %vm986_vm12, %v4250_v50, %v985_v14  ;;  %v4418_v4 = vpop.xlane.xlu0 %594  ;;  %v1045_v23 = vand.u32 2147483648, %v4395_v53  ;;  %vm1030_vm9 = vcmp.eq.f32.partialorder %v4343_v59, 0.0 }
  0xc8   :  { %v3291_v27 = vpop.eup %3290  ;;  %3308 = vrcp.f32 %v1835_v33  ;;  %v4388_v21 = vsel %vm988_vm13, %v989_v51, %v987_v12  ;;  %v980_v20 = vsel %vm979_vm14, %v4256_v52, %v978_v15  ;;  %vm1021_vm10 = vcmp.eq.f32.partialorder %v4369_v32, inf }
  0xc9   :  { %v3293_v28 = vpop.eup %3292  ;;  %v1838_v18 = vmax.f32 %v4388_v21, 5.9604645e-08  ;;  %v4400_v57 = vsel %vm981_vm15, %v982_v7, %v980_v20  ;;  %v999_v50 = vmul.f32 %v3291_v27, %v4272_v63  ;;  %3310 = vrsqrt.f32 %v4343_v59  ;;  %807 = vadd.xlane.f32.xlu1 %v4186_v22  ;;  %v3794_v21 = vld [vmem:[#allocation2 + $0x50] sm:$0xff] }
  0xca   :  { %v1837_v51 = vmax.f32 %v4400_v57, 5.9604645e-08  ;;  %v992_v58 = vmul.f32 %v3293_v28, %v4283_v6  ;;  %3312 = vrsqrt.f32 %v4369_v32  ;;  %804 = vadd.xlane.f32.xlu0 %v4191_v29  ;;  %v1010_v22 = vand.u32 2147483648, %v4318_v1  ;;  %v4444_v9 = vpop.xlane.xlu1 %603 }
  0xcb   :  { %3314 = vrcp.f32 %v1838_v18  ;;  %v1001_v52 = vsel %vm1000_vm0, %v4272_v63, %v999_v50  ;;  %v1024_v20 = vand.u32 2147483648, %v4369_v32  ;;  %vm1023_vm11 = vcmp.eq.f32.partialorder %v4369_v32, 0.0 }
  0xcc   :  { %v3295_v7 = vpop.eup %3294  ;;  %3316 = vrcp.f32 %v1837_v51  ;;  %v4424_v29 = vsel %vm1002_vm1, %v1003_v24, %v1001_v52  ;;  %v994_v62 = vsel %vm993_vm2, %v4283_v6, %v992_v58  ;;  %vm1042_vm12 = vcmp.eq.f32.partialorder %v4395_v53, inf }
  0xcd   :  { %v3297_v8 = vpop.eup %3296  ;;  %v2089_v14 = vmul.f32 %v3295_v7, %v1833_v60  ;;  %v1840_v15 = vmax.f32 %v4424_v29, 5.9604645e-08  ;;  %v4435_v12 = vsel %vm995_vm3, %v996_v19, %v994_v62  ;;  %3318 = vrsqrt.f32 %v4395_v53  ;;  %813 = vadd.xlane.f32.xlu1 %v4193_v30  ;;  %v3798_v29 = vld [vmem:[#allocation2 + $0x70] sm:$0xff] }
  0xce   :  { %v3299_v63 = vpop.eup %3298  ;;  %v2087_v24 = vmul.f32 %v3297_v8, %v1831_v26  ;;  %v1839_v27 = vmax.f32 %v4435_v12, 5.9604645e-08  ;;  %3320 = vrsqrt.f32 %v4418_v4  ;;  %810 = vadd.xlane.f32.xlu0 %v4195_v61  ;;  %vm1044_vm13 = vcmp.eq.f32.partialorder %v4395_v53, 0.0  ;;  %v3800_v12 = vld [vmem:[#allocation2 + $0x60] sm:$0xff] }
  0xcf   :  { %v3301_v6 = vpop.eup %3300  ;;  %v2217_v60 = vsub.f32 2.0, %v2089_v14  ;;  %3322 = vrcp.f32 %v1840_v15  ;;  %v1013_v30 = vmul.f32 %v3299_v63, %v4305_v46  ;;  %vm1035_vm14 = vcmp.eq.f32.partialorder %v4418_v4, inf }
  0xd0   :  { %v3303_v26 = vpop.eup %3302  ;;  %v2215_v19 = vsub.f32 2.0, %v2087_v24  ;;  %3324 = vrcp.f32 %v1839_v27  ;;  %v1006_v28 = vmul.f32 %v3301_v6, %v4318_v1  ;;  %v3787_v6 = vld [vmem:[#allocation2 + $0x28] sm:$0xff]  ;;  %vm1037_vm15 = vcmp.eq.f32.partialorder %v4418_v4, 0.0 }
  0xd1   :  { %v3305_v58 = vpop.eup %3304  ;;  %v2345_v61 = vmul.f32 %v3295_v7, %v2217_v60  ;;  %v2090_v52 = vmul.f32 %v3303_v26, %v1834_v55  ;;  %v1015_v62 = vsel %vm1014_vm4, %v4305_v46, %v1013_v30  ;;  %3326 = vrsqrt.f32 %v4444_v9  ;;  %819 = vadd.xlane.f32.xlu1 %v4197_v31  ;;  %v3786_v55 = vld [vmem:[#allocation2 + $0x20] sm:$0xff] }
  0xd2   :  { %v2343_v14 = vmul.f32 %v3297_v8, %v2215_v19  ;;  %v2088_v63 = vmul.f32 %v3305_v58, %v1832_v54  ;;  %v4466_v24 = vsel %vm1016_vm5, %v1017_v36, %v1015_v62  ;;  %v1008_v49 = vsel %vm1007_vm6, %v4318_v1, %v1006_v28  ;;  %816 = vadd.xlane.f32.xlu0 %v4202_v37  ;;  %v3789_v19 = vld [vmem:[#allocation2 + $0x8] sm:$0xff] }
  0xd3   :  { %v2475_v7 = vmul.f32 %v3786_v55, %v2345_v61  ;;  %v2476_v60 = vmul.f32 %v3787_v6, %v2345_v61  ;;  %v2218_v30 = vsub.f32 2.0, %v2090_v52  ;;  %v1842_v31 = vmax.f32 %v4466_v24, 5.9604645e-08 }
  0xd4   :  { %v3307_v8 = vpop.eup %3306  ;;  %v2471_v54 = vmul.f32 %v3788_v56, %v2343_v14  ;;  %v2472_v46 = vmul.f32 %v3789_v19, %v2343_v14  ;;  %v2216_v36 = vsub.f32 2.0, %v2088_v63  ;;  %v4475_v62 = vsel %vm1009_vm7, %v1010_v22, %v1008_v49 }
  0xd5   :  { %v3309_v28 = vpop.eup %3308  ;;  %v2743_v37 = vmul.f32 %v4151_v10, %v2475_v7  ;;  %v2744_v55 = vmul.f32 %v4159_v17, %v2476_v60  ;;  %v2346_v50 = vmul.f32 %v3303_v26, %v2218_v30  ;;  %v2092_v61 = vmul.f32 %v3307_v8, %v1836_v0  ;;  %825 = vadd.xlane.f32.xlu1 %v4205_v41  ;;  %v3791_v41 = vld [vmem:[#allocation2 + $0x38] sm:$0xff] }
  0xd6   :  { %v3311_v52 = vpop.eup %3310  ;;  %v2739_v6 = vmul.f32 %v4151_v10, %v2471_v54  ;;  %v2740_v14 = vmul.f32 %v4159_v17, %v2472_v46  ;;  %v2344_v63 = vmul.f32 %v3305_v58, %v2216_v36  ;;  %v2091_v1 = vmul.f32 %v3309_v28, %v1835_v33  ;;  %822 = vadd.xlane.f32.xlu0 %v4219_v34  ;;  %v3792_v33 = vld [vmem:[#allocation2 + $0x10] sm:$0xff]  ;;  %v3793_v34 = vld [vmem:[#allocation2 + $0x18] sm:$0xff] }
  0xd7   :  { %v4488_v22 = vpop.eup %3312  ;;  %2999 = vst [vmem:[#allocation7 + $0x20] sm:$0xff] %v2743_v37  ;;  %3000 = vst [vmem:[#allocation7 + $0x28] sm:$0xff] %v2744_v55  ;;  %v2477_v0 = vmul.f32 %v3790_v16, %v2346_v50  ;;  %v2478_v26 = vmul.f32 %v3791_v41, %v2346_v50  ;;  %v2220_v49 = vsub.f32 2.0, %v2092_v61  ;;  %3328 = vrcp.f32 %v1842_v31 }
  0xd8   :  { %v3315_v11 = vpop.eup %3314  ;;  %2995 = vst [vmem:[#allocation7] sm:$0xff] %v2739_v6  ;;  %2996 = vst [vmem:[#allocation7 + $0x8] sm:$0xff] %v2740_v14  ;;  %v2473_v58 = vmul.f32 %v3792_v33, %v2344_v63  ;;  %v2474_v7 = vmul.f32 %v3793_v34, %v2344_v63  ;;  %v2219_v60 = vsub.f32 2.0, %v2091_v1  ;;  %v1841_v30 = vmax.f32 %v4475_v62, 5.9604645e-08  ;;  %v4505_v14 = vpop.xlane.xlu0 %600 }
  0xd9   :  { %v3317_v56 = vpop.eup %3316  ;;  %v2745_v54 = vmul.f32 %v4151_v10, %v2477_v0  ;;  %v2746_v50 = vmul.f32 %v4159_v17, %v2478_v26  ;;  %v2348_v19 = vmul.f32 %v3307_v8, %v2220_v49  ;;  %v2094_v46 = vmul.f32 %v3315_v11, %v1838_v18  ;;  %831 = vadd.xlane.f32.xlu1 %v4221_v35  ;;  %v3795_v18 = vld [vmem:[#allocation2 + $0x58] sm:$0xff] }
  0xda   :  { %v4499_v36 = vpop.eup %3318  ;;  %v2741_v37 = vmul.f32 %v4151_v10, %v2473_v58  ;;  %v2742_v55 = vmul.f32 %v4159_v17, %v2474_v7  ;;  %v2347_v61 = vmul.f32 %v3309_v28, %v2219_v60  ;;  %v2093_v6 = vmul.f32 %v3317_v56, %v1837_v51  ;;  %828 = vadd.xlane.f32.xlu0 %v4223_v39  ;;  %v3796_v51 = vld [vmem:[#allocation2 + $0x40] sm:$0xff]  ;;  %v3797_v39 = vld [vmem:[#allocation2 + $0x48] sm:$0xff]  ;;  %v4520_v7 = vpop.xlane.xlu1 %609 }
  0xdb   :  { %v4508_v8 = vpop.eup %3320  ;;  %3001 = vst [vmem:[#allocation7 + $0x30] sm:$0xff] %v2745_v54  ;;  %3002 = vst [vmem:[#allocation7 + $0x38] sm:$0xff] %v2746_v50  ;;  %v2481_v35 = vmul.f32 %v3794_v21, %v2348_v19  ;;  %v2482_v63 = vmul.f32 %v3795_v18, %v2348_v19  ;;  %v2222_v1 = vsub.f32 2.0, %v2094_v46  ;;  %3330 = vrcp.f32 %v1841_v30 }
  0xdc   :  { %v3323_v57 = vpop.eup %3322  ;;  %2997 = vst [vmem:[#allocation7 + $0x10] sm:$0xff] %v2741_v37  ;;  %2998 = vst [vmem:[#allocation7 + $0x18] sm:$0xff] %v2742_v55  ;;  %v2479_v28 = vmul.f32 %v3796_v51, %v2347_v61  ;;  %v2480_v16 = vmul.f32 %v3797_v39, %v2347_v61  ;;  %v2221_v0 = vsub.f32 2.0, %v2093_v6  ;;  %v1027_v41 = vmul.f32 %v3311_v52, %v4343_v59  ;;  %v3801_v37 = vld [vmem:[#allocation2 + $0x68] sm:$0xff]  ;;  %v4543_v6 = vpop.xlane.xlu0 %606  ;;  %v3803_v39 = vld [vmem:[#allocation2 + $0x98] sm:$0xff] }
  0xdd   :  { %v3325_v26 = vpop.eup %3324  ;;  %v2749_v49 = vmul.f32 %v4151_v10, %v2481_v35  ;;  %v2750_v33 = vmul.f32 %v4159_v17, %v2482_v63  ;;  %v2350_v58 = vmul.f32 %v3315_v11, %v2222_v1  ;;  %v2096_v34 = vmul.f32 %v3323_v57, %v1840_v15  ;;  %837 = vadd.xlane.f32.xlu1 %v4225_v40  ;;  %v3799_v15 = vld [vmem:[#allocation2 + $0x78] sm:$0xff] }
  0xde   :  { %v4523_v60 = vpop.eup %3326  ;;  %v2747_v52 = vmul.f32 %v4151_v10, %v2479_v28  ;;  %v2748_v54 = vmul.f32 %v4159_v17, %v2480_v16  ;;  %v2349_v50 = vmul.f32 %v3317_v56, %v2221_v0  ;;  %v2095_v19 = vmul.f32 %v3325_v26, %v1839_v27  ;;  %834 = vadd.xlane.f32.xlu0 %v4230_v44  ;;  %v3802_v28 = vld [vmem:[#allocation2 + $0x90] sm:$0xff]  ;;  %v4559_v0 = vpop.xlane.xlu1 %615 }
  0xdf   :  { %3005 = vst [vmem:[#allocation7 + $0x50] sm:$0xff] %v2749_v49  ;;  %3006 = vst [vmem:[#allocation7 + $0x58] sm:$0xff] %v2750_v33  ;;  %v2485_v40 = vmul.f32 %v3798_v29, %v2350_v58  ;;  %v2486_v11 = vmul.f32 %v3799_v15, %v2350_v58  ;;  %v2224_v46 = vsub.f32 2.0, %v2096_v34  ;;  %v1029_v56 = vsel %vm1028_vm8, %v4343_v59, %v1027_v41  ;;  %v247_v15 = vld [vmem:[#allocation2 + $0x688] sm:$0xff] }
  0xe0   :  { %3003 = vst [vmem:[#allocation7 + $0x40] sm:$0xff] %v2747_v52  ;;  %3004 = vst [vmem:[#allocation7 + $0x48] sm:$0xff] %v2748_v54  ;;  %v2483_v27 = vmul.f32 %v3800_v12, %v2349_v50  ;;  %v2484_v55 = vmul.f32 %v3801_v37, %v2349_v50  ;;  %v2223_v44 = vsub.f32 2.0, %v2095_v19  ;;  %v4540_v61 = vsel %vm1030_vm9, %v1031_v5, %v1029_v56  ;;  %v4583_v24 = vpop.xlane.xlu0 %612 }
  0xe1   :  { %vm1056_vm0 = vcmp.eq.f32.partialorder %v4444_v9, inf  ;;  %v2753_v21 = vmul.f32 %v4151_v10, %v2485_v40  ;;  %v2754_v35 = vmul.f32 %v4159_v17, %v2486_v11  ;;  %v2352_v18 = vmul.f32 %v3323_v57, %v2224_v46  ;;  %843 = vadd.xlane.f32.xlu1 %v4232_v45  ;;  %v246_v40 = vld [vmem:[#allocation2 + $0x680] sm:$0xff] }
  0xe2   :  { %v1844_v63 = vmax.f32 %v4540_v61, 5.9604645e-08  ;;  %vm1058_vm1 = vcmp.eq.f32.partialorder %v4444_v9, 0.0  ;;  %v2751_v1 = vmul.f32 %v4151_v10, %v2483_v27  ;;  %v2752_v59 = vmul.f32 %v4159_v17, %v2484_v55  ;;  %840 = vadd.xlane.f32.xlu0 %v4234_v13  ;;  %v3805_v13 = vld [vmem:[#allocation2 + $0x88] sm:$0xff]  ;;  %v4613_v37 = vpop.xlane.xlu1 %621  ;;  %v3806_v55 = vld [vmem:[#allocation2 + $0xb0] sm:$0xff] }
  0xe3   :  { %v2351_v5 = vmul.f32 %v3325_v26, %v2223_v44  ;;  %v1020_v51 = vmul.f32 %v4488_v22, %v4369_v32  ;;  %3009 = vst [vmem:[#allocation7 + $0x70] sm:$0xff] %v2753_v21  ;;  %3010 = vst [vmem:[#allocation7 + $0x78] sm:$0xff] %v2754_v35  ;;  %v2489_v57 = vmul.f32 %v3802_v28, %v2352_v18  ;;  %v3804_v22 = vld [vmem:[#allocation2 + $0x80] sm:$0xff]  ;;  %v1059_v46 = vand.u32 2147483648, %v4444_v9  ;;  %v3807_v21 = vld [vmem:[#allocation2 + $0xb8] sm:$0xff] }
  0xe4   :  { %v2490_v16 = vmul.f32 %v3803_v39, %v2352_v18  ;;  %3332 = vrcp.f32 %v1844_v63  ;;  %v1041_v45 = vmul.f32 %v4499_v36, %v4395_v53  ;;  %v3329_v41 = vpop.eup %3328  ;;  %3007 = vst [vmem:[#allocation7 + $0x60] sm:$0xff] %v2751_v1  ;;  %3008 = vst [vmem:[#allocation7 + $0x68] sm:$0xff] %v2752_v59  ;;  %v1034_v58 = vmul.f32 %v4508_v8, %v4418_v4  ;;  %v4627_v1 = vpop.xlane.xlu0 %618  ;;  %v3808_v28 = vld [vmem:[#allocation2 + $0xa0] sm:$0xff] }
  0xe5   :  { %v2487_v26 = vmul.f32 %v3804_v22, %v2351_v5  ;;  %v2488_v49 = vmul.f32 %v3805_v13, %v2351_v5  ;;  %v1022_v33 = vsel %vm1021_vm10, %v4369_v32, %v1020_v51  ;;  %v2757_v34 = vmul.f32 %v4151_v10, %v2489_v57  ;;  %849 = vadd.xlane.f32.xlu1 %v4237_v3 }
  0xe6   :  { %v2758_v36 = vmul.f32 %v4159_v17, %v2490_v16  ;;  %v2098_v52 = vmul.f32 %v3329_v41, %v1842_v31  ;;  %v4574_v54 = vsel %vm1023_vm11, %v1024_v20, %v1022_v33  ;;  %v1043_v29 = vsel %vm1042_vm12, %v4395_v53, %v1041_v45  ;;  %846 = vadd.xlane.f32.xlu0 %v4240_v43  ;;  %v4639_v39 = vpop.xlane.xlu1 %627 }
  0xe7   :  { %v2755_v50 = vmul.f32 %v4151_v10, %v2487_v26  ;;  %v2756_v19 = vmul.f32 %v4159_v17, %v2488_v49  ;;  %v1843_v8 = vmax.f32 %v4574_v54, 5.9604645e-08  ;;  %3013 = vst [vmem:[#allocation7 + $0x90] sm:$0xff] %v2757_v34  ;;  %v4590_v3 = vsel %vm1044_vm13, %v1045_v23, %v1043_v29 }
  0xe8   :  { %3014 = vst [vmem:[#allocation7 + $0x98] sm:$0xff] %v2758_v36  ;;  %v2226_v32 = vsub.f32 2.0, %v2098_v52  ;;  %v1036_v20 = vsel %vm1035_vm14, %v4418_v4, %v1034_v58  ;;  %v1055_v31 = vmul.f32 %v4523_v60, %v4444_v9  ;;  %v3331_v11 = vpop.eup %3330  ;;  %v1846_v43 = vmax.f32 %v4590_v3, 5.9604645e-08  ;;  %v3810_v52 = vld [vmem:[#allocation2 + $0xd0] sm:$0xff] }
  0xe9   :  { %3011 = vst [vmem:[#allocation7 + $0x80] sm:$0xff] %v2755_v50  ;;  %3012 = vst [vmem:[#allocation7 + $0x88] sm:$0xff] %v2756_v19  ;;  %3334 = vrcp.f32 %v1843_v8  ;;  %v7135_v53 = vand.u32 2147483648, %v4418_v4  ;;  %v2097_v60 = vmul.f32 %v3331_v11, %v1841_v30  ;;  %855 = vadd.xlane.f32.xlu1 %v4242_v47  ;;  %v503_v62 = vmul.f32 %v246_v40, %v246_v40  ;;  %v3811_v19 = vld [vmem:[#allocation2 + $0xd8] sm:$0xff] }
  0xea   :  { %v2354_v56 = vmul.f32 %v3329_v41, %v2226_v32  ;;  %v1057_v27 = vsel %vm1056_vm0, %v4444_v9, %v1055_v31  ;;  %3336 = vrcp.f32 %v1846_v43  ;;  %852 = vadd.xlane.f32.xlu0 %v4244_v48  ;;  %v504_v30 = vmul.f32 %v247_v15, %v247_v15  ;;  %v4655_v49 = vpop.xlane.xlu1 %633 }
  0xeb   :  { %v4604_v23 = vsel %vm1037_vm15, %v7135_v53, %v1036_v20  ;;  %v4620_v4 = vsel %vm1058_vm1, %v1059_v46, %v1057_v27  ;;  %v2225_v18 = vsub.f32 2.0, %v2097_v60  ;;  %v866_v9 = vadd.f32 %v4309_v42, %v4307_v38  ;;  %v3809_v38 = vld [vmem:[#allocation2 + $0xa8] sm:$0xff] }
  0xec   :  { %v1845_v12 = vmax.f32 %v4604_v23, 5.9604645e-08  ;;  %v2493_v44 = vmul.f32 %v3806_v55, %v2354_v56  ;;  %v2494_v35 = vmul.f32 %v3807_v21, %v2354_v56  ;;  %v1848_v47 = vmax.f32 %v4620_v4, 5.9604645e-08  ;;  %v3812_v21 = vld [vmem:[#allocation2 + $0xc0] sm:$0xff] }
  0xed   :  { %v2353_v5 = vmul.f32 %v3331_v11, %v2225_v18  ;;  %861 = vadd.xlane.f32.xlu1 %v4261_v25  ;;  %v863_v51 = vadd.f32 %v504_v30, %v503_v62  ;;  %vm1049_vm2 = vcmp.eq.f32.partialorder %v4505_v14, inf  ;;  %v1052_v26 = vand.u32 2147483648, %v4505_v14  ;;  %v3813_v18 = vld [vmem:[#allocation2 + $0xc8] sm:$0xff] }
  0xee   :  { %3338 = vrcp.f32 %v1845_v12  ;;  %v2761_v48 = vmul.f32 %v4151_v10, %v2493_v44  ;;  %v2762_v59 = vmul.f32 %v4159_v17, %v2494_v35  ;;  %858 = vadd.xlane.f32.xlu0 %v4274_v2  ;;  %v4647_v2 = vpop.xlane.xlu0 %624  ;;  %vm1070_vm3 = vcmp.eq.f32.partialorder %v4520_v7, inf }
  0xef   :  { %3340 = vrsqrt.f32 %v4505_v14  ;;  %v2491_v57 = vmul.f32 %v3808_v28, %v2353_v5  ;;  %v2492_v42 = vmul.f32 %v3809_v38, %v2353_v5  ;;  %vm1051_vm4 = vcmp.eq.f32.partialorder %v4505_v14, 0.0 }
  0xf0   :  { %3342 = vrsqrt.f32 %v4520_v7  ;;  %3017 = vst [vmem:[#allocation7 + $0xb0] sm:$0xff] %v2761_v48  ;;  %3018 = vst [vmem:[#allocation7 + $0xb8] sm:$0xff] %v2762_v59  ;;  %v1066_v58 = vand.u32 2147483648, %v4543_v6  ;;  %v1087_v34 = vand.u32 2147483648, %v4559_v0  ;;  %vm1072_vm5 = vcmp.eq.f32.partialorder %v4520_v7, 0.0 }
  0xf1   :  { %3344 = vrcp.f32 %v1848_v47  ;;  %v3333_v16 = vpop.eup %3332  ;;  %v2759_v45 = vmul.f32 %v4151_v10, %v2491_v57  ;;  %v2760_v25 = vmul.f32 %v4159_v17, %v2492_v42  ;;  %867 = vadd.xlane.f32.xlu1 %v866_v9  ;;  %v1080_v32 = vand.u32 2147483648, %v4583_v24  ;;  %v3814_v42 = vld [vmem:[#allocation2 + $0xf0] sm:$0xff] }
  0xf2   :  { %3346 = vrsqrt.f32 %v4543_v6  ;;  %v2100_v41 = vmul.f32 %v3333_v16, %v1844_v63  ;;  %864 = vadd.xlane.f32.xlu0 %v863_v51  ;;  %v1073_v63 = vand.u32 2147483648, %v4520_v7  ;;  %v1101_v31 = vand.u32 2147483648, %v4613_v37  ;;  %v4670_v40 = vpop.xlane.xlu0 %630 }
  0xf3   :  { %3348 = vrsqrt.f32 %v4559_v0  ;;  %3015 = vst [vmem:[#allocation7 + $0xa0] sm:$0xff] %v2759_v45  ;;  %3016 = vst [vmem:[#allocation7 + $0xa8] sm:$0xff] %v2760_v25  ;;  %vm1063_vm6 = vcmp.eq.f32.partialorder %v4543_v6, inf  ;;  %v1094_v56 = vand.u32 2147483648, %v4627_v1  ;;  %vm1065_vm7 = vcmp.eq.f32.partialorder %v4543_v6, 0.0  ;;  %v3815_v45 = vld [vmem:[#allocation2 + $0xf8] sm:$0xff] }
  0xf4   :  { %3350 = vrsqrt.f32 %v4583_v24  ;;  %v2228_v22 = vsub.f32 2.0, %v2100_v41  ;;  %v1115_v62 = vand.u32 2147483648, %v4639_v39  ;;  %vm1084_vm8 = vcmp.eq.f32.partialorder %v4559_v0, inf }
  0xf5   :  { %3352 = vrsqrt.f32 %v4613_v37  ;;  %vm1077_vm9 = vcmp.eq.f32.partialorder %v4583_v24, inf  ;;  %vm1086_vm10 = vcmp.eq.f32.partialorder %v4559_v0, 0.0  ;;  %vm1079_vm11 = vcmp.eq.f32.partialorder %v4583_v24, 0.0 }
  0xf6   :  { %v3335_v13 = vpop.eup %3334  ;;  %v2356_v61 = vmul.f32 %v3333_v16, %v2228_v22  ;;  %3354 = vrsqrt.f32 %v4627_v1  ;;  %vm1098_vm12 = vcmp.eq.f32.partialorder %v4613_v37, inf  ;;  %vm1100_vm13 = vcmp.eq.f32.partialorder %v4613_v37, 0.0  ;;  %v3816_v22 = vld [vmem:[#allocation2 + $0xe0] sm:$0xff] }
  0xf7   :  { %v2099_v33 = vmul.f32 %v3335_v13, %v1843_v8  ;;  %3356 = vrsqrt.f32 %v4639_v39  ;;  %v3337_v36 = vpop.eup %3336  ;;  %vm1091_vm14 = vcmp.eq.f32.partialorder %v4627_v1, inf  ;;  %vm1112_vm15 = vcmp.eq.f32.partialorder %v4639_v39, inf }
  0xf8   :  { %v2497_v50 = vmul.f32 %v3810_v52, %v2356_v61  ;;  %v2498_v29 = vmul.f32 %v3811_v19, %v2356_v61  ;;  %3358 = vrsqrt.f32 %v4647_v2  ;;  %v2102_v20 = vmul.f32 %v3337_v36, %v1846_v43  ;;  %v3817_v61 = vld [vmem:[#allocation2 + $0xe8] sm:$0xff] }
  0xf9   :  { %v2227_v8 = vsub.f32 2.0, %v2099_v33  ;;  %3360 = vrsqrt.f32 %v4655_v49  ;;  %vm1105_vm0 = vcmp.eq.f32.partialorder %v4647_v2, inf  ;;  %vm1093_vm1 = vcmp.eq.f32.partialorder %v4627_v1, 0.0 }
  0xfa   :  { %v2765_v11 = vmul.f32 %v4151_v10, %v2497_v50  ;;  %v2766_v53 = vmul.f32 %v4159_v17, %v2498_v29  ;;  %v2230_v60 = vsub.f32 2.0, %v2102_v20  ;;  %3362 = vrsqrt.f32 %v4670_v40 }
  0xfb   :  { %v3339_v54 = vpop.eup %3338  ;;  %v2355_v43 = vmul.f32 %v3335_v13, %v2227_v8 }
  0xfc   :  { %v3341_v15 = vpop.eup %3340  ;;  %v2101_v46 = vmul.f32 %v3339_v54, %v1845_v12  ;;  %3021 = vst [vmem:[#allocation7 + $0xd0] sm:$0xff] %v2765_v11  ;;  %3022 = vst [vmem:[#allocation7 + $0xd8] sm:$0xff] %v2766_v53  ;;  %v1108_v12 = vand.u32 2147483648, %v4647_v2  ;;  %v2358_v48 = vmul.f32 %v3337_v36, %v2230_v60  ;;  %v3819_v60 = vld [vmem:[#allocation2 + $0x118] sm:$0xff] }
  0xfd   :  { %v3343_v3 = vpop.eup %3342  ;;  %v1048_v27 = vmul.f32 %v3341_v15, %v4505_v14  ;;  %v2495_v35 = vmul.f32 %v3812_v21, %v2355_v43  ;;  %v2496_v9 = vmul.f32 %v3813_v18, %v2355_v43 }
  0xfe   :  { %v3345_v30 = vpop.eup %3344  ;;  %v2229_v55 = vsub.f32 2.0, %v2101_v46  ;;  %v1069_v23 = vmul.f32 %v3343_v3, %v4520_v7  ;;  %v2501_v16 = vmul.f32 %v3814_v42, %v2358_v48  ;;  %v2502_v25 = vmul.f32 %v3815_v45, %v2358_v48  ;;  %v3818_v3 = vld [vmem:[#allocation2 + $0x110] sm:$0xff] }
  0xff   :  { %v3347_v44 = vpop.eup %3346  ;;  %v2104_v59 = vmul.f32 %v3345_v30, %v1848_v47  ;;  %v1050_v51 = vsel %vm1049_vm2, %v4505_v14, %v1048_v27  ;;  %v2763_v4 = vmul.f32 %v4151_v10, %v2495_v35  ;;  %v2764_v47 = vmul.f32 %v4159_v17, %v2496_v9 }
 0x100   :  { %v2357_v5 = vmul.f32 %v3339_v54, %v2229_v55  ;;  %v1071_v28 = vsel %vm1070_vm3, %v4520_v7, %v1069_v23  ;;  %v1062_v57 = vmul.f32 %v3347_v44, %v4543_v6  ;;  %v3349_v38 = vpop.eup %3348  ;;  %v4705_v52 = vsel %vm1051_vm4, %v1052_v26, %v1050_v51 }
 0x101   :  { %v3351_v41 = vpop.eup %3350  ;;  %v2232_v36 = vsub.f32 2.0, %v2104_v59  ;;  %3019 = vst [vmem:[#allocation7 + $0xc0] sm:$0xff] %v2763_v4  ;;  %3020 = vst [vmem:[#allocation7 + $0xc8] sm:$0xff] %v2764_v47  ;;  %v2769_v50 = vmul.f32 %v4151_v10, %v2501_v16  ;;  %v2770_v19 = vmul.f32 %v4159_v17, %v2502_v25  ;;  %v1847_v29 = vmax.f32 %v4705_v52, 5.9604645e-08  ;;  %v4785_v47 = vpop.xlane.xlu1 %639 }
 0x102   :  { %v2499_v13 = vmul.f32 %v3816_v22, %v2357_v5  ;;  %v2500_v33 = vmul.f32 %v3817_v61, %v2357_v5  ;;  %v4714_v54 = vsel %vm1072_vm5, %v1073_v63, %v1071_v28  ;;  %v3353_v14 = vpop.eup %3352  ;;  %vm1114_vm2 = vcmp.eq.f32.partialorder %v4639_v39, 0.0 }
 0x103   :  { %v2360_v20 = vmul.f32 %v3345_v30, %v2232_v36  ;;  %v1850_v15 = vmax.f32 %v4714_v54, 5.9604645e-08  ;;  %vm1107_vm3 = vcmp.eq.f32.partialorder %v4647_v2, 0.0  ;;  %v3355_v7 = vpop.eup %3354  ;;  %3025 = vst [vmem:[#allocation7 + $0xf0] sm:$0xff] %v2769_v50  ;;  %3026 = vst [vmem:[#allocation7 + $0xf8] sm:$0xff] %v2770_v19  ;;  %3364 = vrcp.f32 %v1847_v29  ;;  %v252_v50 = vld [vmem:[#allocation2 + $0x6b0] sm:$0xff] }
 0x104   :  { %v2767_v26 = vmul.f32 %v4151_v10, %v2499_v13  ;;  %v2768_v8 = vmul.f32 %v4159_v17, %v2500_v33  ;;  %v1064_v63 = vsel %vm1063_vm6, %v4543_v6, %v1062_v57  ;;  %v1083_v11 = vmul.f32 %v3349_v38, %v4559_v0  ;;  %v3357_v46 = vpop.eup %3356  ;;  %v4829_v13 = vpop.xlane.xlu0 %636 }
 0x105   :  { %v1076_v53 = vmul.f32 %v3351_v41, %v4583_v24  ;;  %vm1126_vm4 = vcmp.eq.f32.partialorder %v4655_v49, inf  ;;  %v2505_v43 = vmul.f32 %v3818_v3, %v2360_v20  ;;  %v2506_v27 = vmul.f32 %v3819_v60, %v2360_v20  ;;  %v3359_v55 = vpop.eup %3358  ;;  %v4840_v61 = vpop.xlane.xlu1 %645 }
 0x106   :  { %3023 = vst [vmem:[#allocation7 + $0xe0] sm:$0xff] %v2767_v26  ;;  %3024 = vst [vmem:[#allocation7 + $0xe8] sm:$0xff] %v2768_v8  ;;  %3366 = vrcp.f32 %v1850_v15  ;;  %v4739_v30 = vsel %vm1065_vm7, %v1066_v58, %v1064_v63  ;;  %vm1128_vm5 = vcmp.eq.f32.partialorder %v4655_v49, 0.0  ;;  %v1085_v44 = vsel %vm1084_vm8, %v4559_v0, %v1083_v11  ;;  %v3361_v18 = vpop.eup %3360  ;;  %v253_v8 = vld [vmem:[#allocation2 + $0x6b8] sm:$0xff] }
 0x107   :  { %v1849_v23 = vmax.f32 %v4739_v30, 5.9604645e-08  ;;  %v1078_v21 = vsel %vm1077_vm9, %v4583_v24, %v1076_v53  ;;  %v1097_v35 = vmul.f32 %v3353_v14, %v4613_v37  ;;  %v2773_v6 = vmul.f32 %v4151_v10, %v2505_v43  ;;  %v3363_v28 = vpop.eup %3362 }
 0x108   :  { %v2774_v58 = vmul.f32 %v4159_v17, %v2506_v27  ;;  %v4756_v9 = vsel %vm1086_vm10, %v1087_v34, %v1085_v44  ;;  %v4762_v48 = vsel %vm1079_vm11, %v1080_v32, %v1078_v21  ;;  %v1090_v24 = vmul.f32 %v3355_v7, %v4627_v1  ;;  %v4856_v7 = vpop.xlane.xlu0 %642  ;;  %v3820_v21 = vld [vmem:[#allocation2 + $0x100] sm:$0xff] }
 0x109   :  { %3368 = vrcp.f32 %v1849_v23  ;;  %v1852_v59 = vmax.f32 %v4756_v9, 5.9604645e-08  ;;  %v1851_v5 = vmax.f32 %v4762_v48, 5.9604645e-08  ;;  %v1099_v51 = vsel %vm1098_vm12, %v4613_v37, %v1097_v35  ;;  %3029 = vst [vmem:[#allocation7 + $0x110] sm:$0xff] %v2773_v6  ;;  %v4868_v3 = vpop.xlane.xlu1 %651 }
 0x10a   :  { %3030 = vst [vmem:[#allocation7 + $0x118] sm:$0xff] %v2774_v58  ;;  %v4775_v0 = vsel %vm1100_vm13, %v1101_v31, %v1099_v51  ;;  %v1111_v34 = vmul.f32 %v3357_v46, %v4639_v39  ;;  %v1104_v32 = vmul.f32 %v3359_v55, %v4647_v2  ;;  %v1125_v38 = vmul.f32 %v3361_v18, %v4655_v49  ;;  %v3821_v18 = vld [vmem:[#allocation2 + $0x108] sm:$0xff]  ;;  %v3822_v51 = vld [vmem:[#allocation2 + $0x130] sm:$0xff] }
 0x10b   :  { %3370 = vrcp.f32 %v1852_v59  ;;  %v1854_v57 = vmax.f32 %v4775_v0, 5.9604645e-08  ;;  %v1129_v4 = vand.u32 2147483648, %v4655_v49  ;;  %v1092_v37 = vsel %vm1091_vm14, %v4627_v1, %v1090_v24 }
 0x10c   :  { %3372 = vrcp.f32 %v1851_v5  ;;  %v1113_v31 = vsel %vm1112_vm15, %v4639_v39, %v1111_v34  ;;  %v1106_v42 = vsel %vm1105_vm0, %v4647_v2, %v1104_v32  ;;  %v4804_v16 = vsel %vm1093_vm1, %v1094_v56, %v1092_v37  ;;  %v3823_v34 = vld [vmem:[#allocation2 + $0x138] sm:$0xff] }
 0x10d   :  { %3374 = vrcp.f32 %v1854_v57  ;;  %v4810_v45 = vsel %vm1114_vm2, %v1115_v62, %v1113_v31  ;;  %v4816_v25 = vsel %vm1107_vm3, %v1108_v12, %v1106_v42  ;;  %v1853_v41 = vmax.f32 %v4804_v16, 5.9604645e-08 }
 0x10e   :  { %v1856_v22 = vmax.f32 %v4810_v45, 5.9604645e-08  ;;  %v1855_v1 = vmax.f32 %v4816_v25, 5.9604645e-08  ;;  %v1127_v56 = vsel %vm1126_vm4, %v4655_v49, %v1125_v38  ;;  %v1118_v62 = vmul.f32 %v3363_v28, %v4670_v40 }
 0x10f   :  { %v4826_v39 = vsel %vm1128_vm5, %v1129_v4, %v1127_v56  ;;  %3376 = vrcp.f32 %v1853_v41  ;;  %vm1119_vm6 = vcmp.eq.f32.partialorder %v4670_v40, inf  ;;  %v1122_v12 = vand.u32 2147483648, %v4670_v40  ;;  %v4880_v56 = vpop.xlane.xlu0 %648 }
 0x110   :  { %v1858_v2 = vmax.f32 %v4826_v39, 5.9604645e-08  ;;  %3378 = vrcp.f32 %v1856_v22  ;;  %v1120_v49 = vsel %vm1119_vm6, %v4670_v40, %v1118_v62  ;;  %vm1121_vm7 = vcmp.eq.f32.partialorder %v4670_v40, 0.0  ;;  %v3365_v33 = vpop.eup %3364  ;;  %v3832_v39 = vld [vmem:[#allocation2 + $0x160] sm:$0xff] }
 0x111   :  { %3380 = vrcp.f32 %v1855_v1  ;;  %v4844_v36 = vsel %vm1121_vm7, %v1122_v12, %v1120_v49  ;;  %v2103_v14 = vmul.f32 %v3365_v33, %v1847_v29  ;;  %v4858_v63 = vmul.f32 %v252_v50, %v252_v50 }
 0x112   :  { %3382 = vrcp.f32 %v1858_v2  ;;  %v1857_v26 = vmax.f32 %v4844_v36, 5.9604645e-08  ;;  %v1143_v11 = vand.u32 2147483648, %v4785_v47  ;;  %v4862_v53 = vmul.f32 %v253_v8, %v253_v8 }
 0x113   :  { %v3367_v19 = vpop.eup %3366  ;;  %3384 = vrsqrt.f32 %v4785_v47  ;;  %v2231_v20 = vsub.f32 2.0, %v2103_v14  ;;  %v1136_v46 = vand.u32 2147483648, %v4829_v13  ;;  %v1157_v27 = vand.u32 2147483648, %v4840_v61 }
 0x114   :  { %v2106_v40 = vmul.f32 %v3367_v19, %v1850_v15  ;;  %3386 = vrcp.f32 %v1857_v26  ;;  %v1150_v55 = vand.u32 2147483648, %v4856_v7  ;;  %v1171_v38 = vand.u32 2147483648, %v4868_v3 }
 0x115   :  { %3388 = vrsqrt.f32 %v4829_v13  ;;  %v2359_v54 = vmul.f32 %v3365_v33, %v2231_v20  ;;  %v3825_v33 = vld [vmem:[#allocation2 + $0x128] sm:$0xff]  ;;  %vm1140_vm8 = vcmp.eq.f32.partialorder %v4785_v47, inf  ;;  %vm1142_vm9 = vcmp.eq.f32.partialorder %v4785_v47, 0.0 }
 0x116   :  { %v3369_v52 = vpop.eup %3368  ;;  %v2234_v29 = vsub.f32 2.0, %v2106_v40  ;;  %3390 = vrsqrt.f32 %v4840_v61  ;;  %vm1133_vm10 = vcmp.eq.f32.partialorder %v4829_v13, inf  ;;  %vm1135_vm11 = vcmp.eq.f32.partialorder %v4829_v13, 0.0 }
 0x117   :  { %v2105_v15 = vmul.f32 %v3369_v52, %v1849_v23  ;;  %3392 = vrsqrt.f32 %v4856_v7  ;;  %v2503_v35 = vmul.f32 %v3820_v21, %v2359_v54  ;;  %v2504_v30 = vmul.f32 %v3821_v18, %v2359_v54  ;;  %v3828_v21 = vld [vmem:[#allocation2 + $0x140] sm:$0xff] }
 0x118   :  { %v3371_v43 = vpop.eup %3370  ;;  %v2362_v60 = vmul.f32 %v3367_v19, %v2234_v29  ;;  %3394 = vrsqrt.f32 %v4868_v3  ;;  %v3826_v29 = vld [vmem:[#allocation2 + $0x150] sm:$0xff]  ;;  %vm1154_vm12 = vcmp.eq.f32.partialorder %v4840_v61, inf  ;;  %vm1156_vm13 = vcmp.eq.f32.partialorder %v4840_v61, 0.0 }
 0x119   :  { %v3373_v44 = vpop.eup %3372  ;;  %v2233_v23 = vsub.f32 2.0, %v2105_v15  ;;  %v2108_v6 = vmul.f32 %v3371_v43, %v1852_v59  ;;  %v2771_v4 = vmul.f32 %v4151_v10, %v2503_v35  ;;  %v2772_v37 = vmul.f32 %v4159_v17, %v2504_v30  ;;  %v3827_v15 = vld [vmem:[#allocation2 + $0x158] sm:$0xff] }
 0x11a   :  { %v3375_v58 = vpop.eup %3374  ;;  %v2509_v24 = vmul.f32 %v3822_v51, %v2362_v60  ;;  %v2510_v32 = vmul.f32 %v3823_v34, %v2362_v60  ;;  %v2107_v28 = vmul.f32 %v3373_v44, %v1851_v5  ;;  %v3824_v5 = vld [vmem:[#allocation2 + $0x120] sm:$0xff]  ;;  %3396 = vrsqrt.f32 %v4880_v56 }
 0x11b   :  { %v2361_v31 = vmul.f32 %v3369_v52, %v2233_v23  ;;  %v2236_v42 = vsub.f32 2.0, %v2108_v6  ;;  %v2110_v12 = vmul.f32 %v3375_v58, %v1854_v57  ;;  %3027 = vst [vmem:[#allocation7 + $0x100] sm:$0xff] %v2771_v4  ;;  %3028 = vst [vmem:[#allocation7 + $0x108] sm:$0xff] %v2772_v37  ;;  %v3831_v37 = vld [vmem:[#allocation2 + $0x178] sm:$0xff]  ;;  %vm1147_vm14 = vcmp.eq.f32.partialorder %v4856_v7, inf }
 0x11c   :  { %v2777_v9 = vmul.f32 %v4151_v10, %v2509_v24  ;;  %v2778_v59 = vmul.f32 %v4159_v17, %v2510_v32  ;;  %v2235_v62 = vsub.f32 2.0, %v2107_v28  ;;  %v3377_v48 = vpop.eup %3376  ;;  %v3830_v28 = vld [vmem:[#allocation2 + $0x170] sm:$0xff]  ;;  %vm1149_vm15 = vcmp.eq.f32.partialorder %v4856_v7, 0.0 }
 0x11d   :  { %v2507_v49 = vmul.f32 %v3824_v5, %v2361_v31  ;;  %v2508_v50 = vmul.f32 %v3825_v33, %v2361_v31  ;;  %v2364_v19 = vmul.f32 %v3371_v43, %v2236_v42  ;;  %v3379_v14 = vpop.eup %3378  ;;  %v2238_v40 = vsub.f32 2.0, %v2110_v12 }
 0x11e   :  { %3033 = vst [vmem:[#allocation7 + $0x130] sm:$0xff] %v2777_v9  ;;  %3034 = vst [vmem:[#allocation7 + $0x138] sm:$0xff] %v2778_v59  ;;  %v2363_v8 = vmul.f32 %v3373_v44, %v2235_v62  ;;  %v2109_v0 = vmul.f32 %v3377_v48, %v1853_v41  ;;  %v3381_v57 = vpop.eup %3380  ;;  %v3829_v44 = vld [vmem:[#allocation2 + $0x148] sm:$0xff]  ;;  %v2112_v51 = vmul.f32 %v3379_v14, %v1856_v22  ;;  %vm1168_vm0 = vcmp.eq.f32.partialorder %v4868_v3, inf }
 0x11f   :  { %v2775_v20 = vmul.f32 %v4151_v10, %v2507_v49  ;;  %v2776_v52 = vmul.f32 %v4159_v17, %v2508_v50  ;;  %v2513_v54 = vmul.f32 %v3826_v29, %v2364_v19  ;;  %v2514_v43 = vmul.f32 %v3827_v15, %v2364_v19  ;;  %v4893_v60 = vpop.eup %3382  ;;  %v3835_v29 = vld [vmem:[#allocation2 + $0x198] sm:$0xff]  ;;  %v3836_v15 = vld [vmem:[#allocation2 + $0x180] sm:$0xff] }
 0x120   :  { %v2511_v35 = vmul.f32 %v3828_v21, %v2363_v8  ;;  %v2512_v18 = vmul.f32 %v3829_v44, %v2363_v8  ;;  %v2366_v30 = vmul.f32 %v3375_v58, %v2238_v40  ;;  %v2237_v16 = vsub.f32 2.0, %v2109_v0  ;;  %v3385_v41 = vpop.eup %3384  ;;  %v3837_v21 = vld [vmem:[#allocation2 + $0x188] sm:$0xff] }
 0x121   :  { %3031 = vst [vmem:[#allocation7 + $0x120] sm:$0xff] %v2775_v20  ;;  %3032 = vst [vmem:[#allocation7 + $0x128] sm:$0xff] %v2776_v52  ;;  %v2781_v23 = vmul.f32 %v4151_v10, %v2513_v54  ;;  %v2782_v6 = vmul.f32 %v4159_v17, %v2514_v43  ;;  %v2111_v24 = vmul.f32 %v3381_v57, %v1855_v1  ;;  %v3387_v34 = vpop.eup %3386  ;;  %v2240_v45 = vsub.f32 2.0, %v2112_v51 }
 0x122   :  { %v2779_v58 = vmul.f32 %v4151_v10, %v2511_v35  ;;  %v2780_v32 = vmul.f32 %v4159_v17, %v2512_v18  ;;  %v2517_v4 = vmul.f32 %v3830_v28, %v2366_v30  ;;  %v2518_v31 = vmul.f32 %v3831_v37, %v2366_v30  ;;  %v3389_v42 = vpop.eup %3388  ;;  %v4935_v30 = vpop.xlane.xlu0 %654 }
 0x123   :  { %3037 = vst [vmem:[#allocation7 + $0x150] sm:$0xff] %v2781_v23  ;;  %3038 = vst [vmem:[#allocation7 + $0x158] sm:$0xff] %v2782_v6  ;;  %v2365_v9 = vmul.f32 %v3377_v48, %v2237_v16  ;;  %v2239_v22 = vsub.f32 2.0, %v2111_v24  ;;  %v2114_v25 = vmul.f32 %v4893_v60, %v1858_v2  ;;  %v4909_v1 = vpop.eup %3390  ;;  %v2113_v12 = vmul.f32 %v3387_v34, %v1857_v26  ;;  %v4916_v48 = vpop.xlane.xlu1 %657  ;;  %v3833_v2 = vld [vmem:[#allocation2 + $0x168] sm:$0xff] }
 0x124   :  { %3035 = vst [vmem:[#allocation7 + $0x140] sm:$0xff] %v2779_v58  ;;  %3036 = vst [vmem:[#allocation7 + $0x148] sm:$0xff] %v2780_v32  ;;  %v2785_v59 = vmul.f32 %v4151_v10, %v2517_v4  ;;  %v2786_v62 = vmul.f32 %v4159_v17, %v2518_v31  ;;  %v1139_v5 = vmul.f32 %v3385_v41, %v4785_v47  ;;  %v4918_v49 = vpop.eup %3392  ;;  %vm1161_vm1 = vcmp.eq.f32.partialorder %v4880_v56, inf  ;;  %v3839_v32 = vld [vmem:[#allocation2 + $0x1b8] sm:$0xff]  ;;  %v3841_v31 = vld [vmem:[#allocation2 + $0x1a8] sm:$0xff] }
 0x125   :  { %v2515_v33 = vmul.f32 %v3832_v39, %v2365_v9  ;;  %v2516_v50 = vmul.f32 %v3833_v2, %v2365_v9  ;;  %v2368_v19 = vmul.f32 %v3379_v14, %v2240_v45  ;;  %v2367_v8 = vmul.f32 %v3381_v57, %v2239_v22  ;;  %v3834_v57 = vld [vmem:[#allocation2 + $0x190] sm:$0xff]  ;;  %v3395_v6 = vpop.eup %3394  ;;  %v250_v2 = vld [vmem:[#allocation2 + $0x6a0] sm:$0xff] }
 0x126   :  { %3041 = vst [vmem:[#allocation7 + $0x170] sm:$0xff] %v2785_v59  ;;  %3042 = vst [vmem:[#allocation7 + $0x178] sm:$0xff] %v2786_v62  ;;  %v2242_v40 = vsub.f32 2.0, %v2114_v25  ;;  %v2241_v0 = vsub.f32 2.0, %v2113_v12  ;;  %v1141_v36 = vsel %vm1140_vm8, %v4785_v47, %v1139_v5  ;;  %v1132_v26 = vmul.f32 %v3389_v42, %v4829_v13  ;;  %v3840_v47 = vld [vmem:[#allocation2 + $0x1a0] sm:$0xff] }
 0x127   :  { %v2783_v20 = vmul.f32 %v4151_v10, %v2515_v33  ;;  %v2784_v14 = vmul.f32 %v4159_v17, %v2516_v50  ;;  %v2521_v52 = vmul.f32 %v3834_v57, %v2368_v19  ;;  %v2522_v54 = vmul.f32 %v3835_v29, %v2368_v19  ;;  %v4950_v4 = vpop.xlane.xlu1 %663  ;;  %v3397_v37 = vpop.eup %3396  ;;  %v256_v29 = vld [vmem:[#allocation2 + $0x6d0] sm:$0xff] }
 0x128   :  { %v2519_v43 = vmul.f32 %v3836_v15, %v2367_v8  ;;  %v2520_v35 = vmul.f32 %v3837_v21, %v2367_v8  ;;  %v2370_v44 = vmul.f32 %v4893_v60, %v2242_v40  ;;  %v2369_v18 = vmul.f32 %v3387_v34, %v2241_v0  ;;  %v3838_v34 = vld [vmem:[#allocation2 + $0x1b0] sm:$0xff]  ;;  %v4977_v33 = vpop.xlane.xlu0 %660  ;;  %v251_v8 = vld [vmem:[#allocation2 + $0x6a8] sm:$0xff]  ;;  %v254_v15 = vld [vmem:[#allocation2 + $0x6c0] sm:$0xff] }
 0x129   :  { %vm1170_vm2 = vcmp.eq.f32.partialorder %v4868_v3, 0.0  ;;  %vm1163_vm3 = vcmp.eq.f32.partialorder %v4880_v56, 0.0  ;;  %3039 = vst [vmem:[#allocation7 + $0x160] sm:$0xff] %v2783_v20  ;;  %3040 = vst [vmem:[#allocation7 + $0x168] sm:$0xff] %v2784_v14  ;;  %v2789_v16 = vmul.f32 %v4151_v10, %v2521_v52  ;;  %v2790_v41 = vmul.f32 %v4159_v17, %v2522_v54  ;;  %v257_v54 = vld [vmem:[#allocation2 + $0x6d8] sm:$0xff]  ;;  %v255_v21 = vld [vmem:[#allocation2 + $0x6c8] sm:$0xff] }
 0x12a   :  { %v4943_v23 = vsel %vm1142_vm9, %v1143_v11, %v1141_v36  ;;  %v1134_v60 = vsel %vm1133_vm10, %v4829_v13, %v1132_v26  ;;  %v2787_v51 = vmul.f32 %v4151_v10, %v2519_v43  ;;  %v2788_v24 = vmul.f32 %v4159_v17, %v2520_v35 }
 0x12b   :  { %v2525_v58 = vmul.f32 %v3838_v34, %v2370_v44  ;;  %v2526_v28 = vmul.f32 %v3839_v32, %v2370_v44  ;;  %3045 = vst [vmem:[#allocation7 + $0x190] sm:$0xff] %v2789_v16  ;;  %3046 = vst [vmem:[#allocation7 + $0x198] sm:$0xff] %v2790_v41  ;;  %v2523_v11 = vmul.f32 %v3840_v47, %v2369_v18  ;;  %v1860_v9 = vmax.f32 %v4943_v23, 5.9604645e-08  ;;  %v5003_v36 = vpop.xlane.xlu1 %669  ;;  %v261_v47 = vld [vmem:[#allocation2 + $0x6f8] sm:$0xff] }
 0x12c   :  { %v2524_v42 = vmul.f32 %v3841_v31, %v2369_v18  ;;  %v4957_v45 = vsel %vm1135_vm11, %v1136_v46, %v1134_v60  ;;  %3043 = vst [vmem:[#allocation7 + $0x180] sm:$0xff] %v2787_v51  ;;  %3044 = vst [vmem:[#allocation7 + $0x188] sm:$0xff] %v2788_v24  ;;  %v1153_v62 = vmul.f32 %v4909_v1, %v4840_v61  ;;  %v1164_v19 = vand.u32 2147483648, %v4880_v56 }
 0x12d   :  { %v2793_v22 = vmul.f32 %v4151_v10, %v2525_v58  ;;  %v2794_v25 = vmul.f32 %v4159_v17, %v2526_v28  ;;  %v1859_v59 = vmax.f32 %v4957_v45, 5.9604645e-08  ;;  %v2791_v12 = vmul.f32 %v4151_v10, %v2523_v11  ;;  %v258_v11 = vld [vmem:[#allocation2 + $0x6e0] sm:$0xff] }
 0x12e   :  { %v2792_v5 = vmul.f32 %v4159_v17, %v2524_v42  ;;  %3398 = vrcp.f32 %v1860_v9  ;;  %v1146_v13 = vmul.f32 %v4918_v49, %v4856_v7  ;;  %v1155_v46 = vsel %vm1154_vm12, %v4840_v61, %v1153_v62  ;;  %v259_v62 = vld [vmem:[#allocation2 + $0x6e8] sm:$0xff] }
 0x12f   :  { %3049 = vst [vmem:[#allocation7 + $0x1b0] sm:$0xff] %v2793_v22  ;;  %3050 = vst [vmem:[#allocation7 + $0x1b8] sm:$0xff] %v2794_v25  ;;  %3400 = vrcp.f32 %v1859_v59  ;;  %v1167_v1 = vmul.f32 %v3395_v6, %v4868_v3  ;;  %v1160_v39 = vmul.f32 %v3397_v37, %v4880_v56  ;;  %v4983_v49 = vsel %vm1156_vm13, %v1157_v27, %v1155_v46  ;;  %v5031_v43 = vpop.xlane.xlu1 %675  ;;  %v260_v37 = vld [vmem:[#allocation2 + $0x6f0] sm:$0xff] }
 0x130   :  { %3047 = vst [vmem:[#allocation7 + $0x1a0] sm:$0xff] %v2791_v12  ;;  %3048 = vst [vmem:[#allocation7 + $0x1a8] sm:$0xff] %v2792_v5  ;;  %v1148_v50 = vsel %vm1147_vm14, %v4856_v7, %v1146_v13  ;;  %3402 = vrsqrt.f32 %v4916_v48  ;;  %v1862_v40 = vmax.f32 %v4983_v49, 5.9604645e-08  ;;  %v508_v52 = vmul.f32 %v251_v8, %v251_v8 }
 0x131   :  { %v4995_v0 = vsel %vm1149_vm15, %v1150_v55, %v1148_v50  ;;  %v1169_v61 = vsel %vm1168_vm0, %v4868_v3, %v1167_v1  ;;  %v1162_v27 = vsel %vm1161_vm1, %v4880_v56, %v1160_v39  ;;  %v507_v55 = vmul.f32 %v250_v2, %v250_v2  ;;  %v5024_v3 = vpop.xlane.xlu0 %666 }
 0x132   :  { %v1861_v26 = vmax.f32 %v4995_v0, 5.9604645e-08  ;;  %v5010_v20 = vsel %vm1170_vm2, %v1171_v38, %v1169_v61  ;;  %v5014_v7 = vsel %vm1163_vm3, %v1164_v19, %v1162_v27  ;;  %3404 = vrcp.f32 %v1862_v40 }
 0x133   :  { %v1864_v14 = vmax.f32 %v5010_v20, 5.9604645e-08  ;;  %v1863_v57 = vmax.f32 %v5014_v7, 5.9604645e-08  ;;  %v872_v38 = vadd.f32 %v4862_v53, %v4858_v63  ;;  %v869_v56 = vadd.f32 %v508_v52, %v507_v55  ;;  %v5053_v23 = vpop.xlane.xlu1 %681 }
 0x134   :  { %3406 = vrcp.f32 %v1861_v26  ;;  %vm1182_vm4 = vcmp.eq.f32.partialorder %v4916_v48, inf  ;;  %vm1184_vm5 = vcmp.eq.f32.partialorder %v4916_v48, 0.0  ;;  %v1185_v35 = vand.u32 2147483648, %v4916_v48 }
 0x135   :  { %3408 = vrcp.f32 %v1864_v14  ;;  %v1178_v44 = vand.u32 2147483648, %v4935_v30  ;;  %v1199_v18 = vand.u32 2147483648, %v4950_v4  ;;  %873 = vadd.xlane.f32.xlu1 %v872_v38  ;;  %870 = vadd.xlane.f32.xlu0 %v869_v56  ;;  %v513_v63 = vmul.f32 %v256_v29, %v256_v29  ;;  %v5043_v24 = vpop.xlane.xlu0 %672  ;;  %v3842_v38 = vld [vmem:[#allocation2 + $0x1d0] sm:$0xff]  ;;  %v3843_v29 = vld [vmem:[#allocation2 + $0x1d8] sm:$0xff] }
 0x136   :  { %3410 = vrcp.f32 %v1863_v57  ;;  %v514_v53 = vmul.f32 %v257_v54, %v257_v54  ;;  %v511_v16 = vmul.f32 %v254_v15, %v254_v15  ;;  %v1192_v60 = vand.u32 2147483648, %v4977_v33 }
 0x137   :  { %3412 = vrsqrt.f32 %v4935_v30  ;;  %v1213_v6 = vand.u32 2147483648, %v5003_v36  ;;  %v512_v51 = vmul.f32 %v255_v21, %v255_v21  ;;  %v1206_v32 = vand.u32 2147483648, %v5024_v3 }
 0x138   :  { %3414 = vrsqrt.f32 %v4950_v4  ;;  %v878_v28 = vadd.f32 %v514_v53, %v513_v63  ;;  %v1227_v25 = vand.u32 2147483648, %v5031_v43  ;;  %v1220_v5 = vand.u32 2147483648, %v5043_v24 }
 0x139   :  { %3416 = vrsqrt.f32 %v4977_v33  ;;  %v875_v22 = vadd.f32 %v512_v51, %v511_v16  ;;  %vm1175_vm6 = vcmp.eq.f32.partialorder %v4935_v30, inf  ;;  %v517_v45 = vmul.f32 %v260_v37, %v260_v37 }
 0x13a   :  { %3418 = vrsqrt.f32 %v5003_v36  ;;  %879 = vadd.xlane.f32.xlu1 %v878_v28  ;;  %v5059_v46 = vmul.f32 %v258_v11, %v258_v11  ;;  %v5064_v50 = vmul.f32 %v259_v62, %v259_v62  ;;  %vm1177_vm7 = vcmp.eq.f32.partialorder %v4935_v30, 0.0 }
 0x13b   :  { %v3399_v41 = vpop.eup %3398  ;;  %3420 = vrsqrt.f32 %v5024_v3  ;;  %876 = vadd.xlane.f32.xlu0 %v875_v22  ;;  %vm1196_vm8 = vcmp.eq.f32.partialorder %v4950_v4, inf  ;;  %vm1198_vm9 = vcmp.eq.f32.partialorder %v4950_v4, 0.0  ;;  %vm1189_vm10 = vcmp.eq.f32.partialorder %v4977_v33, inf  ;;  %v3847_v22 = vld [vmem:[#allocation2 + $0x1f8] sm:$0xff] }
 0x13c   :  { %v3401_v34 = vpop.eup %3400  ;;  %v2116_v58 = vmul.f32 %v3399_v41, %v1860_v9  ;;  %3422 = vrsqrt.f32 %v5031_v43  ;;  %vm1210_vm11 = vcmp.eq.f32.partialorder %v5003_v36, inf  ;;  %vm1203_vm12 = vcmp.eq.f32.partialorder %v5024_v3, inf }
 0x13d   :  { %v3403_v31 = vpop.eup %3402  ;;  %v2115_v42 = vmul.f32 %v3401_v34, %v1859_v59  ;;  %3424 = vrsqrt.f32 %v5043_v24  ;;  %v518_v59 = vmul.f32 %v261_v47, %v261_v47  ;;  %vm1191_vm13 = vcmp.eq.f32.partialorder %v4977_v33, 0.0 }
 0x13e   :  { %v2244_v9 = vsub.f32 2.0, %v2116_v58  ;;  %v1181_v12 = vmul.f32 %v3403_v31, %v4916_v48  ;;  %3426 = vrsqrt.f32 %v5053_v23  ;;  %vm1212_vm14 = vcmp.eq.f32.partialorder %v5003_v36, 0.0 }
 0x13f   :  { %v2243_v13 = vsub.f32 2.0, %v2115_v42  ;;  %v3405_v1 = vpop.eup %3404  ;;  %v884_v55 = vadd.f32 %v518_v59, %v517_v45  ;;  %vm1205_vm15 = vcmp.eq.f32.partialorder %v5024_v3, 0.0  ;;  %vm1224_vm0 = vcmp.eq.f32.partialorder %v5031_v43, inf  ;;  %v3848_v45 = vld [vmem:[#allocation2 + $0x1e0] sm:$0xff] }
 0x140   :  { %v2372_v39 = vmul.f32 %v3399_v41, %v2244_v9  ;;  %v1183_v2 = vsel %vm1182_vm4, %v4916_v48, %v1181_v12  ;;  %v2118_v61 = vmul.f32 %v3405_v1, %v1862_v40  ;;  %v3844_v40 = vld [vmem:[#allocation2 + $0x1c0] sm:$0xff]  ;;  %vm1226_vm1 = vcmp.eq.f32.partialorder %v5031_v43, 0.0 }
 0x141   :  { %v3407_v19 = vpop.eup %3406  ;;  %v2371_v8 = vmul.f32 %v3401_v34, %v2243_v13  ;;  %v5071_v27 = vsel %vm1184_vm5, %v1185_v35, %v1183_v2  ;;  %v3845_v35 = vld [vmem:[#allocation2 + $0x1c8] sm:$0xff]  ;;  %885 = vadd.xlane.f32.xlu1 %v884_v55  ;;  %vm1217_vm2 = vcmp.eq.f32.partialorder %v5043_v24, inf  ;;  %vm1219_vm3 = vcmp.eq.f32.partialorder %v5043_v24, 0.0 }
 0x142   :  { %v3409_v52 = vpop.eup %3408  ;;  %v2529_v56 = vmul.f32 %v3842_v38, %v2372_v39  ;;  %v2530_v54 = vmul.f32 %v3843_v29, %v2372_v39  ;;  %v2117_v15 = vmul.f32 %v3407_v19, %v1861_v26  ;;  %v1866_v21 = vmax.f32 %v5071_v27, 5.9604645e-08 }
 0x143   :  { %v3411_v49 = vpop.eup %3410  ;;  %v2527_v48 = vmul.f32 %v3844_v40, %v2371_v8  ;;  %v2528_v63 = vmul.f32 %v3845_v35, %v2371_v8  ;;  %v2246_v53 = vsub.f32 2.0, %v2118_v61  ;;  %v2120_v16 = vmul.f32 %v3409_v52, %v1864_v14  ;;  %v3852_v40 = vld [vmem:[#allocation2 + $0x200] sm:$0xff]  ;;  %v3853_v35 = vld [vmem:[#allocation2 + $0x208] sm:$0xff] }
 0x144   :  { %v3413_v0 = vpop.eup %3412  ;;  %v2797_v26 = vmul.f32 %v4151_v10, %v2529_v56  ;;  %v2798_v41 = vmul.f32 %v4159_v17, %v2530_v54  ;;  %v2245_v51 = vsub.f32 2.0, %v2117_v15  ;;  %v2119_v34 = vmul.f32 %v3411_v49, %v1863_v57  ;;  %v3846_v57 = vld [vmem:[#allocation2 + $0x1f0] sm:$0xff]  ;;  %v3851_v56 = vld [vmem:[#allocation2 + $0x218] sm:$0xff] }
 0x145   :  { %v3415_v58 = vpop.eup %3414  ;;  %v2795_v28 = vmul.f32 %v4151_v10, %v2527_v48  ;;  %v2796_v37 = vmul.f32 %v4159_v17, %v2528_v63  ;;  %v2374_v47 = vmul.f32 %v3405_v1, %v2246_v53  ;;  %v2248_v20 = vsub.f32 2.0, %v2120_v16  ;;  %v3849_v1 = vld [vmem:[#allocation2 + $0x1e8] sm:$0xff] }
 0x146   :  { %3053 = vst [vmem:[#allocation7 + $0x1d0] sm:$0xff] %v2797_v26  ;;  %3054 = vst [vmem:[#allocation7 + $0x1d8] sm:$0xff] %v2798_v41  ;;  %v2373_v14 = vmul.f32 %v3407_v19, %v2245_v51  ;;  %v2247_v11 = vsub.f32 2.0, %v2119_v34  ;;  %3428 = vrcp.f32 %v1866_v21  ;;  %v1174_v31 = vmul.f32 %v3413_v0, %v4935_v30  ;;  %v3417_v7 = vpop.eup %3416 }
 0x147   :  { %3051 = vst [vmem:[#allocation7 + $0x1c0] sm:$0xff] %v2795_v28  ;;  %3052 = vst [vmem:[#allocation7 + $0x1c8] sm:$0xff] %v2796_v37  ;;  %v2533_v42 = vmul.f32 %v3846_v57, %v2374_v47  ;;  %v2534_v62 = vmul.f32 %v3847_v22, %v2374_v47  ;;  %v2376_v9 = vmul.f32 %v3409_v52, %v2248_v20  ;;  %v3419_v13 = vpop.eup %3418  ;;  %v3850_v52 = vld [vmem:[#allocation2 + $0x210] sm:$0xff]  ;;  %vm1238_vm4 = vcmp.eq.f32.partialorder %v5053_v23, inf }
 0x148   :  { %v1195_v12 = vmul.f32 %v3415_v58, %v4950_v4  ;;  %v2531_v59 = vmul.f32 %v3848_v45, %v2373_v14  ;;  %v2532_v39 = vmul.f32 %v3849_v1, %v2373_v14  ;;  %v2375_v2 = vmul.f32 %v3411_v49, %v2247_v11  ;;  %v3421_v8 = vpop.eup %3420  ;;  %v265_v1 = vld [vmem:[#allocation2 + $0x718] sm:$0xff] }
 0x149   :  { %v1176_v19 = vsel %vm1175_vm6, %v4935_v30, %v1174_v31  ;;  %v2801_v61 = vmul.f32 %v4151_v10, %v2533_v42  ;;  %v2802_v55 = vmul.f32 %v4159_v17, %v2534_v62  ;;  %v2537_v38 = vmul.f32 %v3850_v52, %v2376_v9  ;;  %v3423_v54 = vpop.eup %3422 }
 0x14a   :  { %v2538_v29 = vmul.f32 %v3851_v56, %v2376_v9  ;;  %v2799_v15 = vmul.f32 %v4151_v10, %v2531_v59  ;;  %v2800_v49 = vmul.f32 %v4159_v17, %v2532_v39  ;;  %v2535_v48 = vmul.f32 %v3852_v40, %v2375_v2  ;;  %v3425_v53 = vpop.eup %3424  ;;  %v264_v59 = vld [vmem:[#allocation2 + $0x710] sm:$0xff]  ;;  %v262_v39 = vld [vmem:[#allocation2 + $0x700] sm:$0xff] }
 0x14b   :  { %v2536_v63 = vmul.f32 %v3853_v35, %v2375_v2  ;;  %3057 = vst [vmem:[#allocation7 + $0x1f0] sm:$0xff] %v2801_v61  ;;  %3058 = vst [vmem:[#allocation7 + $0x1f8] sm:$0xff] %v2802_v55  ;;  %v2805_v16 = vmul.f32 %v4151_v10, %v2537_v38  ;;  %v5114_v26 = vsel %vm1177_vm7, %v1178_v44, %v1176_v19  ;;  %v3427_v30 = vpop.eup %3426  ;;  %vm1240_vm5 = vcmp.eq.f32.partialorder %v5053_v23, 0.0  ;;  %v5207_v2 = vpop.xlane.xlu1 %687  ;;  %v268_v56 = vld [vmem:[#allocation2 + $0x730] sm:$0xff]  ;;  %v266_v35 = vld [vmem:[#allocation2 + $0x720] sm:$0xff] }
 0x14c   :  { %v2806_v0 = vmul.f32 %v4159_v17, %v2538_v29  ;;  %v1197_v41 = vsel %vm1196_vm8, %v4950_v4, %v1195_v12  ;;  %3055 = vst [vmem:[#allocation7 + $0x1e0] sm:$0xff] %v2799_v15  ;;  %3056 = vst [vmem:[#allocation7 + $0x1e8] sm:$0xff] %v2800_v49  ;;  %v2803_v51 = vmul.f32 %v4151_v10, %v2535_v48  ;;  %v1865_v58 = vmax.f32 %v5114_v26, 5.9604645e-08  ;;  %v3854_v29 = vld [vmem:[#allocation2 + $0x230] sm:$0xff]  ;;  %v3855_v15 = vld [vmem:[#allocation2 + $0x238] sm:$0xff] }
 0x14d   :  { %v2804_v34 = vmul.f32 %v4159_v17, %v2536_v63  ;;  %v5126_v28 = vsel %vm1198_vm9, %v1199_v18, %v1197_v41  ;;  %3061 = vst [vmem:[#allocation7 + $0x210] sm:$0xff] %v2805_v16  ;;  %v1188_v37 = vmul.f32 %v3417_v7, %v4977_v33  ;;  %v1209_v47 = vmul.f32 %v3419_v13, %v5003_v36  ;;  %v269_v48 = vld [vmem:[#allocation2 + $0x738] sm:$0xff]  ;;  %v267_v63 = vld [vmem:[#allocation2 + $0x728] sm:$0xff] }
 0x14e   :  { %3062 = vst [vmem:[#allocation7 + $0x218] sm:$0xff] %v2806_v0  ;;  %v1868_v44 = vmax.f32 %v5126_v28, 5.9604645e-08  ;;  %v1202_v20 = vmul.f32 %v3421_v8, %v5024_v3  ;;  %3059 = vst [vmem:[#allocation7 + $0x200] sm:$0xff] %v2803_v51  ;;  %3430 = vrcp.f32 %v1865_v58  ;;  %v1223_v4 = vmul.f32 %v3423_v54, %v5031_v43  ;;  %v273_v28 = vld [vmem:[#allocation2 + $0x758] sm:$0xff] }
 0x14f   :  { %3060 = vst [vmem:[#allocation7 + $0x208] sm:$0xff] %v2804_v34  ;;  %v1216_v18 = vmul.f32 %v3425_v53, %v5043_v24  ;;  %v881_v14 = vadd.f32 %v5064_v50, %v5059_v46  ;;  %v1190_v11 = vsel %vm1189_vm10, %v4977_v33, %v1188_v37  ;;  %v1211_v31 = vsel %vm1210_vm11, %v5003_v36, %v1209_v47  ;;  %v5221_v16 = vpop.xlane.xlu1 %693 }
 0x150   :  { %3432 = vrcp.f32 %v1868_v44  ;;  %v1204_v7 = vsel %vm1203_vm12, %v5024_v3, %v1202_v20  ;;  %v5153_v46 = vsel %vm1191_vm13, %v1192_v60, %v1190_v11  ;;  %v5159_v50 = vsel %vm1212_vm14, %v1213_v6, %v1211_v31  ;;  %v5179_v3 = vpop.xlane.xlu0 %678  ;;  %v272_v31 = vld [vmem:[#allocation2 + $0x750] sm:$0xff] }
 0x151   :  { %v5165_v57 = vsel %vm1205_vm15, %v1206_v32, %v1204_v7  ;;  %v1225_v42 = vsel %vm1224_vm0, %v5031_v43, %v1223_v4  ;;  %882 = vadd.xlane.f32.xlu0 %v881_v14  ;;  %v1867_v33 = vmax.f32 %v5153_v46, 5.9604645e-08  ;;  %v1870_v60 = vmax.f32 %v5159_v50, 5.9604645e-08 }
 0x152   :  { %v1869_v22 = vmax.f32 %v5165_v57, 5.9604645e-08  ;;  %v5177_v36 = vsel %vm1226_vm1, %v1227_v25, %v1225_v42  ;;  %v1218_v32 = vsel %vm1217_vm2, %v5043_v24, %v1216_v18  ;;  %v1237_v62 = vmul.f32 %v3427_v30, %v5053_v23 }
 0x153   :  { %v1872_v6 = vmax.f32 %v5177_v36, 5.9604645e-08  ;;  %v3429_v9 = vpop.eup %3428  ;;  %3434 = vrcp.f32 %v1867_v33  ;;  %v5193_v43 = vsel %vm1219_vm3, %v1220_v5, %v1218_v32  ;;  %v1241_v25 = vand.u32 2147483648, %v5053_v23  ;;  %v263_v5 = vld [vmem:[#allocation2 + $0x708] sm:$0xff] }
 0x154   :  { %v2122_v12 = vmul.f32 %v3429_v9, %v1866_v21  ;;  %3436 = vrcp.f32 %v1870_v60  ;;  %v1871_v13 = vmax.f32 %v5193_v43, 5.9604645e-08  ;;  %v1239_v45 = vsel %vm1238_vm4, %v5053_v23, %v1237_v62  ;;  %v5214_v61 = vpop.xlane.xlu0 %684 }
 0x155   :  { %3438 = vrcp.f32 %v1869_v22  ;;  %v5205_v24 = vsel %vm1240_vm5, %v1241_v25, %v1239_v45  ;;  %v521_v23 = vmul.f32 %v264_v59, %v264_v59  ;;  %v522_v19 = vmul.f32 %v265_v1, %v265_v1 }
 0x156   :  { %v2250_v27 = vsub.f32 2.0, %v2122_v12  ;;  %3440 = vrcp.f32 %v1872_v6  ;;  %v1874_v21 = vmax.f32 %v5205_v24, 5.9604645e-08  ;;  %v519_v8 = vmul.f32 %v262_v39, %v262_v39 }
 0x157   :  { %3442 = vrcp.f32 %v1871_v13  ;;  %v520_v52 = vmul.f32 %v263_v5, %v263_v5  ;;  %v890_v38 = vadd.f32 %v522_v19, %v521_v23  ;;  %v525_v30 = vmul.f32 %v268_v56, %v268_v56  ;;  %v3856_v5 = vld [vmem:[#allocation2 + $0x220] sm:$0xff]  ;;  %v3857_v23 = vld [vmem:[#allocation2 + $0x228] sm:$0xff] }
 0x158   :  { %v2378_v55 = vmul.f32 %v3429_v9, %v2250_v27  ;;  %3444 = vrcp.f32 %v1874_v21  ;;  %v526_v47 = vmul.f32 %v269_v48, %v269_v48  ;;  %v523_v20 = vmul.f32 %v266_v35, %v266_v35  ;;  %v5229_v18 = vpop.xlane.xlu0 %690 }
 0x159   :  { %3446 = vrsqrt.f32 %v5179_v3  ;;  %v887_v40 = vadd.f32 %v520_v52, %v519_v8  ;;  %891 = vadd.xlane.f32.xlu1 %v890_v38  ;;  %v524_v4 = vmul.f32 %v267_v63, %v267_v63  ;;  %v1234_v11 = vand.u32 2147483648, %v5179_v3  ;;  %v3858_v38 = vld [vmem:[#allocation2 + $0x250] sm:$0xff] }
 0x15a   :  { %v2541_v54 = vmul.f32 %v3854_v29, %v2378_v55  ;;  %v2542_v49 = vmul.f32 %v3855_v15, %v2378_v55  ;;  %3448 = vrsqrt.f32 %v5207_v2  ;;  %v896_v7 = vadd.f32 %v526_v47, %v525_v30 }
 0x15b   :  { %v3431_v53 = vpop.eup %3430  ;;  %3450 = vrsqrt.f32 %v5214_v61  ;;  %888 = vadd.xlane.f32.xlu0 %v887_v40  ;;  %v893_v42 = vadd.f32 %v524_v4, %v523_v20  ;;  %v1248_v62 = vand.u32 2147483648, %v5214_v61  ;;  %v1269_v9 = vand.u32 2147483648, %v5221_v16 }
 0x15c   :  { %v2809_v41 = vmul.f32 %v4151_v10, %v2541_v54  ;;  %v2810_v51 = vmul.f32 %v4159_v17, %v2542_v49  ;;  %v2121_v34 = vmul.f32 %v3431_v53, %v1865_v58  ;;  %3452 = vrsqrt.f32 %v5221_v16 }
 0x15d   :  { %v3433_v0 = vpop.eup %3432  ;;  %v1255_v58 = vand.u32 2147483648, %v5207_v2  ;;  %3454 = vrsqrt.f32 %v5229_v18  ;;  %897 = vadd.xlane.f32.xlu1 %v896_v7  ;;  %v1262_v59 = vand.u32 2147483648, %v5229_v18  ;;  %v5240_v1 = vmul.f32 %v272_v31, %v272_v31 }
 0x15e   :  { %v2124_v37 = vmul.f32 %v3433_v0, %v1868_v44  ;;  %3065 = vst [vmem:[#allocation7 + $0x230] sm:$0xff] %v2809_v41  ;;  %3066 = vst [vmem:[#allocation7 + $0x238] sm:$0xff] %v2810_v51  ;;  %v2249_v14 = vsub.f32 2.0, %v2121_v34  ;;  %v5244_v55 = vmul.f32 %v273_v28, %v273_v28  ;;  %vm1231_vm6 = vcmp.eq.f32.partialorder %v5179_v3, inf  ;;  %v3860_v34 = vld [vmem:[#allocation2 + $0x240] sm:$0xff] }
 0x15f   :  { %894 = vadd.xlane.f32.xlu0 %v893_v42  ;;  %vm1233_vm7 = vcmp.eq.f32.partialorder %v5179_v3, 0.0  ;;  %vm1252_vm8 = vcmp.eq.f32.partialorder %v5207_v2, inf  ;;  %vm1254_vm9 = vcmp.eq.f32.partialorder %v5207_v2, 0.0  ;;  %vm1245_vm10 = vcmp.eq.f32.partialorder %v5214_v61, inf  ;;  %v3864_v28 = vld [vmem:[#allocation2 + $0x260] sm:$0xff] }
 0x160   :  { %v2252_v26 = vsub.f32 2.0, %v2124_v37  ;;  %v3435_v44 = vpop.eup %3434  ;;  %v2377_v32 = vmul.f32 %v3431_v53, %v2249_v14  ;;  %v3861_v37 = vld [vmem:[#allocation2 + $0x248] sm:$0xff]  ;;  %vm1266_vm11 = vcmp.eq.f32.partialorder %v5221_v16, inf  ;;  %vm1247_vm12 = vcmp.eq.f32.partialorder %v5214_v61, 0.0 }
 0x161   :  { %v3437_v25 = vpop.eup %3436  ;;  %v2123_v45 = vmul.f32 %v3435_v44, %v1867_v33  ;;  %v3859_v33 = vld [vmem:[#allocation2 + $0x258] sm:$0xff]  ;;  %vm1268_vm13 = vcmp.eq.f32.partialorder %v5221_v16, 0.0  ;;  %vm1259_vm14 = vcmp.eq.f32.partialorder %v5229_v18, inf  ;;  %vm1261_vm15 = vcmp.eq.f32.partialorder %v5229_v18, 0.0 }
 0x162   :  { %v2380_v12 = vmul.f32 %v3433_v0, %v2252_v26  ;;  %v3439_v39 = vpop.eup %3438  ;;  %v2539_v27 = vmul.f32 %v3856_v5, %v2377_v32  ;;  %v2540_v19 = vmul.f32 %v3857_v23, %v2377_v32  ;;  %v2126_v8 = vmul.f32 %v3437_v25, %v1870_v60  ;;  %v3865_v32 = vld [vmem:[#allocation2 + $0x268] sm:$0xff] }
 0x163   :  { %v3441_v52 = vpop.eup %3440  ;;  %v2251_v29 = vsub.f32 2.0, %v2123_v45  ;;  %v2125_v54 = vmul.f32 %v3439_v39, %v1869_v22 }
 0x164   :  { %v2545_v46 = vmul.f32 %v3858_v38, %v2380_v12  ;;  %v2546_v56 = vmul.f32 %v3859_v33, %v2380_v12  ;;  %v3443_v15 = vpop.eup %3442  ;;  %v2807_v49 = vmul.f32 %v4151_v10, %v2539_v27  ;;  %v2808_v40 = vmul.f32 %v4159_v17, %v2540_v19  ;;  %v3867_v27 = vld [vmem:[#allocation2 + $0x298] sm:$0xff]  ;;  %v5277_v33 = vpop.xlane.xlu1 %699 }
 0x165   :  { %v2254_v50 = vsub.f32 2.0, %v2126_v8  ;;  %v2128_v60 = vmul.f32 %v3441_v52, %v1872_v6  ;;  %v5254_v48 = vpop.eup %3444  ;;  %v2379_v22 = vmul.f32 %v3435_v44, %v2251_v29  ;;  %v2253_v63 = vsub.f32 2.0, %v2125_v54 }
 0x166   :  { %v2813_v35 = vmul.f32 %v4151_v10, %v2545_v46  ;;  %v2814_v57 = vmul.f32 %v4159_v17, %v2546_v56  ;;  %v3447_v53 = vpop.eup %3446  ;;  %3063 = vst [vmem:[#allocation7 + $0x220] sm:$0xff] %v2807_v49  ;;  %3064 = vst [vmem:[#allocation7 + $0x228] sm:$0xff] %v2808_v40  ;;  %v2127_v36 = vmul.f32 %v3443_v15, %v1871_v13  ;;  %v3862_v13 = vld [vmem:[#allocation2 + $0x270] sm:$0xff]  ;;  %vm1280_vm0 = vcmp.eq.f32.partialorder %v5277_v33, inf }
 0x167   :  { %v2382_v0 = vmul.f32 %v3437_v25, %v2254_v50  ;;  %v2256_v41 = vsub.f32 2.0, %v2128_v60  ;;  %v2130_v6 = vmul.f32 %v5254_v48, %v1874_v21  ;;  %v3449_v51 = vpop.eup %3448  ;;  %v2543_v30 = vmul.f32 %v3860_v34, %v2379_v22  ;;  %v3863_v21 = vld [vmem:[#allocation2 + $0x278] sm:$0xff]  ;;  %v3869_v60 = vld [vmem:[#allocation2 + $0x288] sm:$0xff] }
 0x168   :  { %3069 = vst [vmem:[#allocation7 + $0x250] sm:$0xff] %v2813_v35  ;;  %3070 = vst [vmem:[#allocation7 + $0x258] sm:$0xff] %v2814_v57  ;;  %v2544_v47 = vmul.f32 %v3861_v37, %v2379_v22  ;;  %v2381_v20 = vmul.f32 %v3439_v39, %v2253_v63  ;;  %v1230_v4 = vmul.f32 %v3447_v53, %v5179_v3  ;;  %v3451_v43 = vpop.eup %3450  ;;  %v2255_v26 = vsub.f32 2.0, %v2127_v36  ;;  %v3866_v39 = vld [vmem:[#allocation2 + $0x290] sm:$0xff]  ;;  %v5292_v63 = vpop.xlane.xlu0 %696 }
 0x169   :  { %v2549_v24 = vmul.f32 %v3862_v13, %v2382_v0  ;;  %v2550_v14 = vmul.f32 %v3863_v21, %v2382_v0  ;;  %v2384_v31 = vmul.f32 %v3441_v52, %v2256_v41  ;;  %v2811_v7 = vmul.f32 %v4151_v10, %v2543_v30  ;;  %v3453_v19 = vpop.eup %3452 }
 0x16a   :  { %v2812_v42 = vmul.f32 %v4159_v17, %v2544_v47  ;;  %v2547_v44 = vmul.f32 %v3864_v28, %v2381_v20  ;;  %v2548_v25 = vmul.f32 %v3865_v32, %v2381_v20  ;;  %v2383_v38 = vmul.f32 %v3443_v15, %v2255_v26  ;;  %v3455_v40 = vpop.eup %3454  ;;  %v3868_v15 = vld [vmem:[#allocation2 + $0x280] sm:$0xff]  ;;  %v275_v32 = vld [vmem:[#allocation2 + $0x768] sm:$0xff] }
 0x16b   :  { %v2817_v12 = vmul.f32 %v4151_v10, %v2549_v24  ;;  %v2818_v45 = vmul.f32 %v4159_v17, %v2550_v14  ;;  %v2553_v5 = vmul.f32 %v3866_v39, %v2384_v31  ;;  %v2554_v23 = vmul.f32 %v3867_v27, %v2384_v31  ;;  %3067 = vst [vmem:[#allocation7 + $0x240] sm:$0xff] %v2811_v7  ;;  %v270_v20 = vld [vmem:[#allocation2 + $0x740] sm:$0xff]  ;;  %v5325_v24 = vpop.xlane.xlu1 %705  ;;  %v281_v27 = vld [vmem:[#allocation2 + $0x798] sm:$0xff] }
 0x16c   :  { %3068 = vst [vmem:[#allocation7 + $0x248] sm:$0xff] %v2812_v42  ;;  %v2815_v8 = vmul.f32 %v4151_v10, %v2547_v44  ;;  %v2816_v52 = vmul.f32 %v4159_v17, %v2548_v25  ;;  %v2258_v46 = vsub.f32 2.0, %v2130_v6  ;;  %v1232_v54 = vsel %vm1231_vm6, %v5179_v3, %v1230_v4  ;;  %v271_v4 = vld [vmem:[#allocation2 + $0x748] sm:$0xff]  ;;  %v5340_v42 = vpop.xlane.xlu0 %702  ;;  %v274_v44 = vld [vmem:[#allocation2 + $0x760] sm:$0xff] }
 0x16d   :  { %3073 = vst [vmem:[#allocation7 + $0x270] sm:$0xff] %v2817_v12  ;;  %3074 = vst [vmem:[#allocation7 + $0x278] sm:$0xff] %v2818_v45  ;;  %v2821_v56 = vmul.f32 %v4151_v10, %v2553_v5  ;;  %v2822_v29 = vmul.f32 %v4159_v17, %v2554_v23  ;;  %v1251_v49 = vmul.f32 %v3449_v51, %v5207_v2  ;;  %v3871_v51 = vld [vmem:[#allocation2 + $0x2b8] sm:$0xff]  ;;  %v280_v5 = vld [vmem:[#allocation2 + $0x790] sm:$0xff]  ;;  %vm1282_vm1 = vcmp.eq.f32.partialorder %v5277_v33, 0.0 }
 0x16e   :  { %3071 = vst [vmem:[#allocation7 + $0x260] sm:$0xff] %v2815_v8  ;;  %3072 = vst [vmem:[#allocation7 + $0x268] sm:$0xff] %v2816_v52  ;;  %v2551_v50 = vmul.f32 %v3868_v15, %v2383_v38  ;;  %v2552_v35 = vmul.f32 %v3869_v60, %v2383_v38  ;;  %v2386_v57 = vmul.f32 %v5254_v48, %v2258_v46  ;;  %v278_v23 = vld [vmem:[#allocation2 + $0x780] sm:$0xff]  ;;  %v279_v8 = vld [vmem:[#allocation2 + $0x788] sm:$0xff]  ;;  %vm1273_vm2 = vcmp.eq.f32.partialorder %v5292_v63, inf }
 0x16f   :  { %v5290_v22 = vsel %vm1233_vm7, %v1234_v11, %v1232_v54  ;;  %3077 = vst [vmem:[#allocation7 + $0x290] sm:$0xff] %v2821_v56  ;;  %3078 = vst [vmem:[#allocation7 + $0x298] sm:$0xff] %v2822_v29  ;;  %v1253_v0 = vsel %vm1252_vm8, %v5207_v2, %v1251_v49  ;;  %v1244_v41 = vmul.f32 %v3451_v43, %v5214_v61  ;;  %v3870_v11 = vld [vmem:[#allocation2 + $0x2b0] sm:$0xff]  ;;  %v5357_v39 = vpop.xlane.xlu1 %711  ;;  %v282_v15 = vld [vmem:[#allocation2 + $0x7a0] sm:$0xff]  ;;  %vm1275_vm3 = vcmp.eq.f32.partialorder %v5292_v63, 0.0 }
 0x170   :  { %v1873_v53 = vmax.f32 %v5290_v22, 5.9604645e-08  ;;  %v1265_v48 = vmul.f32 %v3453_v19, %v5221_v16  ;;  %v2819_v36 = vmul.f32 %v4151_v10, %v2551_v50  ;;  %v2820_v3 = vmul.f32 %v4159_v17, %v2552_v35  ;;  %v5361_v52 = vpop.xlane.xlu0 %708  ;;  %v284_v54 = vld [vmem:[#allocation2 + $0x7b0] sm:$0xff]  ;;  %v283_v50 = vld [vmem:[#allocation2 + $0x7a8] sm:$0xff] }
 0x171   :  { %v2557_v6 = vmul.f32 %v3870_v11, %v2386_v57  ;;  %v2558_v34 = vmul.f32 %v3871_v51, %v2386_v57  ;;  %v5308_v30 = vsel %vm1254_vm9, %v1255_v58, %v1253_v0  ;;  %v1246_v37 = vsel %vm1245_vm10, %v5214_v61, %v1244_v41 }
 0x172   :  { %3456 = vrcp.f32 %v1873_v53  ;;  %v1267_v47 = vsel %vm1266_vm11, %v5221_v16, %v1265_v48  ;;  %3075 = vst [vmem:[#allocation7 + $0x280] sm:$0xff] %v2819_v36  ;;  %3076 = vst [vmem:[#allocation7 + $0x288] sm:$0xff] %v2820_v3  ;;  %v1876_v2 = vmax.f32 %v5308_v30, 5.9604645e-08  ;;  %v5323_v58 = vsel %vm1247_vm12, %v1248_v62, %v1246_v37 }
 0x173   :  { %v2825_v43 = vmul.f32 %v4151_v10, %v2557_v6  ;;  %v2826_v13 = vmul.f32 %v4159_v17, %v2558_v34  ;;  %v1875_v21 = vmax.f32 %v5323_v58, 5.9604645e-08  ;;  %v5332_v14 = vsel %vm1268_vm13, %v1269_v9, %v1267_v47  ;;  %v276_v9 = vld [vmem:[#allocation2 + $0x770] sm:$0xff]  ;;  %v5367_v0 = vpop.xlane.xlu1 %717 }
 0x174   :  { %v1258_v31 = vmul.f32 %v3455_v40, %v5229_v18  ;;  %v902_v26 = vadd.f32 %v5244_v55, %v5240_v1  ;;  %3458 = vrcp.f32 %v1876_v2  ;;  %v1878_v61 = vmax.f32 %v5332_v14, 5.9604645e-08  ;;  %v277_v1 = vld [vmem:[#allocation2 + $0x778] sm:$0xff]  ;;  %v5375_v34 = vpop.xlane.xlu0 %714 }
 0x175   :  { %3081 = vst [vmem:[#allocation7 + $0x2b0] sm:$0xff] %v2825_v43  ;;  %3082 = vst [vmem:[#allocation7 + $0x2b8] sm:$0xff] %v2826_v13  ;;  %v527_v62 = vmul.f32 %v270_v20, %v270_v20  ;;  %v528_v7 = vmul.f32 %v271_v4, %v271_v4  ;;  %3460 = vrcp.f32 %v1875_v21  ;;  %v533_v12 = vmul.f32 %v276_v9, %v276_v9  ;;  %v285_v40 = vld [vmem:[#allocation2 + $0x7b8] sm:$0xff]  ;;  %v288_v9 = vld [vmem:[#allocation2 + $0x7d0] sm:$0xff] }
 0x176   :  { %v1260_v16 = vsel %vm1259_vm14, %v5229_v18, %v1258_v31  ;;  %903 = vadd.xlane.f32.xlu1 %v902_v26  ;;  %3462 = vrcp.f32 %v1878_v61  ;;  %v534_v45 = vmul.f32 %v277_v1, %v277_v1  ;;  %v531_v18 = vmul.f32 %v274_v44, %v274_v44  ;;  %v3872_v44 = vld [vmem:[#allocation2 + $0x2a0] sm:$0xff] }
 0x177   :  { %v5352_v55 = vsel %vm1261_vm15, %v1262_v59, %v1260_v16  ;;  %v899_v28 = vadd.f32 %v528_v7, %v527_v62  ;;  %3464 = vrsqrt.f32 %v5277_v33  ;;  %v532_v59 = vmul.f32 %v275_v32, %v275_v32 }
 0x178   :  { %v1877_v25 = vmax.f32 %v5352_v55, 5.9604645e-08  ;;  %3466 = vrsqrt.f32 %v5292_v63  ;;  %v908_v19 = vadd.f32 %v534_v45, %v533_v12  ;;  %v537_v46 = vmul.f32 %v280_v5, %v280_v5  ;;  %v3873_v12 = vld [vmem:[#allocation2 + $0x2a8] sm:$0xff] }
 0x179   :  { %900 = vadd.xlane.f32.xlu0 %v899_v28  ;;  %v905_v38 = vadd.f32 %v532_v59, %v531_v18  ;;  %v538_v56 = vmul.f32 %v281_v27, %v281_v27  ;;  %v535_v29 = vmul.f32 %v278_v23, %v278_v23  ;;  %v536_v49 = vmul.f32 %v279_v8, %v279_v8 }
 0x17a   :  { %3468 = vrcp.f32 %v1877_v25  ;;  %909 = vadd.xlane.f32.xlu1 %v908_v19  ;;  %v1283_v35 = vand.u32 2147483648, %v5277_v33  ;;  %v1276_v48 = vand.u32 2147483648, %v5292_v63  ;;  %v541_v3 = vmul.f32 %v284_v54, %v284_v54  ;;  %v3875_v54 = vld [vmem:[#allocation2 + $0x2d8] sm:$0xff] }
 0x17b   :  { %3470 = vrsqrt.f32 %v5325_v24  ;;  %v914_v57 = vadd.f32 %v538_v56, %v537_v46  ;;  %v911_v36 = vadd.f32 %v536_v49, %v535_v29  ;;  %v542_v11 = vmul.f32 %v285_v40, %v285_v40  ;;  %v3874_v56 = vld [vmem:[#allocation2 + $0x2d0] sm:$0xff] }
 0x17c   :  { %3472 = vrsqrt.f32 %v5340_v42  ;;  %v539_v6 = vmul.f32 %v282_v15, %v282_v15  ;;  %v540_v51 = vmul.f32 %v283_v50, %v283_v50  ;;  %v1297_v22 = vand.u32 2147483648, %v5325_v24 }
 0x17d   :  { %906 = vadd.xlane.f32.xlu0 %v905_v38  ;;  %3474 = vrsqrt.f32 %v5357_v39  ;;  %v1311_v43 = vand.u32 2147483648, %v5357_v39  ;;  %v920_v13 = vadd.f32 %v542_v11, %v541_v3  ;;  %v1304_v16 = vand.u32 2147483648, %v5361_v52 }
 0x17e   :  { %3476 = vrsqrt.f32 %v5361_v52  ;;  %915 = vadd.xlane.f32.xlu1 %v914_v57  ;;  %v917_v31 = vadd.f32 %v540_v51, %v539_v6  ;;  %v1318_v58 = vand.u32 2147483648, %v5375_v34  ;;  %vm1294_vm4 = vcmp.eq.f32.partialorder %v5325_v24, inf  ;;  %v3878_v51 = vld [vmem:[#allocation2 + $0x2f0] sm:$0xff] }
 0x17f   :  { %v3457_v60 = vpop.eup %3456  ;;  %3478 = vrsqrt.f32 %v5367_v0  ;;  %vm1296_vm5 = vcmp.eq.f32.partialorder %v5325_v24, 0.0  ;;  %v5397_v23 = vmul.f32 %v288_v9, %v288_v9  ;;  %vm1287_vm6 = vcmp.eq.f32.partialorder %v5340_v42, inf }
 0x180   :  { %v2129_v41 = vmul.f32 %v3457_v60, %v1873_v53  ;;  %v1290_v53 = vand.u32 2147483648, %v5340_v42  ;;  %3480 = vrsqrt.f32 %v5375_v34  ;;  %vm1308_vm7 = vcmp.eq.f32.partialorder %v5357_v39, inf }
 0x181   :  { %v3459_v37 = vpop.eup %3458  ;;  %912 = vadd.xlane.f32.xlu0 %v911_v36  ;;  %vm1289_vm8 = vcmp.eq.f32.partialorder %v5340_v42, 0.0  ;;  %vm1310_vm9 = vcmp.eq.f32.partialorder %v5357_v39, 0.0  ;;  %vm1301_vm10 = vcmp.eq.f32.partialorder %v5361_v52, inf  ;;  %vm1303_vm11 = vcmp.eq.f32.partialorder %v5361_v52, 0.0 }
 0x182   :  { %v2257_v47 = vsub.f32 2.0, %v2129_v41  ;;  %v3461_v20 = vpop.eup %3460  ;;  %v2132_v4 = vmul.f32 %v3459_v37, %v1876_v2  ;;  %921 = vadd.xlane.f32.xlu1 %v920_v13  ;;  %v1325_v2 = vand.u32 2147483648, %v5367_v0  ;;  %vm1322_vm12 = vcmp.eq.f32.partialorder %v5367_v0, inf }
 0x183   :  { %v3463_v26 = vpop.eup %3462  ;;  %v2131_v7 = vmul.f32 %v3461_v20, %v1875_v21  ;;  %vm1324_vm13 = vcmp.eq.f32.partialorder %v5367_v0, 0.0  ;;  %vm1315_vm14 = vcmp.eq.f32.partialorder %v5375_v34, inf  ;;  %vm1317_vm15 = vcmp.eq.f32.partialorder %v5375_v34, 0.0 }
 0x184   :  { %v2385_v62 = vmul.f32 %v3457_v60, %v2257_v47  ;;  %v3465_v1 = vpop.eup %3464  ;;  %v2260_v28 = vsub.f32 2.0, %v2132_v4  ;;  %v2134_v30 = vmul.f32 %v3463_v26, %v1878_v61  ;;  %v3877_v60 = vld [vmem:[#allocation2 + $0x2c8] sm:$0xff]  ;;  %v3879_v47 = vld [vmem:[#allocation2 + $0x2f8] sm:$0xff] }
 0x185   :  { %v3467_v21 = vpop.eup %3466  ;;  %v2259_v18 = vsub.f32 2.0, %v2131_v7  ;;  %v1279_v59 = vmul.f32 %v3465_v1, %v5277_v33  ;;  %918 = vadd.xlane.f32.xlu0 %v917_v31 }
 0x186   :  { %v2555_v32 = vmul.f32 %v3872_v44, %v2385_v62  ;;  %v2556_v45 = vmul.f32 %v3873_v12, %v2385_v62  ;;  %v2388_v61 = vmul.f32 %v3459_v37, %v2260_v28  ;;  %v2262_v5 = vsub.f32 2.0, %v2134_v30  ;;  %v3880_v28 = vld [vmem:[#allocation2 + $0x2e0] sm:$0xff]  ;;  %v5441_v12 = vpop.xlane.xlu1 %723 }
 0x187   :  { %v3469_v14 = vpop.eup %3468  ;;  %v1272_v27 = vmul.f32 %v3467_v21, %v5292_v63  ;;  %v2387_v38 = vmul.f32 %v3461_v20, %v2259_v18  ;;  %v1281_v15 = vsel %vm1280_vm0, %v5277_v33, %v1279_v59  ;;  %v3881_v21 = vld [vmem:[#allocation2 + $0x2e8] sm:$0xff]  ;;  %vm1336_vm0 = vcmp.eq.f32.partialorder %v5441_v12, inf }
 0x188   :  { %v2823_v19 = vmul.f32 %v4151_v10, %v2555_v32  ;;  %v2824_v8 = vmul.f32 %v4159_v17, %v2556_v45  ;;  %v2133_v46 = vmul.f32 %v3469_v14, %v1877_v25  ;;  %v2561_v29 = vmul.f32 %v3874_v56, %v2388_v61  ;;  %v3471_v55 = vpop.eup %3470  ;;  %v3876_v25 = vld [vmem:[#allocation2 + $0x2c0] sm:$0xff]  ;;  %v289_v56 = vld [vmem:[#allocation2 + $0x7d8] sm:$0xff] }
 0x189   :  { %v2562_v49 = vmul.f32 %v3875_v54, %v2388_v61  ;;  %v2390_v40 = vmul.f32 %v3463_v26, %v2262_v5  ;;  %v2559_v50 = vmul.f32 %v3876_v25, %v2387_v38  ;;  %v2560_v57 = vmul.f32 %v3877_v60, %v2387_v38  ;;  %v3473_v3 = vpop.eup %3472 }
 0x18a   :  { %3079 = vst [vmem:[#allocation7 + $0x2a0] sm:$0xff] %v2823_v19  ;;  %3080 = vst [vmem:[#allocation7 + $0x2a8] sm:$0xff] %v2824_v8  ;;  %v2261_v41 = vsub.f32 2.0, %v2133_v46  ;;  %v5415_v36 = vsel %vm1282_vm1, %v1283_v35, %v1281_v15  ;;  %v2829_v11 = vmul.f32 %v4151_v10, %v2561_v29  ;;  %v3475_v4 = vpop.eup %3474  ;;  %v1274_v9 = vsel %vm1273_vm2, %v5292_v63, %v1272_v27  ;;  %v287_v15 = vld [vmem:[#allocation2 + $0x7c8] sm:$0xff]  ;;  %v5500_v60 = vpop.xlane.xlu1 %729 }
 0x18b   :  { %v2830_v6 = vmul.f32 %v4159_v17, %v2562_v49  ;;  %v2565_v37 = vmul.f32 %v3878_v51, %v2390_v40  ;;  %v2566_v20 = vmul.f32 %v3879_v47, %v2390_v40  ;;  %v2827_v13 = vmul.f32 %v4151_v10, %v2559_v50  ;;  %v3477_v26 = vpop.eup %3476  ;;  %v286_v40 = vld [vmem:[#allocation2 + $0x7c0] sm:$0xff]  ;;  %v293_v51 = vld [vmem:[#allocation2 + $0x7f8] sm:$0xff] }
 0x18c   :  { %v2828_v33 = vmul.f32 %v4159_v17, %v2560_v57  ;;  %v2389_v35 = vmul.f32 %v3469_v14, %v2261_v41  ;;  %v1880_v31 = vmax.f32 %v5415_v36, 5.9604645e-08  ;;  %3085 = vst [vmem:[#allocation7 + $0x2d0] sm:$0xff] %v2829_v11  ;;  %v1293_v1 = vmul.f32 %v3471_v55, %v5325_v24  ;;  %v3479_v45 = vpop.eup %3478 }
 0x18d   :  { %3086 = vst [vmem:[#allocation7 + $0x2d8] sm:$0xff] %v2830_v6  ;;  %v2833_v62 = vmul.f32 %v4151_v10, %v2565_v37  ;;  %v2834_v7 = vmul.f32 %v4159_v17, %v2566_v20  ;;  %3083 = vst [vmem:[#allocation7 + $0x2c0] sm:$0xff] %v2827_v13  ;;  %v5438_v32 = vsel %vm1275_vm3, %v1276_v48, %v1274_v9  ;;  %v3481_v19 = vpop.eup %3480  ;;  %v292_v6 = vld [vmem:[#allocation2 + $0x7f0] sm:$0xff]  ;;  %v290_v37 = vld [vmem:[#allocation2 + $0x7e0] sm:$0xff]  ;;  %vm1338_vm1 = vcmp.eq.f32.partialorder %v5441_v12, 0.0 }
 0x18e   :  { %3084 = vst [vmem:[#allocation7 + $0x2c8] sm:$0xff] %v2828_v33  ;;  %v2563_v30 = vmul.f32 %v3880_v28, %v2389_v35  ;;  %v2564_v44 = vmul.f32 %v3881_v21, %v2389_v35  ;;  %3482 = vrcp.f32 %v1880_v31  ;;  %v1879_v18 = vmax.f32 %v5438_v32, 5.9604645e-08  ;;  %v291_v20 = vld [vmem:[#allocation2 + $0x7e8] sm:$0xff]  ;;  %v5533_v13 = vpop.xlane.xlu1 %735 }
 0x18f   :  { %3089 = vst [vmem:[#allocation7 + $0x2f0] sm:$0xff] %v2833_v62  ;;  %3090 = vst [vmem:[#allocation7 + $0x2f8] sm:$0xff] %v2834_v7  ;;  %v1295_v59 = vsel %vm1294_vm4, %v5325_v24, %v1293_v1  ;;  %v1286_v14 = vmul.f32 %v3473_v3, %v5340_v42  ;;  %v1307_v61 = vmul.f32 %v3475_v4, %v5357_v39  ;;  %v5467_v24 = vpop.xlane.xlu0 %720  ;;  %v1339_v21 = vand.u32 2147483648, %v5441_v12 }
 0x190   :  { %v2831_v63 = vmul.f32 %v4151_v10, %v2563_v30  ;;  %v2832_v48 = vmul.f32 %v4159_v17, %v2564_v44  ;;  %v5455_v5 = vsel %vm1296_vm5, %v1297_v22, %v1295_v59  ;;  %v1300_v27 = vmul.f32 %v3477_v26, %v5361_v52 }
 0x191   :  { %3484 = vrcp.f32 %v1879_v18  ;;  %v1882_v8 = vmax.f32 %v5455_v5, 5.9604645e-08  ;;  %v1288_v38 = vsel %vm1287_vm6, %v5340_v42, %v1286_v14  ;;  %v1309_v46 = vsel %vm1308_vm7, %v5357_v39, %v1307_v61 }
 0x192   :  { %3087 = vst [vmem:[#allocation7 + $0x2e0] sm:$0xff] %v2831_v63  ;;  %3088 = vst [vmem:[#allocation7 + $0x2e8] sm:$0xff] %v2832_v48  ;;  %v5473_v22 = vsel %vm1289_vm8, %v1290_v53, %v1288_v38  ;;  %v5479_v29 = vsel %vm1310_vm9, %v1311_v43, %v1309_v46  ;;  %v1302_v54 = vsel %vm1301_vm10, %v5361_v52, %v1300_v27  ;;  %v1332_v44 = vand.u32 2147483648, %v5467_v24  ;;  %v5548_v14 = vpop.xlane.xlu1 %741  ;;  %v3882_v48 = vld [vmem:[#allocation2 + $0x310] sm:$0xff] }
 0x193   :  { %v1321_v49 = vmul.f32 %v3479_v45, %v5367_v0  ;;  %3486 = vrcp.f32 %v1882_v8  ;;  %v1881_v42 = vmax.f32 %v5473_v22, 5.9604645e-08  ;;  %v1884_v53 = vmax.f32 %v5479_v29, 5.9604645e-08  ;;  %v5525_v47 = vpop.xlane.xlu0 %726 }
 0x194   :  { %v5493_v39 = vsel %vm1303_vm11, %v1304_v16, %v1302_v54  ;;  %v1314_v25 = vmul.f32 %v3481_v19, %v5375_v34  ;;  %v546_v50 = vmul.f32 %v289_v56, %v289_v56  ;;  %v543_v16 = vmul.f32 %v286_v40, %v286_v40  ;;  %v3883_v19 = vld [vmem:[#allocation2 + $0x318] sm:$0xff] }
 0x195   :  { %v1883_v43 = vmax.f32 %v5493_v39, 5.9604645e-08  ;;  %v1323_v55 = vsel %vm1322_vm12, %v5367_v0, %v1321_v49  ;;  %3488 = vrcp.f32 %v1881_v42  ;;  %v544_v57 = vmul.f32 %v287_v15, %v287_v15 }
 0x196   :  { %v5508_v52 = vsel %vm1324_vm13, %v1325_v2, %v1323_v55  ;;  %3490 = vrcp.f32 %v1884_v53  ;;  %v1316_v3 = vsel %vm1315_vm14, %v5375_v34, %v1314_v25  ;;  %v926_v11 = vadd.f32 %v546_v50, %v5397_v23 }
 0x197   :  { %v1886_v41 = vmax.f32 %v5508_v52, 5.9604645e-08  ;;  %3492 = vrcp.f32 %v1883_v43  ;;  %v5523_v0 = vsel %vm1317_vm15, %v1318_v58, %v1316_v3  ;;  %v923_v2 = vadd.f32 %v544_v57, %v543_v16  ;;  %v5538_v9 = vpop.xlane.xlu0 %732  ;;  %v3884_v57 = vld [vmem:[#allocation2 + $0x300] sm:$0xff] }
 0x198   :  { %v1885_v23 = vmax.f32 %v5523_v0, 5.9604645e-08  ;;  %927 = vadd.xlane.f32.xlu1 %v926_v11  ;;  %v549_v34 = vmul.f32 %v292_v6, %v292_v6  ;;  %v550_v58 = vmul.f32 %v293_v51, %v293_v51  ;;  %v547_v4 = vmul.f32 %v290_v37, %v290_v37  ;;  %v3885_v11 = vld [vmem:[#allocation2 + $0x308] sm:$0xff] }
 0x199   :  { %3494 = vrcp.f32 %v1886_v41  ;;  %924 = vadd.xlane.f32.xlu0 %v923_v2  ;;  %v548_v35 = vmul.f32 %v291_v20, %v291_v20  ;;  %v1353_v45 = vand.u32 2147483648, %v5500_v60  ;;  %v1346_v59 = vand.u32 2147483648, %v5525_v47 }
 0x19a   :  { %3496 = vrsqrt.f32 %v5441_v12  ;;  %v932_v62 = vadd.f32 %v550_v58, %v549_v34  ;;  %v1360_v46 = vand.u32 2147483648, %v5538_v9  ;;  %v1381_v50 = vand.u32 2147483648, %v5548_v14 }
 0x19b   :  { %3498 = vrcp.f32 %v1885_v23  ;;  %v3483_v33 = vpop.eup %3482  ;;  %v929_v7 = vadd.f32 %v548_v35, %v547_v4  ;;  %v3886_v4 = vld [vmem:[#allocation2 + $0x330] sm:$0xff]  ;;  %v3887_v35 = vld [vmem:[#allocation2 + $0x338] sm:$0xff]  ;;  %vm1329_vm2 = vcmp.eq.f32.partialorder %v5467_v24, inf  ;;  %vm1331_vm3 = vcmp.eq.f32.partialorder %v5467_v24, 0.0 }
 0x19c   :  { %v2136_v26 = vmul.f32 %v3483_v33, %v1880_v31  ;;  %3500 = vrsqrt.f32 %v5467_v24  ;;  %933 = vadd.xlane.f32.xlu1 %v932_v62  ;;  %vm1350_vm4 = vcmp.eq.f32.partialorder %v5500_v60, inf  ;;  %vm1352_vm5 = vcmp.eq.f32.partialorder %v5500_v60, 0.0 }
 0x19d   :  { %3502 = vrsqrt.f32 %v5500_v60  ;;  %930 = vadd.xlane.f32.xlu0 %v929_v7  ;;  %vm1343_vm6 = vcmp.eq.f32.partialorder %v5525_v47, inf  ;;  %vm1364_vm7 = vcmp.eq.f32.partialorder %v5533_v13, inf  ;;  %vm1345_vm8 = vcmp.eq.f32.partialorder %v5525_v47, 0.0 }
 0x19e   :  { %v3485_v1 = vpop.eup %3484  ;;  %v2264_v28 = vsub.f32 2.0, %v2136_v26  ;;  %3504 = vrsqrt.f32 %v5525_v47  ;;  %vm1366_vm9 = vcmp.eq.f32.partialorder %v5533_v13, 0.0  ;;  %vm1357_vm10 = vcmp.eq.f32.partialorder %v5538_v9, inf }
 0x19f   :  { %v2135_v30 = vmul.f32 %v3485_v1, %v1879_v18  ;;  %3506 = vrsqrt.f32 %v5533_v13  ;;  %v1367_v18 = vand.u32 2147483648, %v5533_v13  ;;  %vm1359_vm11 = vcmp.eq.f32.partialorder %v5538_v9, 0.0 }
 0x1a0   :  { %v3487_v36 = vpop.eup %3486  ;;  %v2392_v31 = vmul.f32 %v3483_v33, %v2264_v28  ;;  %3508 = vrsqrt.f32 %v5538_v9  ;;  %vm1378_vm12 = vcmp.eq.f32.partialorder %v5548_v14, inf  ;;  %vm1380_vm13 = vcmp.eq.f32.partialorder %v5548_v14, 0.0 }
 0x1a1   :  { %v2263_v61 = vsub.f32 2.0, %v2135_v30  ;;  %v2138_v32 = vmul.f32 %v3487_v36, %v1882_v8  ;;  %3510 = vrsqrt.f32 %v5548_v14  ;;  %v5560_v8 = vpop.xlane.xlu0 %738 }
 0x1a2   :  { %v3489_v63 = vpop.eup %3488  ;;  %v2569_v27 = vmul.f32 %v3882_v48, %v2392_v31  ;;  %v2570_v38 = vmul.f32 %v3883_v19, %v2392_v31  ;;  %3512 = vrsqrt.f32 %v5560_v8  ;;  %vm1371_vm14 = vcmp.eq.f32.partialorder %v5560_v8, inf }
 0x1a3   :  { %v3491_v56 = vpop.eup %3490  ;;  %v2391_v54 = vmul.f32 %v3485_v1, %v2263_v61  ;;  %v2266_v49 = vsub.f32 2.0, %v2138_v32  ;;  %v2137_v5 = vmul.f32 %v3489_v63, %v1881_v42  ;;  %v3889_v61 = vld [vmem:[#allocation2 + $0x328] sm:$0xff]  ;;  %vm1373_vm15 = vcmp.eq.f32.partialorder %v5560_v8, 0.0 }
 0x1a4   :  { %v3493_v40 = vpop.eup %3492  ;;  %v2837_v15 = vmul.f32 %v4151_v10, %v2569_v27  ;;  %v2838_v55 = vmul.f32 %v4159_v17, %v2570_v38  ;;  %v2140_v25 = vmul.f32 %v3491_v56, %v1884_v53  ;;  %v5573_v53 = vpop.xlane.xlu1 %747  ;;  %v3891_v27 = vld [vmem:[#allocation2 + $0x358] sm:$0xff] }
 0x1a5   :  { %v2567_v3 = vmul.f32 %v3884_v57, %v2391_v54  ;;  %v2568_v22 = vmul.f32 %v3885_v11, %v2391_v54  ;;  %v2394_v42 = vmul.f32 %v3487_v36, %v2266_v49  ;;  %v2265_v2 = vsub.f32 2.0, %v2137_v5  ;;  %v3888_v36 = vld [vmem:[#allocation2 + $0x320] sm:$0xff]  ;;  %v5591_v0 = vpop.xlane.xlu0 %744  ;;  %v3893_v11 = vld [vmem:[#allocation2 + $0x348] sm:$0xff] }
 0x1a6   :  { %v3495_v16 = vpop.eup %3494  ;;  %3093 = vst [vmem:[#allocation7 + $0x310] sm:$0xff] %v2837_v15  ;;  %3094 = vst [vmem:[#allocation7 + $0x318] sm:$0xff] %v2838_v55  ;;  %v2268_v51 = vsub.f32 2.0, %v2140_v25  ;;  %v2139_v37 = vmul.f32 %v3493_v40, %v1883_v43  ;;  %v3892_v57 = vld [vmem:[#allocation2 + $0x340] sm:$0xff] }
 0x1a7   :  { %v3497_v6 = vpop.eup %3496  ;;  %v2142_v29 = vmul.f32 %v3495_v16, %v1886_v41  ;;  %v2835_v34 = vmul.f32 %v4151_v10, %v2567_v3  ;;  %v2836_v58 = vmul.f32 %v4159_v17, %v2568_v22  ;;  %v2573_v33 = vmul.f32 %v3886_v4, %v2394_v42 }
 0x1a8   :  { %v5575_v20 = vpop.eup %3498  ;;  %v2574_v26 = vmul.f32 %v3887_v35, %v2394_v42  ;;  %v2393_v39 = vmul.f32 %v3489_v63, %v2265_v2  ;;  %v2396_v43 = vmul.f32 %v3491_v56, %v2268_v51  ;;  %v2267_v52 = vsub.f32 2.0, %v2139_v37  ;;  %v3890_v63 = vld [vmem:[#allocation2 + $0x350] sm:$0xff] }
 0x1a9   :  { %v2270_v41 = vsub.f32 2.0, %v2142_v29  ;;  %3091 = vst [vmem:[#allocation7 + $0x300] sm:$0xff] %v2835_v34  ;;  %3092 = vst [vmem:[#allocation7 + $0x308] sm:$0xff] %v2836_v58  ;;  %v2841_v62 = vmul.f32 %v4151_v10, %v2573_v33  ;;  %v2141_v1 = vmul.f32 %v5575_v20, %v1885_v23  ;;  %v1335_v28 = vmul.f32 %v3497_v6, %v5441_v12  ;;  %v3501_v30 = vpop.eup %3500  ;;  %v3894_v42 = vld [vmem:[#allocation2 + $0x370] sm:$0xff]  ;;  %v3895_v6 = vld [vmem:[#allocation2 + $0x378] sm:$0xff] }
 0x1aa   :  { %v2842_v7 = vmul.f32 %v4159_v17, %v2574_v26  ;;  %v2571_v31 = vmul.f32 %v3888_v36, %v2393_v39  ;;  %v2572_v32 = vmul.f32 %v3889_v61, %v2393_v39  ;;  %v2577_v48 = vmul.f32 %v3890_v63, %v2396_v43  ;;  %v3503_v23 = vpop.eup %3502 }
 0x1ab   :  { %v2578_v19 = vmul.f32 %v3891_v27, %v2396_v43  ;;  %3097 = vst [vmem:[#allocation7 + $0x330] sm:$0xff] %v2841_v62  ;;  %v2395_v38 = vmul.f32 %v3493_v40, %v2267_v52  ;;  %v2398_v56 = vmul.f32 %v3495_v16, %v2270_v41  ;;  %v2269_v54 = vsub.f32 2.0, %v2141_v1  ;;  %v5603_v40 = vpop.xlane.xlu1 %753  ;;  %v3505_v16 = vpop.eup %3504  ;;  %v3897_v52 = vld [vmem:[#allocation2 + $0x368] sm:$0xff] }
 0x1ac   :  { %3098 = vst [vmem:[#allocation7 + $0x338] sm:$0xff] %v2842_v7  ;;  %v1337_v49 = vsel %vm1336_vm0, %v5441_v12, %v1335_v28  ;;  %v2839_v5 = vmul.f32 %v4151_v10, %v2571_v31  ;;  %v2840_v15 = vmul.f32 %v4159_v17, %v2572_v32  ;;  %v2845_v55 = vmul.f32 %v4151_v10, %v2577_v48  ;;  %v3507_v37 = vpop.eup %3506  ;;  %v5625_v1 = vpop.xlane.xlu0 %750 }
 0x1ad   :  { %v2846_v25 = vmul.f32 %v4159_v17, %v2578_v19  ;;  %v2575_v3 = vmul.f32 %v3892_v57, %v2395_v38  ;;  %v2576_v22 = vmul.f32 %v3893_v11, %v2395_v38  ;;  %v2581_v2 = vmul.f32 %v3894_v42, %v2398_v56  ;;  %v3509_v33 = vpop.eup %3508 }
 0x1ae   :  { %v2582_v51 = vmul.f32 %v3895_v6, %v2398_v56  ;;  %3095 = vst [vmem:[#allocation7 + $0x320] sm:$0xff] %v2839_v5  ;;  %3096 = vst [vmem:[#allocation7 + $0x328] sm:$0xff] %v2840_v15  ;;  %v2397_v29 = vmul.f32 %v5575_v20, %v2269_v54  ;;  %v5611_v34 = vsel %vm1338_vm1, %v1339_v21, %v1337_v49  ;;  %v3511_v12 = vpop.eup %3510  ;;  %v3896_v21 = vld [vmem:[#allocation2 + $0x360] sm:$0xff]  ;;  %v1409_v6 = vand.u32 2147483648, %v5603_v40 }
 0x1af   :  { %3101 = vst [vmem:[#allocation7 + $0x350] sm:$0xff] %v2845_v55  ;;  %3102 = vst [vmem:[#allocation7 + $0x358] sm:$0xff] %v2846_v25  ;;  %v1328_v58 = vmul.f32 %v3501_v30, %v5467_v24  ;;  %v1349_v4 = vmul.f32 %v3503_v23, %v5500_v60  ;;  %v2843_v35 = vmul.f32 %v4151_v10, %v2575_v3  ;;  %v1888_v62 = vmax.f32 %v5611_v34, 5.9604645e-08  ;;  %v5638_v48 = vpop.xlane.xlu1 %759  ;;  %v3513_v27 = vpop.eup %3512 }
 0x1b0   :  { %v2844_v26 = vmul.f32 %v4159_v17, %v2576_v22  ;;  %v2849_v39 = vmul.f32 %v4151_v10, %v2581_v2  ;;  %v2850_v20 = vmul.f32 %v4159_v17, %v2582_v51  ;;  %v2579_v43 = vmul.f32 %v3896_v21, %v2397_v29 }
 0x1b1   :  { %v2580_v41 = vmul.f32 %v3897_v52, %v2397_v29  ;;  %v1330_v7 = vsel %vm1329_vm2, %v5467_v24, %v1328_v58  ;;  %3099 = vst [vmem:[#allocation7 + $0x340] sm:$0xff] %v2843_v35  ;;  %v1351_v30 = vsel %vm1350_vm4, %v5500_v60, %v1349_v4  ;;  %v1342_v36 = vmul.f32 %v3505_v16, %v5525_v47 }
 0x1b2   :  { %3100 = vst [vmem:[#allocation7 + $0x348] sm:$0xff] %v2844_v26  ;;  %3105 = vst [vmem:[#allocation7 + $0x370] sm:$0xff] %v2849_v39  ;;  %v1333_v28 = vsel %vm1331_vm3, %v1332_v44, %v1330_v7  ;;  %v1363_v31 = vmul.f32 %v3507_v37, %v5533_v13  ;;  %v2847_v61 = vmul.f32 %v4151_v10, %v2579_v43  ;;  %3514 = vrcp.f32 %v1888_v62 }
 0x1b3   :  { %3106 = vst [vmem:[#allocation7 + $0x378] sm:$0xff] %v2850_v20  ;;  %v2848_v32 = vmul.f32 %v4159_v17, %v2580_v41  ;;  %v1887_v63 = vmax.f32 %v1333_v28, 5.9604645e-08  ;;  %v5644_v24 = vsel %vm1352_vm5, %v1353_v45, %v1351_v30  ;;  %v1344_v44 = vsel %vm1343_vm6, %v5525_v47, %v1342_v36  ;;  %v5694_v25 = vpop.xlane.xlu1 %765  ;;  %v3898_v30 = vld [vmem:[#allocation2 + $0x390] sm:$0xff] }
 0x1b4   :  { %v1365_v19 = vsel %vm1364_vm7, %v5533_v13, %v1363_v31  ;;  %v1356_v23 = vmul.f32 %v3509_v33, %v5538_v9  ;;  %3103 = vst [vmem:[#allocation7 + $0x360] sm:$0xff] %v2847_v61  ;;  %v1890_v38 = vmax.f32 %v5644_v24, 5.9604645e-08  ;;  %v1347_v60 = vsel %vm1345_vm8, %v1346_v59, %v1344_v44  ;;  %v5677_v59 = vpop.xlane.xlu0 %756  ;;  %v3899_v31 = vld [vmem:[#allocation2 + $0x398] sm:$0xff] }
 0x1b5   :  { %3104 = vst [vmem:[#allocation7 + $0x368] sm:$0xff] %v2848_v32  ;;  %3516 = vrcp.f32 %v1887_v63  ;;  %v5662_v45 = vsel %vm1366_vm9, %v1367_v18, %v1365_v19  ;;  %v1889_v56 = vmax.f32 %v1347_v60, 5.9604645e-08  ;;  %v1377_v5 = vmul.f32 %v3511_v12, %v5548_v14 }
 0x1b6   :  { %v1892_v54 = vmax.f32 %v5662_v45, 5.9604645e-08  ;;  %v1358_v49 = vsel %vm1357_vm10, %v5538_v9, %v1356_v23  ;;  %3518 = vrcp.f32 %v1890_v38  ;;  %v1370_v13 = vmul.f32 %v3513_v27, %v5560_v8 }
 0x1b7   :  { %v5673_v47 = vsel %vm1359_vm11, %v1360_v46, %v1358_v49  ;;  %3520 = vrcp.f32 %v1889_v56  ;;  %v1379_v15 = vsel %vm1378_vm12, %v5548_v14, %v1377_v5  ;;  %v1374_v55 = vand.u32 2147483648, %v5560_v8  ;;  %v3901_v5 = vld [vmem:[#allocation2 + $0x388] sm:$0xff] }
 0x1b8   :  { %v1891_v18 = vmax.f32 %v5673_v47, 5.9604645e-08  ;;  %3522 = vrcp.f32 %v1892_v54  ;;  %v5690_v9 = vsel %vm1380_vm13, %v1381_v50, %v1379_v15  ;;  %v1372_v46 = vsel %vm1371_vm14, %v5560_v8, %v1370_v13  ;;  %v5705_v14 = vpop.xlane.xlu0 %762  ;;  %v5709_v8 = vpop.xlane.xlu1 %771 }
 0x1b9   :  { %v1894_v16 = vmax.f32 %v5690_v9, 5.9604645e-08  ;;  %v5697_v57 = vsel %vm1373_vm15, %v1374_v55, %v1372_v46  ;;  %v1395_v22 = vand.u32 2147483648, %v5573_v53  ;;  %v1388_v2 = vand.u32 2147483648, %v5591_v0 }
 0x1ba   :  { %3524 = vrcp.f32 %v1891_v18  ;;  %v1893_v3 = vmax.f32 %v5697_v57, 5.9604645e-08  ;;  %v1402_v51 = vand.u32 2147483648, %v5625_v1  ;;  %v1423_v34 = vand.u32 2147483648, %v5638_v48 }
 0x1bb   :  { %3526 = vrsqrt.f32 %v5573_v53  ;;  %v1416_v33 = vand.u32 2147483648, %v5677_v59  ;;  %v1437_v35 = vand.u32 2147483648, %v5694_v25  ;;  %v1430_v26 = vand.u32 2147483648, %v5705_v14 }
 0x1bc   :  { %3528 = vrcp.f32 %v1894_v16  ;;  %v5720_v58 = vpop.xlane.xlu0 %768  ;;  %v5727_v43 = vpop.xlane.xlu1 %777  ;;  %vm1392_vm0 = vcmp.eq.f32.partialorder %v5573_v53, inf  ;;  %vm1385_vm1 = vcmp.eq.f32.partialorder %v5591_v0, inf  ;;  %vm1394_vm2 = vcmp.eq.f32.partialorder %v5573_v53, 0.0 }
 0x1bd   :  { %3530 = vrcp.f32 %v1893_v3  ;;  %v1444_v7 = vand.u32 2147483648, %v5720_v58  ;;  %vm1387_vm3 = vcmp.eq.f32.partialorder %v5591_v0, 0.0  ;;  %vm1406_vm4 = vcmp.eq.f32.partialorder %v5603_v40, inf }
 0x1be   :  { %3532 = vrsqrt.f32 %v5591_v0  ;;  %vm1399_vm5 = vcmp.eq.f32.partialorder %v5625_v1, inf  ;;  %vm1408_vm6 = vcmp.eq.f32.partialorder %v5603_v40, 0.0  ;;  %vm1401_vm7 = vcmp.eq.f32.partialorder %v5625_v1, 0.0 }
 0x1bf   :  { %3534 = vrsqrt.f32 %v5603_v40  ;;  %v3515_v50 = vpop.eup %3514  ;;  %vm1420_vm8 = vcmp.eq.f32.partialorder %v5638_v48, inf  ;;  %vm1413_vm9 = vcmp.eq.f32.partialorder %v5677_v59, inf  ;;  %vm1422_vm10 = vcmp.eq.f32.partialorder %v5638_v48, 0.0 }
 0x1c0   :  { %3536 = vrsqrt.f32 %v5625_v1  ;;  %v2144_v11 = vmul.f32 %v3515_v50, %v1888_v62  ;;  %v1451_v62 = vand.u32 2147483648, %v5709_v8  ;;  %vm1415_vm11 = vcmp.eq.f32.partialorder %v5677_v59, 0.0 }
 0x1c1   :  { %3538 = vrsqrt.f32 %v5638_v48  ;;  %vm1427_vm14 = vcmp.eq.f32.partialorder %v5705_v14, inf  ;;  %vm1448_vm15 = vcmp.eq.f32.partialorder %v5709_v8, inf  ;;  %vm1441_vm13 = vcmp.eq.f32.partialorder %v5720_v58, inf }
 0x1c2   :  { %v3517_v42 = vpop.eup %3516  ;;  %3540 = vrsqrt.f32 %v5677_v59  ;;  %v2272_v37 = vsub.f32 2.0, %v2144_v11  ;;  %vm1443_vm12 = vcmp.eq.f32.partialorder %v5720_v58, 0.0 }
 0x1c3   :  { %v2143_v29 = vmul.f32 %v3517_v42, %v1887_v63  ;;  %3542 = vrsqrt.f32 %v5694_v25  ;;  %v3519_v4 = vpop.eup %3518 }
 0x1c4   :  { %3544 = vrsqrt.f32 %v5705_v14  ;;  %v3521_v39 = vpop.eup %3520  ;;  %v2400_v20 = vmul.f32 %v3515_v50, %v2272_v37  ;;  %v2146_v21 = vmul.f32 %v3519_v4, %v1890_v38 }
 0x1c5   :  { %v2271_v12 = vsub.f32 2.0, %v2143_v29  ;;  %3546 = vrsqrt.f32 %v5709_v8  ;;  %v3523_v52 = vpop.eup %3522  ;;  %v2145_v41 = vmul.f32 %v3521_v39, %v1889_v56  ;;  %v3900_v56 = vld [vmem:[#allocation2 + $0x380] sm:$0xff]  ;;  %v3902_v29 = vld [vmem:[#allocation2 + $0x3b0] sm:$0xff] }
 0x1c6   :  { %3548 = vrsqrt.f32 %v5720_v58  ;;  %v2585_v36 = vmul.f32 %v3898_v30, %v2400_v20  ;;  %v2586_v61 = vmul.f32 %v3899_v31, %v2400_v20  ;;  %v2274_v63 = vsub.f32 2.0, %v2146_v21 }
 0x1c7   :  { %v3525_v28 = vpop.eup %3524  ;;  %v2399_v32 = vmul.f32 %v3517_v42, %v2271_v12  ;;  %v2273_v24 = vsub.f32 2.0, %v2145_v41  ;;  %v2148_v44 = vmul.f32 %v3523_v52, %v1892_v54  ;;  %3550 = vrsqrt.f32 %v5727_v43  ;;  %v3904_v12 = vld [vmem:[#allocation2 + $0x3a0] sm:$0xff]  ;;  %v3905_v41 = vld [vmem:[#allocation2 + $0x3a8] sm:$0xff] }
 0x1c8   :  { %v5732_v27 = vpop.eup %3526  ;;  %v2147_v19 = vmul.f32 %v3525_v28, %v1891_v18  ;;  %v2853_v38 = vmul.f32 %v4151_v10, %v2585_v36  ;;  %v2854_v60 = vmul.f32 %v4159_v17, %v2586_v61  ;;  %v2402_v15 = vmul.f32 %v3519_v4, %v2274_v63 }
 0x1c9   :  { %v3529_v23 = vpop.eup %3528  ;;  %v2583_v49 = vmul.f32 %v3900_v56, %v2399_v32  ;;  %v2584_v47 = vmul.f32 %v3901_v5, %v2399_v32  ;;  %v2401_v55 = vmul.f32 %v3521_v39, %v2273_v24  ;;  %v2276_v46 = vsub.f32 2.0, %v2148_v44  ;;  %v3903_v39 = vld [vmem:[#allocation2 + $0x3b8] sm:$0xff] }
 0x1ca   :  { %v3531_v13 = vpop.eup %3530  ;;  %v2275_v50 = vsub.f32 2.0, %v2147_v19  ;;  %3109 = vst [vmem:[#allocation7 + $0x390] sm:$0xff] %v2853_v38  ;;  %3110 = vst [vmem:[#allocation7 + $0x398] sm:$0xff] %v2854_v60  ;;  %v2150_v11 = vmul.f32 %v3529_v23, %v1894_v16  ;;  %v2589_v4 = vmul.f32 %v3902_v29, %v2402_v15  ;;  %v2590_v20 = vmul.f32 %v3903_v39, %v2402_v15  ;;  %v3907_v19 = vld [vmem:[#allocation2 + $0x3d8] sm:$0xff]  ;;  %v3908_v60 = vld [vmem:[#allocation2 + $0x3c0] sm:$0xff] }
 0x1cb   :  { %v3533_v45 = vpop.eup %3532  ;;  %v2851_v54 = vmul.f32 %v4151_v10, %v2583_v49  ;;  %v2852_v18 = vmul.f32 %v4159_v17, %v2584_v47  ;;  %v2149_v42 = vmul.f32 %v3531_v13, %v1893_v3  ;;  %v2587_v21 = vmul.f32 %v3904_v12, %v2401_v55  ;;  %v3909_v49 = vld [vmem:[#allocation2 + $0x3c8] sm:$0xff]  ;;  %v3912_v39 = vld [vmem:[#allocation2 + $0x3e0] sm:$0xff] }
 0x1cc   :  { %v5747_v37 = vpop.eup %3534  ;;  %v2588_v30 = vmul.f32 %v3905_v41, %v2401_v55  ;;  %v2404_v16 = vmul.f32 %v3523_v52, %v2276_v46  ;;  %v2403_v57 = vmul.f32 %v3525_v28, %v2275_v50  ;;  %v2278_v3 = vsub.f32 2.0, %v2150_v11  ;;  %v3906_v52 = vld [vmem:[#allocation2 + $0x3d0] sm:$0xff]  ;;  %v3913_v12 = vld [vmem:[#allocation2 + $0x3e8] sm:$0xff] }
 0x1cd   :  { %v3537_v9 = vpop.eup %3536  ;;  %3107 = vst [vmem:[#allocation7 + $0x380] sm:$0xff] %v2851_v54  ;;  %3108 = vst [vmem:[#allocation7 + $0x388] sm:$0xff] %v2852_v18  ;;  %v2277_v36 = vsub.f32 2.0, %v2149_v42  ;;  %v2857_v61 = vmul.f32 %v4151_v10, %v2589_v4  ;;  %v2858_v32 = vmul.f32 %v4159_v17, %v2590_v20  ;;  %v2855_v63 = vmul.f32 %v4151_v10, %v2587_v21 }
 0x1ce   :  { %v5755_v31 = vpop.eup %3538  ;;  %v2856_v24 = vmul.f32 %v4159_v17, %v2588_v30  ;;  %v2593_v28 = vmul.f32 %v3906_v52, %v2404_v16  ;;  %v2594_v38 = vmul.f32 %v3907_v19, %v2404_v16  ;;  %v2591_v56 = vmul.f32 %v3908_v60, %v2403_v57  ;;  %v5815_v19 = vpop.xlane.xlu0 %774 }
 0x1cf   :  { %v5761_v44 = vpop.eup %3540  ;;  %v2592_v5 = vmul.f32 %v3909_v49, %v2403_v57  ;;  %3113 = vst [vmem:[#allocation7 + $0x3b0] sm:$0xff] %v2857_v61  ;;  %3114 = vst [vmem:[#allocation7 + $0x3b8] sm:$0xff] %v2858_v32  ;;  %v2406_v15 = vmul.f32 %v3529_v23, %v2278_v3  ;;  %v2405_v55 = vmul.f32 %v3531_v13, %v2277_v36  ;;  %v3910_v23 = vld [vmem:[#allocation2 + $0x3f0] sm:$0xff] }
 0x1d0   :  { %v5763_v47 = vpop.eup %3542  ;;  %3111 = vst [vmem:[#allocation7 + $0x3a0] sm:$0xff] %v2855_v63  ;;  %3112 = vst [vmem:[#allocation7 + $0x3a8] sm:$0xff] %v2856_v24  ;;  %v1391_v46 = vmul.f32 %v5732_v27, %v5573_v53  ;;  %v1384_v50 = vmul.f32 %v3533_v45, %v5591_v0  ;;  %v2861_v18 = vmul.f32 %v4151_v10, %v2593_v28  ;;  %v3911_v45 = vld [vmem:[#allocation2 + $0x3f8] sm:$0xff] }
 0x1d1   :  { %v3545_v54 = vpop.eup %3544  ;;  %v2862_v11 = vmul.f32 %v4159_v17, %v2594_v38  ;;  %v2859_v42 = vmul.f32 %v4151_v10, %v2591_v56  ;;  %v2860_v29 = vmul.f32 %v4159_v17, %v2592_v5  ;;  %v2597_v13 = vmul.f32 %v3910_v23, %v2406_v15  ;;  %v5831_v38 = vpop.xlane.xlu1 %783 }
 0x1d2   :  { %v3547_v27 = vpop.eup %3546  ;;  %v2598_v4 = vmul.f32 %v3911_v45, %v2406_v15  ;;  %v2595_v20 = vmul.f32 %v3912_v39, %v2405_v55  ;;  %v2596_v21 = vmul.f32 %v3913_v12, %v2405_v55  ;;  %3117 = vst [vmem:[#allocation7 + $0x3d0] sm:$0xff] %v2861_v18  ;;  %v1393_v30 = vsel %vm1392_vm0, %v5573_v53, %v1391_v46 }
 0x1d3   :  { %v3549_v41 = vpop.eup %3548  ;;  %3118 = vst [vmem:[#allocation7 + $0x3d8] sm:$0xff] %v2862_v11  ;;  %3115 = vst [vmem:[#allocation7 + $0x3c0] sm:$0xff] %v2859_v42  ;;  %v1386_v16 = vsel %vm1385_vm1, %v5591_v0, %v1384_v50  ;;  %v1405_v57 = vmul.f32 %v5747_v37, %v5603_v40  ;;  %v1398_v3 = vmul.f32 %v3537_v9, %v5625_v1  ;;  %vm1429_vm0 = vcmp.eq.f32.partialorder %v5705_v14, 0.0 }
 0x1d4   :  { %3116 = vst [vmem:[#allocation7 + $0x3c8] sm:$0xff] %v2860_v29  ;;  %v2865_v36 = vmul.f32 %v4151_v10, %v2597_v13  ;;  %v2866_v61 = vmul.f32 %v4159_v17, %v2598_v4  ;;  %v2863_v32 = vmul.f32 %v4151_v10, %v2595_v20  ;;  %v2864_v63 = vmul.f32 %v4159_v17, %v2596_v21  ;;  %v3551_v37 = vpop.eup %3550 }
 0x1d5   :  { %vm1450_vm1 = vcmp.eq.f32.partialorder %v5709_v8, 0.0  ;;  %v5801_v9 = vsel %vm1394_vm2, %v1395_v22, %v1393_v30  ;;  %v5807_v24 = vsel %vm1387_vm3, %v1388_v2, %v1386_v16  ;;  %v1407_v52 = vsel %vm1406_vm4, %v5603_v40, %v1405_v57  ;;  %v5889_v11 = vpop.xlane.xlu1 %789 }
 0x1d6   :  { %v1400_v28 = vsel %vm1399_vm5, %v5625_v1, %v1398_v3  ;;  %3121 = vst [vmem:[#allocation7 + $0x3f0] sm:$0xff] %v2865_v36  ;;  %3122 = vst [vmem:[#allocation7 + $0x3f8] sm:$0xff] %v2866_v61  ;;  %v1896_v53 = vmax.f32 %v5801_v9, 5.9604645e-08  ;;  %v1895_v0 = vmax.f32 %v5807_v24, 5.9604645e-08  ;;  %v5823_v22 = vsel %vm1408_vm6, %v1409_v6, %v1407_v52 }
 0x1d7   :  { %3119 = vst [vmem:[#allocation7 + $0x3e0] sm:$0xff] %v2863_v32  ;;  %3120 = vst [vmem:[#allocation7 + $0x3e8] sm:$0xff] %v2864_v63  ;;  %v5829_v2 = vsel %vm1401_vm7, %v1402_v51, %v1400_v28  ;;  %v1898_v60 = vmax.f32 %v5823_v22, 5.9604645e-08  ;;  %v1419_v49 = vmul.f32 %v5755_v31, %v5638_v48  ;;  %v1412_v40 = vmul.f32 %v5761_v44, %v5677_v59 }
 0x1d8   :  { %v1897_v56 = vmax.f32 %v5829_v2, 5.9604645e-08  ;;  %3552 = vrcp.f32 %v1896_v53  ;;  %v1433_v6 = vmul.f32 %v5763_v47, %v5694_v25  ;;  %v1426_v1 = vmul.f32 %v3545_v54, %v5705_v14 }
 0x1d9   :  { %v1447_v51 = vmul.f32 %v3547_v27, %v5709_v8  ;;  %3554 = vrcp.f32 %v1895_v0  ;;  %v1421_v5 = vsel %vm1420_vm8, %v5638_v48, %v1419_v49  ;;  %v1414_v31 = vsel %vm1413_vm9, %v5677_v59, %v1412_v40  ;;  %v5877_v59 = vpop.xlane.xlu0 %780  ;;  %v5933_v23 = vpop.xlane.xlu1 %795 }
 0x1da   :  { %v1440_v15 = vmul.f32 %v3549_v41, %v5720_v58  ;;  %3556 = vrcp.f32 %v1898_v60  ;;  %v5856_v44 = vsel %vm1422_vm10, %v1423_v34, %v1421_v5  ;;  %v5862_v47 = vsel %vm1415_vm11, %v1416_v33, %v1414_v31 }
 0x1db   :  { %vm7136_vm2 = vcmp.eq.f32.partialorder %v5694_v25, inf  ;;  %3558 = vrcp.f32 %v1897_v56  ;;  %v1900_v46 = vmax.f32 %v5856_v44, 5.9604645e-08  ;;  %v1899_v50 = vmax.f32 %v5862_v47, 5.9604645e-08 }
 0x1dc   :  { %v1435_v55 = vsel %vm7136_vm2, %v5694_v25, %v1433_v6  ;;  %vm7137_vm3 = vcmp.eq.f32.partialorder %v5694_v25, 0.0  ;;  %v1428_v33 = vsel %vm1427_vm14, %v5705_v14, %v1426_v1  ;;  %v1449_v54 = vsel %vm1448_vm15, %v5709_v8, %v1447_v51  ;;  %v3915_v6 = vld [vmem:[#allocation2 + $0x418] sm:$0xff] }
 0x1dd   :  { %v5875_v48 = vsel %vm7137_vm3, %v1437_v35, %v1435_v55  ;;  %v1442_v18 = vsel %vm1441_vm13, %v5720_v58, %v1440_v15  ;;  %3560 = vrcp.f32 %v1900_v46  ;;  %v5897_v25 = vsel %vm1429_vm0, %v1430_v26, %v1428_v33  ;;  %v5952_v32 = vpop.xlane.xlu1 %801  ;;  %v3916_v15 = vld [vmem:[#allocation2 + $0x400] sm:$0xff]  ;;  %v3917_v33 = vld [vmem:[#allocation2 + $0x408] sm:$0xff] }
 0x1de   :  { %v1902_v34 = vmax.f32 %v5875_v48, 5.9604645e-08  ;;  %v5903_v35 = vsel %vm1450_vm1, %v1451_v62, %v1449_v54  ;;  %v5909_v42 = vsel %vm1443_vm12, %v1444_v7, %v1442_v18  ;;  %3562 = vrcp.f32 %v1899_v50  ;;  %v5927_v7 = vpop.xlane.xlu0 %786 }
 0x1df   :  { %v1901_v29 = vmax.f32 %v5897_v25, 5.9604645e-08  ;;  %v1904_v14 = vmax.f32 %v5903_v35, 5.9604645e-08  ;;  %v1903_v26 = vmax.f32 %v5909_v42, 5.9604645e-08  ;;  %v1461_v8 = vmul.f32 %v3551_v37, %v5727_v43 }
 0x1e0   :  { %3564 = vrcp.f32 %v1902_v34  ;;  %vm1462_vm4 = vcmp.eq.f32.partialorder %v5727_v43, inf  ;;  %v1465_v58 = vand.u32 2147483648, %v5727_v43  ;;  %vm1464_vm5 = vcmp.eq.f32.partialorder %v5727_v43, 0.0 }
 0x1e1   :  { %3566 = vrcp.f32 %v1901_v29  ;;  %v1463_v62 = vsel %vm1462_vm4, %v5727_v43, %v1461_v8  ;;  %v1458_v39 = vand.u32 2147483648, %v5815_v19  ;;  %v1479_v20 = vand.u32 2147483648, %v5831_v38 }
 0x1e2   :  { %3568 = vrcp.f32 %v1904_v14  ;;  %v5931_v27 = vsel %vm1464_vm5, %v1465_v58, %v1463_v62  ;;  %v1472_v41 = vand.u32 2147483648, %v5877_v59  ;;  %v1493_v30 = vand.u32 2147483648, %v5889_v11  ;;  %v5946_v16 = vpop.xlane.xlu0 %792  ;;  %v3918_v62 = vld [vmem:[#allocation2 + $0x430] sm:$0xff] }
 0x1e3   :  { %3570 = vrcp.f32 %v1903_v26  ;;  %v1906_v13 = vmax.f32 %v5931_v27, 5.9604645e-08  ;;  %v1486_v61 = vand.u32 2147483648, %v5927_v7  ;;  %v1507_v9 = vand.u32 2147483648, %v5933_v23 }
 0x1e4   :  { %3572 = vrsqrt.f32 %v5815_v19  ;;  %vm1455_vm6 = vcmp.eq.f32.partialorder %v5815_v19, inf  ;;  %vm1457_vm7 = vcmp.eq.f32.partialorder %v5815_v19, 0.0  ;;  %vm1476_vm8 = vcmp.eq.f32.partialorder %v5831_v38, inf }
 0x1e5   :  { %3574 = vrsqrt.f32 %v5831_v38  ;;  %v3553_v45 = vpop.eup %3552  ;;  %vm1478_vm9 = vcmp.eq.f32.partialorder %v5831_v38, 0.0  ;;  %vm1469_vm10 = vcmp.eq.f32.partialorder %v5877_v59, inf  ;;  %vm1490_vm11 = vcmp.eq.f32.partialorder %v5889_v11, inf }
 0x1e6   :  { %3576 = vrcp.f32 %v1906_v13  ;;  %v3555_v43 = vpop.eup %3554  ;;  %v2152_v4 = vmul.f32 %v3553_v45, %v1896_v53  ;;  %v1500_v53 = vand.u32 2147483648, %v5946_v16  ;;  %vm1483_vm12 = vcmp.eq.f32.partialorder %v5927_v7, inf }
 0x1e7   :  { %3578 = vrsqrt.f32 %v5877_v59  ;;  %v3557_v12 = vpop.eup %3556  ;;  %v2151_v21 = vmul.f32 %v3555_v43, %v1895_v0  ;;  %vm1471_vm13 = vcmp.eq.f32.partialorder %v5877_v59, 0.0  ;;  %vm1492_vm14 = vcmp.eq.f32.partialorder %v5889_v11, 0.0 }
 0x1e8   :  { %3580 = vrsqrt.f32 %v5889_v11  ;;  %v3559_v57 = vpop.eup %3558  ;;  %v2280_v3 = vsub.f32 2.0, %v2152_v4  ;;  %v2154_v36 = vmul.f32 %v3557_v12, %v1898_v60  ;;  %vm1485_vm15 = vcmp.eq.f32.partialorder %v5927_v7, 0.0 }
 0x1e9   :  { %3582 = vrsqrt.f32 %v5927_v7  ;;  %v2279_v63 = vsub.f32 2.0, %v2151_v21  ;;  %v2153_v37 = vmul.f32 %v3559_v57, %v1897_v56  ;;  %v3914_v56 = vld [vmem:[#allocation2 + $0x410] sm:$0xff]  ;;  %v3920_v21 = vld [vmem:[#allocation2 + $0x420] sm:$0xff]  ;;  %vm1504_vm0 = vcmp.eq.f32.partialorder %v5933_v23, inf }
 0x1ea   :  { %3584 = vrsqrt.f32 %v5933_v23  ;;  %v3561_v24 = vpop.eup %3560  ;;  %v2408_v52 = vmul.f32 %v3553_v45, %v2280_v3  ;;  %v2282_v28 = vsub.f32 2.0, %v2154_v36  ;;  %vm1506_vm1 = vcmp.eq.f32.partialorder %v5933_v23, 0.0 }
 0x1eb   :  { %3586 = vrsqrt.f32 %v5946_v16  ;;  %v3563_v0 = vpop.eup %3562  ;;  %v2407_v22 = vmul.f32 %v3555_v43, %v2279_v63  ;;  %v2281_v60 = vsub.f32 2.0, %v2153_v37  ;;  %v2156_v49 = vmul.f32 %v3561_v24, %v1900_v46  ;;  %v3919_v43 = vld [vmem:[#allocation2 + $0x438] sm:$0xff] }
 0x1ec   :  { %3588 = vrsqrt.f32 %v5952_v32  ;;  %v2601_v40 = vmul.f32 %v3914_v56, %v2408_v52  ;;  %v2602_v1 = vmul.f32 %v3915_v6, %v2408_v52  ;;  %v2410_v51 = vmul.f32 %v3557_v12, %v2282_v28 }
 0x1ed   :  { %v5963_v2 = vpop.eup %3564  ;;  %v2155_v5 = vmul.f32 %v3563_v0, %v1899_v50  ;;  %v2599_v55 = vmul.f32 %v3916_v15, %v2407_v22  ;;  %v2600_v54 = vmul.f32 %v3917_v33, %v2407_v22  ;;  %v2409_v44 = vmul.f32 %v3559_v57, %v2281_v60  ;;  %v3921_v57 = vld [vmem:[#allocation2 + $0x428] sm:$0xff] }
 0x1ee   :  { %v5967_v31 = vpop.eup %3566  ;;  %v2284_v46 = vsub.f32 2.0, %v2156_v49  ;;  %v2869_v8 = vmul.f32 %v4151_v10, %v2601_v40  ;;  %v2870_v58 = vmul.f32 %v4159_v17, %v2602_v1  ;;  %v2605_v45 = vmul.f32 %v3918_v62, %v2410_v51 }
 0x1ef   :  { %v5969_v18 = vpop.eup %3568  ;;  %v2606_v4 = vmul.f32 %v3919_v43, %v2410_v51  ;;  %v2867_v50 = vmul.f32 %v4151_v10, %v2599_v55  ;;  %v2868_v12 = vmul.f32 %v4159_v17, %v2600_v54  ;;  %v2603_v3 = vmul.f32 %v3920_v21, %v2409_v44 }
 0x1f0   :  { %v5973_v47 = vpop.eup %3570  ;;  %v2604_v36 = vmul.f32 %v3921_v57, %v2409_v44  ;;  %3125 = vst [vmem:[#allocation7 + $0x410] sm:$0xff] %v2869_v8  ;;  %3126 = vst [vmem:[#allocation7 + $0x418] sm:$0xff] %v2870_v58  ;;  %v2873_v37 = vmul.f32 %v4151_v10, %v2605_v45  ;;  %v2412_v28 = vmul.f32 %v3561_v24, %v2284_v46  ;;  %v2283_v22 = vsub.f32 2.0, %v2155_v5  ;;  %v3922_v24 = vld [vmem:[#allocation2 + $0x450] sm:$0xff]  ;;  %v3923_v5 = vld [vmem:[#allocation2 + $0x458] sm:$0xff] }
 0x1f1   :  { %v3573_v63 = vpop.eup %3572  ;;  %v2874_v52 = vmul.f32 %v4159_v17, %v2606_v4  ;;  %3123 = vst [vmem:[#allocation7 + $0x400] sm:$0xff] %v2867_v50  ;;  %3124 = vst [vmem:[#allocation7 + $0x408] sm:$0xff] %v2868_v12  ;;  %v2871_v49 = vmul.f32 %v4151_v10, %v2603_v3  ;;  %v2158_v40 = vmul.f32 %v5963_v2, %v1902_v34  ;;  %v3924_v44 = vld [vmem:[#allocation2 + $0x440] sm:$0xff]  ;;  %v3925_v8 = vld [vmem:[#allocation2 + $0x448] sm:$0xff]  ;;  %vm1497_vm2 = vcmp.eq.f32.partialorder %v5946_v16, inf }
 0x1f2   :  { %v5980_v60 = vpop.eup %3574  ;;  %v2872_v56 = vmul.f32 %v4159_v17, %v2604_v36  ;;  %v2157_v6 = vmul.f32 %v5967_v31, %v1901_v29  ;;  %3129 = vst [vmem:[#allocation7 + $0x430] sm:$0xff] %v2873_v37  ;;  %v2609_v51 = vmul.f32 %v3922_v24, %v2412_v28  ;;  %v2610_v15 = vmul.f32 %v3923_v5, %v2412_v28  ;;  %v3928_v36 = vld [vmem:[#allocation2 + $0x460] sm:$0xff] }
 0x1f3   :  { %v3577_v1 = vpop.eup %3576  ;;  %3130 = vst [vmem:[#allocation7 + $0x438] sm:$0xff] %v2874_v52  ;;  %v2411_v55 = vmul.f32 %v3563_v0, %v2283_v22  ;;  %v2160_v33 = vmul.f32 %v5969_v18, %v1904_v14  ;;  %3127 = vst [vmem:[#allocation7 + $0x420] sm:$0xff] %v2871_v49  ;;  %v2286_v34 = vsub.f32 2.0, %v2158_v40  ;;  %v2159_v29 = vmul.f32 %v5973_v47, %v1903_v26  ;;  %v3929_v52 = vld [vmem:[#allocation2 + $0x468] sm:$0xff]  ;;  %v6021_v22 = vpop.xlane.xlu0 %798 }
 0x1f4   :  { %v5994_v48 = vpop.eup %3578  ;;  %3128 = vst [vmem:[#allocation7 + $0x428] sm:$0xff] %v2872_v56  ;;  %v2285_v25 = vsub.f32 2.0, %v2157_v6  ;;  %v2162_v54 = vmul.f32 %v3577_v1, %v1906_v13  ;;  %v2877_v35 = vmul.f32 %v4151_v10, %v2609_v51  ;;  %v2878_v14 = vmul.f32 %v4159_v17, %v2610_v15 }
 0x1f5   :  { %v6001_v0 = vpop.eup %3580  ;;  %v2607_v46 = vmul.f32 %v3924_v44, %v2411_v55  ;;  %v2608_v58 = vmul.f32 %v3925_v8, %v2411_v55  ;;  %v2414_v42 = vmul.f32 %v5963_v2, %v2286_v34  ;;  %v2288_v27 = vsub.f32 2.0, %v2160_v33  ;;  %v3926_v2 = vld [vmem:[#allocation2 + $0x470] sm:$0xff]  ;;  %v3931_v55 = vld [vmem:[#allocation2 + $0x498] sm:$0xff]  ;;  %v3932_v34 = vld [vmem:[#allocation2 + $0x480] sm:$0xff] }
 0x1f6   :  { %v6006_v62 = vpop.eup %3582  ;;  %v2413_v26 = vmul.f32 %v5967_v31, %v2285_v25  ;;  %v2287_v13 = vsub.f32 2.0, %v2159_v29  ;;  %3133 = vst [vmem:[#allocation7 + $0x450] sm:$0xff] %v2877_v35  ;;  %3134 = vst [vmem:[#allocation7 + $0x458] sm:$0xff] %v2878_v14  ;;  %v2290_v50 = vsub.f32 2.0, %v2162_v54  ;;  %v1454_v12 = vmul.f32 %v3573_v63, %v5815_v19  ;;  %v3927_v31 = vld [vmem:[#allocation2 + $0x478] sm:$0xff]  ;;  %v3933_v29 = vld [vmem:[#allocation2 + $0x488] sm:$0xff] }
 0x1f7   :  { %v6011_v45 = vpop.eup %3584  ;;  %v2875_v43 = vmul.f32 %v4151_v10, %v2607_v46  ;;  %v2876_v4 = vmul.f32 %v4159_v17, %v2608_v58  ;;  %v2613_v3 = vmul.f32 %v3926_v2, %v2414_v42  ;;  %v2614_v57 = vmul.f32 %v3927_v31, %v2414_v42  ;;  %v3934_v35 = vld [vmem:[#allocation2 + $0x4b0] sm:$0xff]  ;;  %v3935_v44 = vld [vmem:[#allocation2 + $0x4b8] sm:$0xff] }
 0x1f8   :  { %v6016_v21 = vpop.eup %3586  ;;  %v2611_v37 = vmul.f32 %v3928_v36, %v2413_v26  ;;  %v2612_v28 = vmul.f32 %v3929_v52, %v2413_v26  ;;  %v2416_v63 = vmul.f32 %v5969_v18, %v2288_v27  ;;  %v2415_v56 = vmul.f32 %v5973_v47, %v2287_v13  ;;  %v6038_v47 = vpop.xlane.xlu1 %807 }
 0x1f9   :  { %v6023_v49 = vpop.eup %3588  ;;  %3131 = vst [vmem:[#allocation7 + $0x440] sm:$0xff] %v2875_v43  ;;  %3132 = vst [vmem:[#allocation7 + $0x448] sm:$0xff] %v2876_v4  ;;  %v2418_v40 = vmul.f32 %v3577_v1, %v2290_v50  ;;  %v1456_v6 = vsel %vm1455_vm6, %v5815_v19, %v1454_v12  ;;  %v2881_v24 = vmul.f32 %v4151_v10, %v2613_v3  ;;  %v3930_v1 = vld [vmem:[#allocation2 + $0x490] sm:$0xff]  ;;  %vm1518_vm3 = vcmp.eq.f32.partialorder %v5952_v32, inf }
 0x1fa   :  { %v2882_v51 = vmul.f32 %v4159_v17, %v2614_v57  ;;  %v2879_v5 = vmul.f32 %v4151_v10, %v2611_v37  ;;  %v2880_v18 = vmul.f32 %v4159_v17, %v2612_v28  ;;  %v2617_v15 = vmul.f32 %v3930_v1, %v2416_v63 }
 0x1fb   :  { %v2618_v33 = vmul.f32 %v3931_v55, %v2416_v63  ;;  %v2615_v25 = vmul.f32 %v3932_v34, %v2415_v56  ;;  %v2616_v54 = vmul.f32 %v3933_v29, %v2415_v56  ;;  %3137 = vst [vmem:[#allocation7 + $0x470] sm:$0xff] %v2881_v24  ;;  %v2621_v14 = vmul.f32 %v3934_v35, %v2418_v40 }
 0x1fc   :  { %3138 = vst [vmem:[#allocation7 + $0x478] sm:$0xff] %v2882_v51  ;;  %3135 = vst [vmem:[#allocation7 + $0x460] sm:$0xff] %v2879_v5  ;;  %v2622_v46 = vmul.f32 %v3935_v44, %v2418_v40  ;;  %v6047_v8 = vsel %vm1457_vm7, %v1458_v39, %v1456_v6  ;;  %v1475_v58 = vmul.f32 %v5980_v60, %v5831_v38  ;;  %v6061_v39 = vpop.xlane.xlu0 %804  ;;  %vm1499_vm4 = vcmp.eq.f32.partialorder %v5946_v16, 0.0 }
 0x1fd   :  { %3136 = vst [vmem:[#allocation7 + $0x468] sm:$0xff] %v2880_v18  ;;  %v2885_v42 = vmul.f32 %v4151_v10, %v2617_v15  ;;  %v2886_v26 = vmul.f32 %v4159_v17, %v2618_v33  ;;  %v2883_v27 = vmul.f32 %v4151_v10, %v2615_v25  ;;  %v2884_v13 = vmul.f32 %v4159_v17, %v2616_v54 }
 0x1fe   :  { %v2889_v43 = vmul.f32 %v4151_v10, %v2621_v14  ;;  %v2890_v4 = vmul.f32 %v4159_v17, %v2622_v46  ;;  %v1905_v50 = vmax.f32 %v6047_v8, 5.9604645e-08  ;;  %v1477_v19 = vsel %vm1476_vm8, %v5831_v38, %v1475_v58 }
 0x1ff   :  { %3141 = vst [vmem:[#allocation7 + $0x490] sm:$0xff] %v2885_v42  ;;  %3142 = vst [vmem:[#allocation7 + $0x498] sm:$0xff] %v2886_v26  ;;  %v1480_v60 = vsel %vm1478_vm9, %v1479_v20, %v1477_v19  ;;  %v1468_v12 = vmul.f32 %v5994_v48, %v5877_v59  ;;  %v1489_v2 = vmul.f32 %v6001_v0, %v5889_v11  ;;  %v6077_v20 = vpop.xlane.xlu1 %813  ;;  %vm1520_vm5 = vcmp.eq.f32.partialorder %v5952_v32, 0.0 }
 0x200   :  { %3139 = vst [vmem:[#allocation7 + $0x480] sm:$0xff] %v2883_v27  ;;  %3140 = vst [vmem:[#allocation7 + $0x488] sm:$0xff] %v2884_v13  ;;  %v1482_v3 = vmul.f32 %v6006_v62, %v5927_v7  ;;  %3590 = vrcp.f32 %v1905_v50  ;;  %v1908_v31 = vmax.f32 %v1480_v60, 5.9604645e-08  ;;  %v1503_v57 = vmul.f32 %v6011_v45, %v5933_v23  ;;  %v3936_v27 = vld [vmem:[#allocation2 + $0x4a0] sm:$0xff] }
 0x201   :  { %3145 = vst [vmem:[#allocation7 + $0x4b0] sm:$0xff] %v2889_v43  ;;  %3146 = vst [vmem:[#allocation7 + $0x4b8] sm:$0xff] %v2890_v4  ;;  %v1496_v38 = vmul.f32 %v6016_v21, %v5946_v16  ;;  %v1470_v48 = vsel %vm1469_vm10, %v5877_v59, %v1468_v12  ;;  %v1491_v0 = vsel %vm1490_vm11, %v5889_v11, %v1489_v2  ;;  %v1514_v5 = vand.u32 2147483648, %v6021_v22  ;;  %v3937_v43 = vld [vmem:[#allocation2 + $0x4a8] sm:$0xff] }
 0x202   :  { %v1484_v62 = vsel %vm1483_vm12, %v5927_v7, %v1482_v3  ;;  %v1517_v45 = vmul.f32 %v6023_v49, %v5952_v32  ;;  %3592 = vrcp.f32 %v1908_v31  ;;  %v1473_v21 = vsel %vm1471_vm13, %v1472_v41, %v1470_v48  ;;  %v3938_v48 = vld [vmem:[#allocation2 + $0x4d0] sm:$0xff] }
 0x203   :  { %v6098_v36 = vsel %vm1492_vm14, %v1493_v30, %v1491_v0  ;;  %v6104_v37 = vsel %vm1485_vm15, %v1486_v61, %v1484_v62  ;;  %v1907_v52 = vmax.f32 %v1473_v21, 5.9604645e-08  ;;  %v1505_v59 = vsel %vm1504_vm0, %v5933_v23, %v1503_v57  ;;  %v6124_v30 = vpop.xlane.xlu0 %810  ;;  %v6134_v56 = vpop.xlane.xlu1 %819  ;;  %v3939_v62 = vld [vmem:[#allocation2 + $0x4d8] sm:$0xff] }
 0x204   :  { %v1910_v28 = vmax.f32 %v6098_v36, 5.9604645e-08  ;;  %v1909_v49 = vmax.f32 %v6104_v37, 5.9604645e-08  ;;  %v6115_v11 = vsel %vm1506_vm1, %v1507_v9, %v1505_v59  ;;  %v1498_v7 = vsel %vm1497_vm2, %v5946_v16, %v1496_v38 }
 0x205   :  { %v1519_v41 = vsel %vm1518_vm3, %v5952_v32, %v1517_v45  ;;  %3594 = vrcp.f32 %v1907_v52  ;;  %v1912_v61 = vmax.f32 %v6115_v11, 5.9604645e-08  ;;  %v6129_v23 = vsel %vm1499_vm4, %v1500_v53, %v1498_v7 }
 0x206   :  { %v1521_v9 = vand.u32 2147483648, %v5952_v32  ;;  %3596 = vrcp.f32 %v1910_v28  ;;  %v1911_v63 = vmax.f32 %v6129_v23, 5.9604645e-08  ;;  %v1535_v15 = vand.u32 2147483648, %v6038_v47 }
 0x207   :  { %3598 = vrcp.f32 %v1909_v49  ;;  %v6145_v16 = vpop.xlane.xlu0 %816  ;;  %v6149_v32 = vpop.xlane.xlu1 %825  ;;  %v1528_v33 = vand.u32 2147483648, %v6061_v39  ;;  %v1549_v34 = vand.u32 2147483648, %v6077_v20  ;;  %v1542_v25 = vand.u32 2147483648, %v6124_v30 }
 0x208   :  { %v6136_v40 = vsel %vm1520_vm5, %v1521_v9, %v1519_v41  ;;  %3600 = vrcp.f32 %v1912_v61  ;;  %v1563_v14 = vand.u32 2147483648, %v6134_v56  ;;  %v1556_v58 = vand.u32 2147483648, %v6145_v16 }
 0x209   :  { %v1914_v6 = vmax.f32 %v6136_v40, 5.9604645e-08  ;;  %3602 = vrcp.f32 %v1911_v63  ;;  %v1577_v42 = vand.u32 2147483648, %v6149_v32  ;;  %vm1511_vm6 = vcmp.eq.f32.partialorder %v6021_v22, inf }
 0x20a   :  { %vm1513_vm7 = vcmp.eq.f32.partialorder %v6021_v22, 0.0  ;;  %vm1532_vm8 = vcmp.eq.f32.partialorder %v6038_v47, inf  ;;  %vm1534_vm9 = vcmp.eq.f32.partialorder %v6038_v47, 0.0  ;;  %vm1525_vm10 = vcmp.eq.f32.partialorder %v6061_v39, inf }
 0x20b   :  { %3604 = vrcp.f32 %v1914_v6  ;;  %v6157_v55 = vpop.xlane.xlu0 %822  ;;  %v6165_v44 = vpop.xlane.xlu1 %831  ;;  %vm1546_vm11 = vcmp.eq.f32.partialorder %v6077_v20, inf  ;;  %vm1527_vm12 = vcmp.eq.f32.partialorder %v6061_v39, 0.0  ;;  %vm1548_vm13 = vcmp.eq.f32.partialorder %v6077_v20, 0.0 }
 0x20c   :  { %3606 = vrsqrt.f32 %v6021_v22  ;;  %v1570_v3 = vand.u32 2147483648, %v6157_v55  ;;  %vm1539_vm14 = vcmp.eq.f32.partialorder %v6124_v30, inf  ;;  %vm1560_vm15 = vcmp.eq.f32.partialorder %v6134_v56, inf }
 0x20d   :  { %3608 = vrsqrt.f32 %v6038_v47  ;;  %v3591_v53 = vpop.eup %3590  ;;  %vm1541_vm0 = vcmp.eq.f32.partialorder %v6124_v30, 0.0  ;;  %vm1562_vm1 = vcmp.eq.f32.partialorder %v6134_v56, 0.0  ;;  %vm1553_vm2 = vcmp.eq.f32.partialorder %v6145_v16, inf }
 0x20e   :  { %3610 = vrsqrt.f32 %v6061_v39  ;;  %v2161_v24 = vmul.f32 %v3591_v53, %v1905_v50  ;;  %vm1555_vm3 = vcmp.eq.f32.partialorder %v6145_v16, 0.0  ;;  %vm1574_vm4 = vcmp.eq.f32.partialorder %v6149_v32, inf }
 0x20f   :  { %3612 = vrsqrt.f32 %v6077_v20  ;;  %v3593_v51 = vpop.eup %3592  ;;  %vm1588_vm5 = vcmp.eq.f32.partialorder %v6165_v44, inf }
 0x210   :  { %3614 = vrsqrt.f32 %v6124_v30  ;;  %v2289_v18 = vsub.f32 2.0, %v2161_v24  ;;  %v2164_v1 = vmul.f32 %v3593_v51, %v1908_v31  ;;  %v3940_v24 = vld [vmem:[#allocation2 + $0x4c0] sm:$0xff] }
 0x211   :  { %3616 = vrsqrt.f32 %v6134_v56 }
 0x212   :  { %3618 = vrsqrt.f32 %v6145_v16  ;;  %v3595_v29 = vpop.eup %3594  ;;  %v2417_v54 = vmul.f32 %v3591_v53, %v2289_v18  ;;  %v2292_v35 = vsub.f32 2.0, %v2164_v1 }
 0x213   :  { %3620 = vrsqrt.f32 %v6149_v32  ;;  %v3597_v46 = vpop.eup %3596  ;;  %v2163_v8 = vmul.f32 %v3595_v29, %v1907_v52 }
 0x214   :  { %3622 = vrsqrt.f32 %v6157_v55  ;;  %v3599_v26 = vpop.eup %3598  ;;  %v2619_v13 = vmul.f32 %v3936_v27, %v2417_v54  ;;  %v2620_v4 = vmul.f32 %v3937_v43, %v2417_v54  ;;  %v2420_v50 = vmul.f32 %v3593_v51, %v2292_v35  ;;  %v3943_v27 = vld [vmem:[#allocation2 + $0x4f8] sm:$0xff] }
 0x215   :  { %v2166_v19 = vmul.f32 %v3597_v46, %v1910_v28  ;;  %v3601_v60 = vpop.eup %3600  ;;  %v2291_v12 = vsub.f32 2.0, %v2163_v8  ;;  %v2165_v2 = vmul.f32 %v3599_v26, %v1909_v49  ;;  %3624 = vrsqrt.f32 %v6165_v44  ;;  %v3942_v8 = vld [vmem:[#allocation2 + $0x4f0] sm:$0xff] }
 0x216   :  { %v3603_v31 = vpop.eup %3602  ;;  %v2887_v57 = vmul.f32 %v4151_v10, %v2619_v13  ;;  %v2888_v38 = vmul.f32 %v4159_v17, %v2620_v4  ;;  %v2625_v0 = vmul.f32 %v3938_v48, %v2420_v50  ;;  %v2626_v45 = vmul.f32 %v3939_v62, %v2420_v50  ;;  %v3944_v4 = vld [vmem:[#allocation2 + $0x4e0] sm:$0xff] }
 0x217   :  { %v2419_v36 = vmul.f32 %v3595_v29, %v2291_v12  ;;  %v2294_v37 = vsub.f32 2.0, %v2166_v19  ;;  %v2293_v52 = vsub.f32 2.0, %v2165_v2  ;;  %v2168_v28 = vmul.f32 %v3601_v60, %v1912_v61  ;;  %v3941_v61 = vld [vmem:[#allocation2 + $0x4c8] sm:$0xff] }
 0x218   :  { %v3605_v21 = vpop.eup %3604  ;;  %3143 = vst [vmem:[#allocation7 + $0x4a0] sm:$0xff] %v2887_v57  ;;  %3144 = vst [vmem:[#allocation7 + $0x4a8] sm:$0xff] %v2888_v38  ;;  %v2893_v59 = vmul.f32 %v4151_v10, %v2625_v0  ;;  %v2894_v7 = vmul.f32 %v4159_v17, %v2626_v45  ;;  %v2167_v41 = vmul.f32 %v3603_v31, %v1911_v63  ;;  %v3945_v19 = vld [vmem:[#allocation2 + $0x4e8] sm:$0xff] }
 0x219   :  { %v3607_v49 = vpop.eup %3606  ;;  %v2170_v9 = vmul.f32 %v3605_v21, %v1914_v6  ;;  %v2623_v11 = vmul.f32 %v3940_v24, %v2419_v36  ;;  %v2624_v51 = vmul.f32 %v3941_v61, %v2419_v36  ;;  %v2422_v18 = vmul.f32 %v3597_v46, %v2294_v37  ;;  %v3946_v37 = vld [vmem:[#allocation2 + $0x510] sm:$0xff] }
 0x21a   :  { %v6184_v53 = vpop.eup %3608  ;;  %v2421_v1 = vmul.f32 %v3599_v26, %v2293_v52  ;;  %3149 = vst [vmem:[#allocation7 + $0x4d0] sm:$0xff] %v2893_v59  ;;  %3150 = vst [vmem:[#allocation7 + $0x4d8] sm:$0xff] %v2894_v7  ;;  %v2296_v54 = vsub.f32 2.0, %v2168_v28  ;;  %v2295_v23 = vsub.f32 2.0, %v2167_v41  ;;  %v1510_v40 = vmul.f32 %v3607_v49, %v6021_v22  ;;  %v3947_v28 = vld [vmem:[#allocation2 + $0x518] sm:$0xff]  ;;  %v3948_v7 = vld [vmem:[#allocation2 + $0x500] sm:$0xff] }
 0x21b   :  { %v6187_v29 = vpop.eup %3610  ;;  %v2298_v63 = vsub.f32 2.0, %v2170_v9  ;;  %v2891_v35 = vmul.f32 %v4151_v10, %v2623_v11  ;;  %v2892_v46 = vmul.f32 %v4159_v17, %v2624_v51  ;;  %v2629_v26 = vmul.f32 %v3942_v8, %v2422_v18  ;;  %v3949_v9 = vld [vmem:[#allocation2 + $0x508] sm:$0xff]  ;;  %v3950_v11 = vld [vmem:[#allocation2 + $0x530] sm:$0xff]  ;;  %v3951_v51 = vld [vmem:[#allocation2 + $0x538] sm:$0xff] }
 0x21c   :  { %v6191_v6 = vpop.eup %3612  ;;  %v2630_v13 = vmul.f32 %v3943_v27, %v2422_v18  ;;  %v2627_v50 = vmul.f32 %v3944_v4, %v2421_v1  ;;  %v2628_v12 = vmul.f32 %v3945_v19, %v2421_v1  ;;  %v2424_v2 = vmul.f32 %v3601_v60, %v2296_v54  ;;  %v6243_v4 = vpop.xlane.xlu1 %837 }
 0x21d   :  { %v6197_v43 = vpop.eup %3614  ;;  %v2423_v57 = vmul.f32 %v3603_v31, %v2295_v23  ;;  %3147 = vst [vmem:[#allocation7 + $0x4c0] sm:$0xff] %v2891_v35  ;;  %3148 = vst [vmem:[#allocation7 + $0x4c8] sm:$0xff] %v2892_v46  ;;  %v2897_v48 = vmul.f32 %v4151_v10, %v2629_v26  ;;  %v2426_v62 = vmul.f32 %v3605_v21, %v2298_v63  ;;  %v6213_v21 = vpop.xlane.xlu0 %828 }
 0x21e   :  { %v3617_v38 = vpop.eup %3616  ;;  %v2898_v0 = vmul.f32 %v4159_v17, %v2630_v13  ;;  %v1512_v60 = vsel %vm1511_vm6, %v6021_v22, %v1510_v40  ;;  %v2895_v45 = vmul.f32 %v4151_v10, %v2627_v50  ;;  %v2896_v36 = vmul.f32 %v4159_v17, %v2628_v12 }
 0x21f   :  { %v3619_v31 = vpop.eup %3618  ;;  %v2633_v52 = vmul.f32 %v3946_v37, %v2424_v2  ;;  %v2634_v49 = vmul.f32 %v3947_v28, %v2424_v2  ;;  %3153 = vst [vmem:[#allocation7 + $0x4f0] sm:$0xff] %v2897_v48  ;;  %v2631_v41 = vmul.f32 %v3948_v7, %v2423_v57  ;;  %v2632_v24 = vmul.f32 %v3949_v9, %v2423_v57 }
 0x220   :  { %v3621_v59 = vpop.eup %3620  ;;  %3154 = vst [vmem:[#allocation7 + $0x4f8] sm:$0xff] %v2898_v0  ;;  %v2637_v61 = vmul.f32 %v3950_v11, %v2426_v62  ;;  %v2638_v18 = vmul.f32 %v3951_v51, %v2426_v62  ;;  %3151 = vst [vmem:[#allocation7 + $0x4e0] sm:$0xff] %v2895_v45  ;;  %v6222_v63 = vsel %vm1513_vm7, %v1514_v5, %v1512_v60  ;;  %vm1567_vm6 = vcmp.eq.f32.partialorder %v6157_v55, inf }
 0x221   :  { %v3623_v1 = vpop.eup %3622  ;;  %3152 = vst [vmem:[#allocation7 + $0x4e8] sm:$0xff] %v2896_v36  ;;  %v2901_v54 = vmul.f32 %v4151_v10, %v2633_v52  ;;  %v2902_v23 = vmul.f32 %v4159_v17, %v2634_v49  ;;  %v1531_v40 = vmul.f32 %v6184_v53, %v6038_v47  ;;  %v2899_v35 = vmul.f32 %v4151_v10, %v2631_v41 }
 0x222   :  { %v2900_v46 = vmul.f32 %v4159_v17, %v2632_v24  ;;  %v2905_v8 = vmul.f32 %v4151_v10, %v2637_v61  ;;  %v2906_v26 = vmul.f32 %v4159_v17, %v2638_v18  ;;  %v3625_v22 = vpop.eup %3624  ;;  %v1913_v5 = vmax.f32 %v6222_v63, 5.9604645e-08 }
 0x223   :  { %3157 = vst [vmem:[#allocation7 + $0x510] sm:$0xff] %v2901_v54  ;;  %3158 = vst [vmem:[#allocation7 + $0x518] sm:$0xff] %v2902_v23  ;;  %v1533_v53 = vsel %vm1532_vm8, %v6038_v47, %v1531_v40  ;;  %v1524_v27 = vmul.f32 %v6187_v29, %v6061_v39  ;;  %v1545_v13 = vmul.f32 %v6191_v6, %v6077_v20  ;;  %vm1569_vm7 = vcmp.eq.f32.partialorder %v6157_v55, 0.0 }
 0x224   :  { %3155 = vst [vmem:[#allocation7 + $0x500] sm:$0xff] %v2899_v35  ;;  %3156 = vst [vmem:[#allocation7 + $0x508] sm:$0xff] %v2900_v46  ;;  %v1536_v50 = vsel %vm1534_vm9, %v1535_v15, %v1533_v53  ;;  %v1538_v29 = vmul.f32 %v6197_v43, %v6124_v30  ;;  %v1559_v6 = vmul.f32 %v3617_v38, %v6134_v56  ;;  %vm1590_vm8 = vcmp.eq.f32.partialorder %v6165_v44, 0.0  ;;  %v6262_v15 = vpop.xlane.xlu0 %834 }
 0x225   :  { %3161 = vst [vmem:[#allocation7 + $0x530] sm:$0xff] %v2905_v8  ;;  %3162 = vst [vmem:[#allocation7 + $0x538] sm:$0xff] %v2906_v26  ;;  %v1552_v19 = vmul.f32 %v3619_v31, %v6145_v16  ;;  %3626 = vrcp.f32 %v1913_v5  ;;  %v1916_v12 = vmax.f32 %v1536_v50, 5.9604645e-08  ;;  %v1526_v2 = vsel %vm1525_vm10, %v6061_v39, %v1524_v27 }
 0x226   :  { %v1547_v47 = vsel %vm1546_vm11, %v6077_v20, %v1545_v13  ;;  %v1529_v43 = vsel %vm1527_vm12, %v1528_v33, %v1526_v2  ;;  %v1540_v38 = vsel %vm1539_vm14, %v6124_v30, %v1538_v29  ;;  %v1561_v48 = vsel %vm1560_vm15, %v6134_v56, %v1559_v6  ;;  %v6306_v56 = vpop.xlane.xlu1 %843  ;;  %v3952_v29 = vld [vmem:[#allocation2 + $0x520] sm:$0xff] }
 0x227   :  { %v6272_v57 = vsel %vm1548_vm13, %v1549_v34, %v1547_v47  ;;  %3628 = vrcp.f32 %v1916_v12  ;;  %v1915_v0 = vmax.f32 %v1529_v43, 5.9604645e-08  ;;  %v6285_v39 = vsel %vm1541_vm0, %v1542_v25, %v1540_v38 }
 0x228   :  { %v1918_v62 = vmax.f32 %v6272_v57, 5.9604645e-08  ;;  %v1917_v20 = vmax.f32 %v6285_v39, 5.9604645e-08  ;;  %v6292_v33 = vsel %vm1562_vm1, %v1563_v14, %v1561_v48  ;;  %v1554_v34 = vsel %vm1553_vm2, %v6145_v16, %v1552_v19  ;;  %v6325_v52 = vpop.xlane.xlu0 %840  ;;  %v3953_v19 = vld [vmem:[#allocation2 + $0x528] sm:$0xff] }
 0x229   :  { %v1573_v60 = vmul.f32 %v3621_v59, %v6149_v32  ;;  %3630 = vrcp.f32 %v1915_v0  ;;  %v1920_v31 = vmax.f32 %v6292_v33, 5.9604645e-08  ;;  %v6303_v30 = vsel %vm1555_vm3, %v1556_v58, %v1554_v34 }
 0x22a   :  { %v1566_v25 = vmul.f32 %v3623_v1, %v6157_v55  ;;  %3632 = vrcp.f32 %v1918_v62  ;;  %v1919_v14 = vmax.f32 %v6303_v30, 5.9604645e-08  ;;  %v1587_v36 = vmul.f32 %v3625_v22, %v6165_v44 }
 0x22b   :  { %v1575_v45 = vsel %vm1574_vm4, %v6149_v32, %v1573_v60  ;;  %3634 = vrcp.f32 %v1917_v20  ;;  %vm7138_vm9 = vcmp.eq.f32.partialorder %v6149_v32, 0.0  ;;  %v1591_v37 = vand.u32 2147483648, %v6165_v44  ;;  %v3954_v60 = vld [vmem:[#allocation2 + $0x550] sm:$0xff] }
 0x22c   :  { %v6319_v16 = vsel %vm7138_vm9, %v1577_v42, %v1575_v45  ;;  %v1568_v58 = vsel %vm1567_vm6, %v6157_v55, %v1566_v25  ;;  %3636 = vrcp.f32 %v1920_v31  ;;  %v1589_v42 = vsel %vm1588_vm5, %v6165_v44, %v1587_v36  ;;  %v6356_v7 = vpop.xlane.xlu0 %846  ;;  %v3955_v45 = vld [vmem:[#allocation2 + $0x558] sm:$0xff] }
 0x22d   :  { %v1922_v28 = vmax.f32 %v6319_v16, 5.9604645e-08  ;;  %v6334_v32 = vsel %vm1569_vm7, %v1570_v3, %v1568_v58  ;;  %3638 = vrcp.f32 %v1919_v14  ;;  %v6344_v59 = vsel %vm1590_vm8, %v1591_v37, %v1589_v42  ;;  %v6351_v3 = vpop.xlane.xlu1 %849 }
 0x22e   :  { %v1921_v49 = vmax.f32 %v6334_v32, 5.9604645e-08  ;;  %v1924_v55 = vmax.f32 %v6344_v59, 5.9604645e-08  ;;  %v1584_v24 = vand.u32 2147483648, %v6213_v21  ;;  %v1605_v11 = vand.u32 2147483648, %v6243_v4 }
 0x22f   :  { %3640 = vrcp.f32 %v1922_v28  ;;  %v1598_v18 = vand.u32 2147483648, %v6262_v15  ;;  %v1619_v23 = vand.u32 2147483648, %v6306_v56  ;;  %v1612_v63 = vand.u32 2147483648, %v6325_v52 }
 0x230   :  { %3642 = vrcp.f32 %v1921_v49  ;;  %v1633_v40 = vand.u32 2147483648, %v6351_v3  ;;  %v6374_v22 = vpop.xlane.xlu0 %852  ;;  %v1626_v27 = vand.u32 2147483648, %v6356_v7  ;;  %vm1581_vm10 = vcmp.eq.f32.partialorder %v6213_v21, inf }
 0x231   :  { %3644 = vrcp.f32 %v1924_v55  ;;  %v6367_v1 = vpop.xlane.xlu1 %855  ;;  %vm1602_vm11 = vcmp.eq.f32.partialorder %v6243_v4, inf  ;;  %vm1583_vm12 = vcmp.eq.f32.partialorder %v6213_v21, 0.0  ;;  %vm1604_vm13 = vcmp.eq.f32.partialorder %v6243_v4, 0.0 }
 0x232   :  { %3646 = vrsqrt.f32 %v6213_v21  ;;  %v3627_v44 = vpop.eup %3626  ;;  %v1647_v13 = vand.u32 2147483648, %v6367_v1  ;;  %vm1595_vm14 = vcmp.eq.f32.partialorder %v6262_v15, inf  ;;  %vm1616_vm15 = vcmp.eq.f32.partialorder %v6306_v56, inf }
 0x233   :  { %3648 = vrsqrt.f32 %v6243_v4  ;;  %v2169_v41 = vmul.f32 %v3627_v44, %v1913_v5  ;;  %vm1597_vm0 = vcmp.eq.f32.partialorder %v6262_v15, 0.0  ;;  %vm1618_vm1 = vcmp.eq.f32.partialorder %v6306_v56, 0.0 }
 0x234   :  { %3650 = vrsqrt.f32 %v6262_v15  ;;  %v3629_v9 = vpop.eup %3628  ;;  %vm1609_vm2 = vcmp.eq.f32.partialorder %v6325_v52, inf  ;;  %vm1611_vm3 = vcmp.eq.f32.partialorder %v6325_v52, 0.0  ;;  %vm1630_vm4 = vcmp.eq.f32.partialorder %v6351_v3, inf }
 0x235   :  { %3652 = vrsqrt.f32 %v6306_v56  ;;  %v2297_v61 = vsub.f32 2.0, %v2169_v41  ;;  %v2172_v51 = vmul.f32 %v3629_v9, %v1916_v12  ;;  %vm1632_vm5 = vcmp.eq.f32.partialorder %v6351_v3, 0.0 }
 0x236   :  { %3654 = vrsqrt.f32 %v6325_v52  ;;  %v3631_v54 = vpop.eup %3630  ;;  %vm1623_vm6 = vcmp.eq.f32.partialorder %v6356_v7, inf  ;;  %vm1625_vm7 = vcmp.eq.f32.partialorder %v6356_v7, 0.0  ;;  %vm1644_vm8 = vcmp.eq.f32.partialorder %v6367_v1, inf }
 0x237   :  { %3656 = vrsqrt.f32 %v6351_v3  ;;  %v3633_v35 = vpop.eup %3632  ;;  %v2425_v46 = vmul.f32 %v3627_v44, %v2297_v61  ;;  %v2300_v8 = vsub.f32 2.0, %v2172_v51  ;;  %v2171_v26 = vmul.f32 %v3631_v54, %v1915_v0  ;;  %v3956_v51 = vld [vmem:[#allocation2 + $0x540] sm:$0xff] }
 0x238   :  { %3658 = vrsqrt.f32 %v6356_v7  ;;  %v3635_v5 = vpop.eup %3634  ;;  %v2174_v53 = vmul.f32 %v3633_v35, %v1918_v62  ;;  %vm1637_vm9 = vcmp.eq.f32.partialorder %v6374_v22, inf }
 0x239   :  { %3660 = vrsqrt.f32 %v6367_v1  ;;  %v3637_v50 = vpop.eup %3636  ;;  %v2635_v6 = vmul.f32 %v3952_v29, %v2425_v46  ;;  %v2636_v12 = vmul.f32 %v3953_v19, %v2425_v46  ;;  %v2428_v2 = vmul.f32 %v3629_v9, %v2300_v8  ;;  %v3958_v8 = vld [vmem:[#allocation2 + $0x570] sm:$0xff] }
 0x23a   :  { %v2299_v47 = vsub.f32 2.0, %v2171_v26  ;;  %v6379_v43 = vpop.eup %3638  ;;  %v2302_v57 = vsub.f32 2.0, %v2174_v53  ;;  %v2173_v38 = vmul.f32 %v3635_v5, %v1917_v20  ;;  %v2176_v48 = vmul.f32 %v3637_v50, %v1920_v31  ;;  %v3959_v53 = vld [vmem:[#allocation2 + $0x578] sm:$0xff] }
 0x23b   :  { %3662 = vrsqrt.f32 %v6374_v22  ;;  %v2903_v62 = vmul.f32 %v4151_v10, %v2635_v6  ;;  %v2904_v34 = vmul.f32 %v4159_v17, %v2636_v12  ;;  %v2641_v25 = vmul.f32 %v3954_v60, %v2428_v2 }
 0x23c   :  { %v3641_v0 = vpop.eup %3640  ;;  %v2642_v36 = vmul.f32 %v3955_v45, %v2428_v2  ;;  %v2427_v37 = vmul.f32 %v3631_v54, %v2299_v47  ;;  %v2430_v42 = vmul.f32 %v3633_v35, %v2302_v57  ;;  %v2301_v39 = vsub.f32 2.0, %v2173_v38  ;;  %v3957_v35 = vld [vmem:[#allocation2 + $0x548] sm:$0xff] }
 0x23d   :  { %v6388_v58 = vpop.eup %3642  ;;  %v2304_v20 = vsub.f32 2.0, %v2176_v48  ;;  %3159 = vst [vmem:[#allocation7 + $0x520] sm:$0xff] %v2903_v62  ;;  %3160 = vst [vmem:[#allocation7 + $0x528] sm:$0xff] %v2904_v34  ;;  %v2909_v33 = vmul.f32 %v4151_v10, %v2641_v25  ;;  %v2175_v41 = vmul.f32 %v6379_v43, %v1919_v14  ;;  %v2178_v9 = vmul.f32 %v3641_v0, %v1922_v28  ;;  %v3961_v48 = vld [vmem:[#allocation2 + $0x568] sm:$0xff]  ;;  %v3962_v34 = vld [vmem:[#allocation2 + $0x590] sm:$0xff] }
 0x23e   :  { %v6390_v44 = vpop.eup %3644  ;;  %v2910_v31 = vmul.f32 %v4159_v17, %v2642_v36  ;;  %v2639_v54 = vmul.f32 %v3956_v51, %v2427_v37  ;;  %v2640_v46 = vmul.f32 %v3957_v35, %v2427_v37  ;;  %v2645_v26 = vmul.f32 %v3958_v8, %v2430_v42  ;;  %v3963_v25 = vld [vmem:[#allocation2 + $0x598] sm:$0xff]  ;;  %v6434_v8 = vpop.xlane.xlu1 %861 }
 0x23f   :  { %v6399_v61 = vpop.eup %3646  ;;  %v2646_v29 = vmul.f32 %v3959_v53, %v2430_v42  ;;  %3165 = vst [vmem:[#allocation7 + $0x550] sm:$0xff] %v2909_v33  ;;  %v2429_v14 = vmul.f32 %v3635_v5, %v2301_v39  ;;  %v2432_v16 = vmul.f32 %v3637_v50, %v2304_v20  ;;  %v2303_v28 = vsub.f32 2.0, %v2175_v41  ;;  %v3960_v5 = vld [vmem:[#allocation2 + $0x560] sm:$0xff]  ;;  %v3967_v35 = vld [vmem:[#allocation2 + $0x5b8] sm:$0xff] }
 0x240   :  { %v3649_v30 = vpop.eup %3648  ;;  %3166 = vst [vmem:[#allocation7 + $0x558] sm:$0xff] %v2910_v31  ;;  %v2306_v6 = vsub.f32 2.0, %v2178_v9  ;;  %v2907_v12 = vmul.f32 %v4151_v10, %v2639_v54  ;;  %v2908_v2 = vmul.f32 %v4159_v17, %v2640_v46  ;;  %v2913_v47 = vmul.f32 %v4151_v10, %v2645_v26 }
 0x241   :  { %v6405_v19 = vpop.eup %3650  ;;  %v2914_v57 = vmul.f32 %v4159_v17, %v2646_v29  ;;  %v2643_v50 = vmul.f32 %v3960_v5, %v2429_v14  ;;  %v2644_v62 = vmul.f32 %v3961_v48, %v2429_v14  ;;  %v2649_v60 = vmul.f32 %v3962_v34, %v2432_v16 }
 0x242   :  { %v6411_v38 = vpop.eup %3652  ;;  %v2650_v45 = vmul.f32 %v3963_v25, %v2432_v16  ;;  %3163 = vst [vmem:[#allocation7 + $0x540] sm:$0xff] %v2907_v12  ;;  %3164 = vst [vmem:[#allocation7 + $0x548] sm:$0xff] %v2908_v2  ;;  %v2431_v37 = vmul.f32 %v6379_v43, %v2303_v28  ;;  %v2434_v42 = vmul.f32 %v3641_v0, %v2306_v6  ;;  %v3965_v43 = vld [vmem:[#allocation2 + $0x588] sm:$0xff]  ;;  %v3966_v0 = vld [vmem:[#allocation2 + $0x5b0] sm:$0xff] }
 0x243   :  { %v6415_v36 = vpop.eup %3654  ;;  %3169 = vst [vmem:[#allocation7 + $0x570] sm:$0xff] %v2913_v47  ;;  %3170 = vst [vmem:[#allocation7 + $0x578] sm:$0xff] %v2914_v57  ;;  %v2177_v39 = vmul.f32 %v6388_v58, %v1921_v49  ;;  %v2180_v20 = vmul.f32 %v6390_v44, %v1924_v55  ;;  %v2911_v31 = vmul.f32 %v4151_v10, %v2643_v50  ;;  %v3964_v49 = vld [vmem:[#allocation2 + $0x580] sm:$0xff] }
 0x244   :  { %v6424_v33 = vpop.eup %3656  ;;  %v2912_v41 = vmul.f32 %v4159_v17, %v2644_v62  ;;  %v2917_v9 = vmul.f32 %v4151_v10, %v2649_v60  ;;  %v2918_v51 = vmul.f32 %v4159_v17, %v2650_v45  ;;  %v2647_v59 = vmul.f32 %v3964_v49, %v2431_v37  ;;  %v3969_v62 = vld [vmem:[#allocation2 + $0x5a8] sm:$0xff]  ;;  %v3970_v60 = vld [vmem:[#allocation2 + $0x5d0] sm:$0xff] }
 0x245   :  { %v6432_v32 = vpop.eup %3658  ;;  %v2648_v55 = vmul.f32 %v3965_v43, %v2431_v37  ;;  %v2653_v54 = vmul.f32 %v3966_v0, %v2434_v42  ;;  %v2654_v46 = vmul.f32 %v3967_v35, %v2434_v42  ;;  %3167 = vst [vmem:[#allocation7 + $0x560] sm:$0xff] %v2911_v31  ;;  %v2305_v53 = vsub.f32 2.0, %v2177_v39  ;;  %v6489_v39 = vpop.xlane.xlu1 %867 }
 0x246   :  { %v6436_v26 = vpop.eup %3660  ;;  %3168 = vst [vmem:[#allocation7 + $0x568] sm:$0xff] %v2912_v41  ;;  %3173 = vst [vmem:[#allocation7 + $0x590] sm:$0xff] %v2917_v9  ;;  %v2308_v29 = vsub.f32 2.0, %v2180_v20  ;;  %v1580_v14 = vmul.f32 %v6399_v61, %v6213_v21  ;;  %v1601_v16 = vmul.f32 %v3649_v30, %v6243_v4  ;;  %v2915_v28 = vmul.f32 %v4151_v10, %v2647_v59 }
 0x247   :  { %3174 = vst [vmem:[#allocation7 + $0x598] sm:$0xff] %v2918_v51  ;;  %v2916_v6 = vmul.f32 %v4159_v17, %v2648_v55  ;;  %v2921_v12 = vmul.f32 %v4151_v10, %v2653_v54  ;;  %v2922_v2 = vmul.f32 %v4159_v17, %v2654_v46  ;;  %v2433_v57 = vmul.f32 %v6388_v58, %v2305_v53 }
 0x248   :  { %v3663_v47 = vpop.eup %3662  ;;  %v2436_v61 = vmul.f32 %v6390_v44, %v2308_v29  ;;  %v1582_v30 = vsel %vm1581_vm10, %v6213_v21, %v1580_v14  ;;  %v1603_v5 = vsel %vm1602_vm11, %v6243_v4, %v1601_v16  ;;  %3171 = vst [vmem:[#allocation7 + $0x580] sm:$0xff] %v2915_v28  ;;  %v1594_v50 = vmul.f32 %v6405_v19, %v6262_v15  ;;  %v3968_v21 = vld [vmem:[#allocation2 + $0x5a0] sm:$0xff]  ;;  %v6479_v19 = vpop.xlane.xlu0 %858 }
 0x249   :  { %3172 = vst [vmem:[#allocation7 + $0x588] sm:$0xff] %v2916_v6  ;;  %3177 = vst [vmem:[#allocation7 + $0x5b0] sm:$0xff] %v2921_v12  ;;  %v6462_v58 = vsel %vm1583_vm12, %v1584_v24, %v1582_v30  ;;  %v6468_v44 = vsel %vm1604_vm13, %v1605_v11, %v1603_v5  ;;  %v1615_v48 = vmul.f32 %v6411_v38, %v6306_v56  ;;  %v3971_v11 = vld [vmem:[#allocation2 + $0x5d8] sm:$0xff]  ;;  %vm1646_vm10 = vcmp.eq.f32.partialorder %v6367_v1, 0.0 }
 0x24a   :  { %3178 = vst [vmem:[#allocation7 + $0x5b8] sm:$0xff] %v2922_v2  ;;  %v2651_v24 = vmul.f32 %v3968_v21, %v2433_v57  ;;  %v2652_v34 = vmul.f32 %v3969_v62, %v2433_v57  ;;  %v2657_v4 = vmul.f32 %v3970_v60, %v2436_v61  ;;  %v2658_v25 = vmul.f32 %v3971_v11, %v2436_v61 }
 0x24b   :  { %vm1639_vm11 = vcmp.eq.f32.partialorder %v6374_v22, 0.0  ;;  %v1923_v38 = vmax.f32 %v6462_v58, 5.9604645e-08  ;;  %v1926_v45 = vmax.f32 %v6468_v44, 5.9604645e-08  ;;  %v1596_v37 = vsel %vm1595_vm14, %v6262_v15, %v1594_v50 }
 0x24c   :  { %v1617_v42 = vsel %vm1616_vm15, %v6306_v56, %v1615_v48  ;;  %v2919_v20 = vmul.f32 %v4151_v10, %v2651_v24  ;;  %v2920_v31 = vmul.f32 %v4159_v17, %v2652_v34  ;;  %v2925_v41 = vmul.f32 %v4151_v10, %v2657_v4  ;;  %v6531_v35 = vpop.xlane.xlu0 %864 }
 0x24d   :  { %v2926_v9 = vmul.f32 %v4159_v17, %v2658_v25  ;;  %3664 = vrcp.f32 %v1923_v38  ;;  %v6499_v51 = vsel %vm1597_vm0, %v1598_v18, %v1596_v37  ;;  %v6505_v49 = vsel %vm1618_vm1, %v1619_v23, %v1617_v42  ;;  %v3972_v42 = vld [vmem:[#allocation2 + $0x5c0] sm:$0xff] }
 0x24e   :  { %v1608_v59 = vmul.f32 %v6415_v36, %v6325_v52  ;;  %3175 = vst [vmem:[#allocation7 + $0x5a0] sm:$0xff] %v2919_v20  ;;  %3176 = vst [vmem:[#allocation7 + $0x5a8] sm:$0xff] %v2920_v31  ;;  %3666 = vrcp.f32 %v1926_v45  ;;  %v1925_v43 = vmax.f32 %v6499_v51, 5.9604645e-08  ;;  %v1928_v15 = vmax.f32 %v6505_v49, 5.9604645e-08  ;;  %v3973_v31 = vld [vmem:[#allocation2 + $0x5c8] sm:$0xff] }
 0x24f   :  { %3181 = vst [vmem:[#allocation7 + $0x5d0] sm:$0xff] %v2925_v41  ;;  %3182 = vst [vmem:[#allocation7 + $0x5d8] sm:$0xff] %v2926_v9  ;;  %v1629_v18 = vmul.f32 %v6424_v33, %v6351_v3  ;;  %v1622_v23 = vmul.f32 %v6432_v32, %v6356_v7  ;;  %v1643_v36 = vmul.f32 %v6436_v26, %v6367_v1  ;;  %v1640_v54 = vand.u32 2147483648, %v6374_v22 }
 0x250   :  { %v1610_v56 = vsel %vm1609_vm2, %v6325_v52, %v1608_v59  ;;  %v1636_v55 = vmul.f32 %v3663_v47, %v6374_v22  ;;  %3668 = vrcp.f32 %v1925_v43  ;;  %v6575_v28 = vpop.xlane.xlu0 %870  ;;  %v1661_v12 = vand.u32 2147483648, %v6434_v8  ;;  %v3974_v59 = vld [vmem:[#allocation2 + $0x5f0] sm:$0xff] }
 0x251   :  { %v6525_v0 = vsel %vm1611_vm3, %v1612_v63, %v1610_v56  ;;  %v1631_v33 = vsel %vm1630_vm4, %v6351_v3, %v1629_v18  ;;  %3670 = vrcp.f32 %v1928_v15  ;;  %v1624_v52 = vsel %vm1623_vm6, %v6356_v7, %v1622_v23  ;;  %v6543_v63 = vpop.xlane.xlu1 %873 }
 0x252   :  { %v1927_v32 = vmax.f32 %v6525_v0, 5.9604645e-08  ;;  %v6538_v46 = vsel %vm1632_vm5, %v1633_v40, %v1631_v33  ;;  %v6550_v53 = vsel %vm1625_vm7, %v1626_v27, %v1624_v52  ;;  %v1645_v3 = vsel %vm1644_vm8, %v6367_v1, %v1643_v36 }
 0x253   :  { %v1930_v26 = vmax.f32 %v6538_v46, 5.9604645e-08  ;;  %v1638_v40 = vsel %vm1637_vm9, %v6374_v22, %v1636_v55  ;;  %v1929_v29 = vmax.f32 %v6550_v53, 5.9604645e-08  ;;  %v6563_v14 = vsel %vm1646_vm10, %v1647_v13, %v1645_v3  ;;  %v3976_v3 = vld [vmem:[#allocation2 + $0x5e0] sm:$0xff] }
 0x254   :  { %3672 = vrcp.f32 %v1927_v32  ;;  %v6567_v7 = vsel %vm1639_vm11, %v1640_v54, %v1638_v40  ;;  %v1932_v27 = vmax.f32 %v6563_v14, 5.9604645e-08  ;;  %v1654_v47 = vand.u32 2147483648, %v6479_v19  ;;  %v6589_v61 = vpop.xlane.xlu0 %876 }
 0x255   :  { %3674 = vrcp.f32 %v1930_v26  ;;  %v1931_v16 = vmax.f32 %v6567_v7, 5.9604645e-08  ;;  %v6579_v1 = vpop.xlane.xlu1 %879  ;;  %v1675_v57 = vand.u32 2147483648, %v6489_v39  ;;  %v1668_v58 = vand.u32 2147483648, %v6531_v35  ;;  %v3982_v7 = vld [vmem:[#allocation2 + $0x630] sm:$0xff] }
 0x256   :  { %3676 = vrcp.f32 %v1929_v29  ;;  %v1689_v44 = vand.u32 2147483648, %v6543_v63  ;;  %v1682_v62 = vand.u32 2147483648, %v6575_v28  ;;  %v1703_v4 = vand.u32 2147483648, %v6579_v1 }
 0x257   :  { %3678 = vrcp.f32 %v1932_v27  ;;  %vm1658_vm12 = vcmp.eq.f32.partialorder %v6434_v8, inf  ;;  %vm1651_vm13 = vcmp.eq.f32.partialorder %v6479_v19, inf  ;;  %vm1660_vm14 = vcmp.eq.f32.partialorder %v6434_v8, 0.0 }
 0x258   :  { %3680 = vrcp.f32 %v1931_v16  ;;  %vm1653_vm15 = vcmp.eq.f32.partialorder %v6479_v19, 0.0  ;;  %vm1672_vm0 = vcmp.eq.f32.partialorder %v6489_v39, inf  ;;  %vm1674_vm1 = vcmp.eq.f32.partialorder %v6489_v39, 0.0 }
 0x259   :  { %3682 = vrsqrt.f32 %v6434_v8  ;;  %v6594_v50 = vpop.xlane.xlu1 %885  ;;  %vm1665_vm2 = vcmp.eq.f32.partialorder %v6531_v35, inf  ;;  %vm1667_vm3 = vcmp.eq.f32.partialorder %v6531_v35, 0.0  ;;  %vm1686_vm4 = vcmp.eq.f32.partialorder %v6543_v63, inf }
 0x25a   :  { %3684 = vrsqrt.f32 %v6479_v19  ;;  %v3665_v22 = vpop.eup %3664  ;;  %vm1688_vm5 = vcmp.eq.f32.partialorder %v6543_v63, 0.0  ;;  %vm1679_vm6 = vcmp.eq.f32.partialorder %v6575_v28, inf  ;;  %vm1681_vm7 = vcmp.eq.f32.partialorder %v6575_v28, 0.0 }
 0x25b   :  { %3686 = vrsqrt.f32 %v6489_v39  ;;  %v3667_v13 = vpop.eup %3666  ;;  %v2179_v6 = vmul.f32 %v3665_v22, %v1923_v38  ;;  %vm1700_vm8 = vcmp.eq.f32.partialorder %v6579_v1, inf  ;;  %vm1693_vm9 = vcmp.eq.f32.partialorder %v6589_v61, inf }
 0x25c   :  { %3688 = vrsqrt.f32 %v6531_v35  ;;  %v2182_v2 = vmul.f32 %v3667_v13, %v1926_v45  ;;  %v1696_v45 = vand.u32 2147483648, %v6589_v61  ;;  %vm1702_vm10 = vcmp.eq.f32.partialorder %v6579_v1, 0.0 }
 0x25d   :  { %3690 = vrsqrt.f32 %v6543_v63  ;;  %v3669_v30 = vpop.eup %3668  ;;  %v2307_v5 = vsub.f32 2.0, %v2179_v6  ;;  %v3978_v6 = vld [vmem:[#allocation2 + $0x610] sm:$0xff]  ;;  %vm1695_vm11 = vcmp.eq.f32.partialorder %v6589_v61, 0.0 }
 0x25e   :  { %3692 = vrsqrt.f32 %v6575_v28  ;;  %v3671_v48 = vpop.eup %3670  ;;  %v2310_v21 = vsub.f32 2.0, %v2182_v2  ;;  %v2181_v24 = vmul.f32 %v3669_v30, %v1925_v43 }
 0x25f   :  { %3694 = vrsqrt.f32 %v6579_v1  ;;  %v2435_v34 = vmul.f32 %v3665_v22, %v2307_v5  ;;  %v2184_v60 = vmul.f32 %v3671_v48, %v1928_v15  ;;  %v3975_v15 = vld [vmem:[#allocation2 + $0x5f8] sm:$0xff] }
 0x260   :  { %3696 = vrsqrt.f32 %v6589_v61  ;;  %v2438_v25 = vmul.f32 %v3667_v13, %v2310_v21  ;;  %v2309_v38 = vsub.f32 2.0, %v2181_v24 }
 0x261   :  { %v3673_v11 = vpop.eup %3672  ;;  %3698 = vrsqrt.f32 %v6594_v50  ;;  %v2655_v20 = vmul.f32 %v3972_v42, %v2435_v34  ;;  %v2656_v41 = vmul.f32 %v3973_v31, %v2435_v34  ;;  %v2312_v9 = vsub.f32 2.0, %v2184_v60  ;;  %v3980_v31 = vld [vmem:[#allocation2 + $0x600] sm:$0xff] }
 0x262   :  { %v3675_v37 = vpop.eup %3674  ;;  %v2183_v51 = vmul.f32 %v3673_v11, %v1927_v32  ;;  %v2661_v43 = vmul.f32 %v3974_v59, %v2438_v25  ;;  %v2662_v18 = vmul.f32 %v3975_v15, %v2438_v25  ;;  %v2437_v56 = vmul.f32 %v3669_v30, %v2309_v38  ;;  %v3979_v30 = vld [vmem:[#allocation2 + $0x618] sm:$0xff] }
 0x263   :  { %v6602_v49 = vpop.eup %3676  ;;  %v2186_v23 = vmul.f32 %v3675_v37, %v1930_v26  ;;  %v2923_v55 = vmul.f32 %v4151_v10, %v2655_v20  ;;  %v2924_v0 = vmul.f32 %v4159_v17, %v2656_v41  ;;  %v2440_v33 = vmul.f32 %v3671_v48, %v2312_v9  ;;  %v3977_v26 = vld [vmem:[#allocation2 + $0x5e8] sm:$0xff] }
 0x264   :  { %v3679_v36 = vpop.eup %3678  ;;  %v2311_v54 = vsub.f32 2.0, %v2183_v51  ;;  %v2929_v46 = vmul.f32 %v4151_v10, %v2661_v43  ;;  %v2930_v52 = vmul.f32 %v4159_v17, %v2662_v18  ;;  %v2659_v40 = vmul.f32 %v3976_v3, %v2437_v56  ;;  %v3981_v9 = vld [vmem:[#allocation2 + $0x608] sm:$0xff] }
 0x265   :  { %v6608_v32 = vpop.eup %3680  ;;  %v2660_v22 = vmul.f32 %v3977_v26, %v2437_v56  ;;  %3179 = vst [vmem:[#allocation7 + $0x5c0] sm:$0xff] %v2923_v55  ;;  %3180 = vst [vmem:[#allocation7 + $0x5c8] sm:$0xff] %v2924_v0  ;;  %v2665_v2 = vmul.f32 %v3978_v6, %v2440_v33  ;;  %v2666_v5 = vmul.f32 %v3979_v30, %v2440_v33  ;;  %v2314_v21 = vsub.f32 2.0, %v2186_v23  ;;  %v3983_v55 = vld [vmem:[#allocation2 + $0x638] sm:$0xff]  ;;  %v3984_v6 = vld [vmem:[#allocation2 + $0x620] sm:$0xff] }
 0x266   :  { %v3683_v13 = vpop.eup %3682  ;;  %v2439_v48 = vmul.f32 %v3673_v11, %v2311_v54  ;;  %3185 = vst [vmem:[#allocation7 + $0x5f0] sm:$0xff] %v2929_v46  ;;  %3186 = vst [vmem:[#allocation7 + $0x5f8] sm:$0xff] %v2930_v52  ;;  %v2927_v34 = vmul.f32 %v4151_v10, %v2659_v40  ;;  %v2185_v25 = vmul.f32 %v6602_v49, %v1929_v29  ;;  %v6642_v46 = vpop.xlane.xlu0 %882  ;;  %v3985_v30 = vld [vmem:[#allocation2 + $0x628] sm:$0xff] }
 0x267   :  { %v3685_v24 = vpop.eup %3684  ;;  %v2928_v60 = vmul.f32 %v4159_v17, %v2660_v22  ;;  %v2188_v38 = vmul.f32 %v3679_v36, %v1932_v27  ;;  %v2933_v11 = vmul.f32 %v4151_v10, %v2665_v2  ;;  %v2934_v20 = vmul.f32 %v4159_v17, %v2666_v5 }
 0x268   :  { %v3687_v42 = vpop.eup %3686  ;;  %v2663_v41 = vmul.f32 %v3980_v31, %v2439_v48  ;;  %v2664_v51 = vmul.f32 %v3981_v9, %v2439_v48  ;;  %3183 = vst [vmem:[#allocation7 + $0x5e0] sm:$0xff] %v2927_v34  ;;  %v2442_v53 = vmul.f32 %v3675_v37, %v2314_v21  ;;  %v2313_v29 = vsub.f32 2.0, %v2185_v25  ;;  %v3986_v21 = vld [vmem:[#allocation2 + $0x650] sm:$0xff]  ;;  %v3987_v34 = vld [vmem:[#allocation2 + $0x658] sm:$0xff] }
 0x269   :  { %v6624_v59 = vpop.eup %3688  ;;  %3184 = vst [vmem:[#allocation7 + $0x5e8] sm:$0xff] %v2928_v60  ;;  %v2316_v43 = vsub.f32 2.0, %v2188_v38  ;;  %v2187_v14 = vmul.f32 %v6608_v32, %v1931_v16  ;;  %3189 = vst [vmem:[#allocation7 + $0x610] sm:$0xff] %v2933_v11  ;;  %v1657_v56 = vmul.f32 %v3683_v13, %v6434_v8  ;;  %v1650_v37 = vmul.f32 %v3685_v24, %v6479_v19 }
 0x26a   :  { %v6630_v27 = vpop.eup %3690  ;;  %3190 = vst [vmem:[#allocation7 + $0x618] sm:$0xff] %v2934_v20  ;;  %v2931_v15 = vmul.f32 %v4151_v10, %v2663_v41  ;;  %v2932_v18 = vmul.f32 %v4159_v17, %v2664_v51  ;;  %v2669_v16 = vmul.f32 %v3982_v7, %v2442_v53  ;;  %v2670_v0 = vmul.f32 %v3983_v55, %v2442_v53  ;;  %v3988_v41 = vld [vmem:[#allocation2 + $0x640] sm:$0xff]  ;;  %v3989_v51 = vld [vmem:[#allocation2 + $0x648] sm:$0xff] }
 0x26b   :  { %v6637_v23 = vpop.eup %3692  ;;  %v2441_v33 = vmul.f32 %v6602_v49, %v2313_v29  ;;  %v2444_v54 = vmul.f32 %v3679_v36, %v2316_v43  ;;  %v2315_v3 = vsub.f32 2.0, %v2187_v14  ;;  %v1659_v40 = vsel %vm1658_vm12, %v6434_v8, %v1657_v56  ;;  %v6678_v8 = vpop.xlane.xlu1 %891 }
 0x26c   :  { %v6644_v52 = vpop.eup %3694  ;;  %3187 = vst [vmem:[#allocation7 + $0x600] sm:$0xff] %v2931_v15  ;;  %3188 = vst [vmem:[#allocation7 + $0x608] sm:$0xff] %v2932_v18  ;;  %v1652_v49 = vsel %vm1651_vm13, %v6479_v19, %v1650_v37  ;;  %v1671_v36 = vmul.f32 %v3687_v42, %v6489_v39  ;;  %v2937_v22 = vmul.f32 %v4151_v10, %v2669_v16  ;;  %v6690_v43 = vpop.xlane.xlu0 %888  ;;  %vm1714_vm12 = vcmp.eq.f32.partialorder %v6594_v50, inf }
 0x26d   :  { %v3697_v26 = vpop.eup %3696  ;;  %v2938_v13 = vmul.f32 %v4159_v17, %v2670_v0  ;;  %v2667_v2 = vmul.f32 %v3984_v6, %v2441_v33  ;;  %v2668_v5 = vmul.f32 %v3985_v30, %v2441_v33  ;;  %v2673_v24 = vmul.f32 %v3986_v21, %v2444_v54 }
 0x26e   :  { %v3699_v48 = vpop.eup %3698  ;;  %v2674_v60 = vmul.f32 %v3987_v34, %v2444_v54  ;;  %v2443_v25 = vmul.f32 %v6608_v32, %v2315_v3  ;;  %v6665_v38 = vsel %vm1660_vm14, %v1661_v12, %v1659_v40  ;;  %3193 = vst [vmem:[#allocation7 + $0x630] sm:$0xff] %v2937_v22  ;;  %v6676_v32 = vsel %vm1653_vm15, %v1654_v47, %v1652_v49 }
 0x26f   :  { %3194 = vst [vmem:[#allocation7 + $0x638] sm:$0xff] %v2938_v13  ;;  %v2935_v42 = vmul.f32 %v4151_v10, %v2667_v2  ;;  %v2936_v11 = vmul.f32 %v4159_v17, %v2668_v5  ;;  %v1934_v20 = vmax.f32 %v6665_v38, 5.9604645e-08  ;;  %v2941_v12 = vmul.f32 %v4151_v10, %v2673_v24 }
 0x270   :  { %v2942_v31 = vmul.f32 %v4159_v17, %v2674_v60  ;;  %v2671_v9 = vmul.f32 %v3988_v41, %v2443_v25  ;;  %v2672_v53 = vmul.f32 %v3989_v51, %v2443_v25  ;;  %v1933_v29 = vmax.f32 %v6676_v32, 5.9604645e-08  ;;  %v3990_v41 = vld [vmem:[#allocation2 + $0x670] sm:$0xff]  ;;  %v3991_v51 = vld [vmem:[#allocation2 + $0x678] sm:$0xff] }
 0x271   :  { %3191 = vst [vmem:[#allocation7 + $0x620] sm:$0xff] %v2935_v42  ;;  %3192 = vst [vmem:[#allocation7 + $0x628] sm:$0xff] %v2936_v11  ;;  %3700 = vrcp.f32 %v1934_v20  ;;  %v1673_v19 = vsel %vm1672_vm0, %v6489_v39, %v1671_v36  ;;  %v1664_v47 = vmul.f32 %v6624_v59, %v6531_v35  ;;  %v1685_v56 = vmul.f32 %v6630_v27, %v6543_v63 }
 0x272   :  { %3197 = vst [vmem:[#allocation7 + $0x650] sm:$0xff] %v2941_v12  ;;  %3198 = vst [vmem:[#allocation7 + $0x658] sm:$0xff] %v2942_v31  ;;  %v2939_v14 = vmul.f32 %v4151_v10, %v2671_v9  ;;  %v2940_v15 = vmul.f32 %v4159_v17, %v2672_v53  ;;  %v1676_v18 = vsel %vm1674_vm1, %v1675_v57, %v1673_v19  ;;  %3702 = vrcp.f32 %v1933_v29 }
 0x273   :  { %v1936_v37 = vmax.f32 %v1676_v18, 5.9604645e-08  ;;  %v1666_v59 = vsel %vm1665_vm2, %v6531_v35, %v1664_v47  ;;  %v1678_v7 = vmul.f32 %v6637_v23, %v6575_v28  ;;  %v1687_v57 = vsel %vm1686_vm4, %v6543_v63, %v1685_v56 }
 0x274   :  { %3195 = vst [vmem:[#allocation7 + $0x640] sm:$0xff] %v2939_v14  ;;  %3196 = vst [vmem:[#allocation7 + $0x648] sm:$0xff] %v2940_v15  ;;  %v6709_v39 = vsel %vm1667_vm3, %v1668_v58, %v1666_v59  ;;  %v1699_v27 = vmul.f32 %v6644_v52, %v6579_v1  ;;  %v1692_v16 = vmul.f32 %v3697_v26, %v6589_v61  ;;  %v6727_v58 = vpop.xlane.xlu1 %897  ;;  %v6757_v52 = vpop.xlane.xlu0 %894  ;;  %vm1716_vm13 = vcmp.eq.f32.partialorder %v6594_v50, 0.0 }
 0x275   :  { %3704 = vrcp.f32 %v1936_v37  ;;  %v1935_v23 = vmax.f32 %v6709_v39, 5.9604645e-08  ;;  %v6722_v55 = vsel %vm1688_vm5, %v1689_v44, %v1687_v57  ;;  %v1680_v35 = vsel %vm1679_vm6, %v6575_v28, %v1678_v7  ;;  %v3992_v7 = vld [vmem:[#allocation2 + $0x660] sm:$0xff] }
 0x276   :  { %v1938_v0 = vmax.f32 %v6722_v55, 5.9604645e-08  ;;  %v6734_v33 = vsel %vm1681_vm7, %v1682_v62, %v1680_v35  ;;  %v1701_v63 = vsel %vm1700_vm8, %v6579_v1, %v1699_v27  ;;  %v1694_v44 = vsel %vm1693_vm9, %v6589_v61, %v1692_v16  ;;  %v3993_v27 = vld [vmem:[#allocation2 + $0x668] sm:$0xff] }
 0x277   :  { %3706 = vrcp.f32 %v1935_v23  ;;  %v1937_v54 = vmax.f32 %v6734_v33, 5.9604645e-08  ;;  %v6749_v28 = vsel %vm1702_vm10, %v1703_v4, %v1701_v63  ;;  %v6755_v62 = vsel %vm1695_vm11, %v1696_v45, %v1694_v44 }
 0x278   :  { %3708 = vrcp.f32 %v1938_v0  ;;  %v1940_v3 = vmax.f32 %v6749_v28, 5.9604645e-08  ;;  %v1939_v40 = vmax.f32 %v6755_v62, 5.9604645e-08  ;;  %v1713_v49 = vmul.f32 %v3699_v48, %v6594_v50  ;;  %v6774_v45 = vpop.xlane.xlu1 %903  ;;  %v6779_v26 = vpop.xlane.xlu0 %900 }
 0x279   :  { %3710 = vrcp.f32 %v1937_v54  ;;  %v1717_v1 = vand.u32 2147483648, %v6594_v50  ;;  %v1710_v30 = vand.u32 2147483648, %v6642_v46  ;;  %v1731_v21 = vand.u32 2147483648, %v6678_v8 }
 0x27a   :  { %3712 = vrcp.f32 %v1940_v3  ;;  %v1715_v61 = vsel %vm1714_vm12, %v6594_v50, %v1713_v49  ;;  %v1724_v24 = vand.u32 2147483648, %v6690_v43  ;;  %v1745_v34 = vand.u32 2147483648, %v6727_v58 }
 0x27b   :  { %3714 = vrcp.f32 %v1939_v40  ;;  %v6772_v4 = vsel %vm1716_vm13, %v1717_v1, %v1715_v61  ;;  %v1759_v32 = vand.u32 2147483648, %v6774_v45  ;;  %v1752_v12 = vand.u32 2147483648, %v6779_v26 }
 0x27c   :  { %v1942_v36 = vmax.f32 %v6772_v4, 5.9604645e-08  ;;  %3716 = vrsqrt.f32 %v6642_v46  ;;  %v6789_v5 = vpop.xlane.xlu1 %909  ;;  %v6796_v42 = vpop.xlane.xlu0 %906  ;;  %vm1707_vm14 = vcmp.eq.f32.partialorder %v6642_v46, inf  ;;  %vm1709_vm15 = vcmp.eq.f32.partialorder %v6642_v46, 0.0  ;;  %v4002_v4 = vld [vmem:[#allocation2 + $0x6d0] sm:$0xff] }
 0x27d   :  { %3718 = vrsqrt.f32 %v6678_v8  ;;  %v1773_v18 = vand.u32 2147483648, %v6789_v5  ;;  %vm1728_vm0 = vcmp.eq.f32.partialorder %v6678_v8, inf  ;;  %vm1721_vm1 = vcmp.eq.f32.partialorder %v6690_v43, inf }
 0x27e   :  { %v3701_v22 = vpop.eup %3700  ;;  %3720 = vrcp.f32 %v1942_v36  ;;  %vm1730_vm2 = vcmp.eq.f32.partialorder %v6678_v8, 0.0  ;;  %vm1723_vm3 = vcmp.eq.f32.partialorder %v6690_v43, 0.0  ;;  %vm1742_vm4 = vcmp.eq.f32.partialorder %v6727_v58, inf }
 0x27f   :  { %v2190_v50 = vmul.f32 %v3701_v22, %v1934_v20  ;;  %3722 = vrsqrt.f32 %v6690_v43  ;;  %v3703_v13 = vpop.eup %3702  ;;  %v1738_v20 = vand.u32 2147483648, %v6757_v52  ;;  %vm1744_vm5 = vcmp.eq.f32.partialorder %v6727_v58, 0.0 }
 0x280   :  { %3724 = vrsqrt.f32 %v6727_v58  ;;  %v2189_v2 = vmul.f32 %v3703_v13, %v1933_v29  ;;  %vm1735_vm6 = vcmp.eq.f32.partialorder %v6757_v52, inf  ;;  %vm1756_vm7 = vcmp.eq.f32.partialorder %v6774_v45, inf }
 0x281   :  { %v2318_v6 = vsub.f32 2.0, %v2190_v50  ;;  %3726 = vrsqrt.f32 %v6757_v52  ;;  %v3994_v50 = vld [vmem:[#allocation2 + $0x690] sm:$0xff]  ;;  %vm1737_vm8 = vcmp.eq.f32.partialorder %v6757_v52, 0.0  ;;  %vm1758_vm9 = vcmp.eq.f32.partialorder %v6774_v45, 0.0 }
 0x282   :  { %v3705_v48 = vpop.eup %3704  ;;  %3728 = vrsqrt.f32 %v6774_v45  ;;  %v2317_v25 = vsub.f32 2.0, %v2189_v2  ;;  %vm1749_vm10 = vcmp.eq.f32.partialorder %v6779_v26, inf  ;;  %vm1751_vm11 = vcmp.eq.f32.partialorder %v6779_v26, 0.0 }
 0x283   :  { %v2446_v60 = vmul.f32 %v3701_v22, %v2318_v6  ;;  %v2192_v38 = vmul.f32 %v3705_v48, %v1936_v37  ;;  %3730 = vrsqrt.f32 %v6779_v26  ;;  %vm1770_vm12 = vcmp.eq.f32.partialorder %v6789_v5, inf }
 0x284   :  { %v3707_v11 = vpop.eup %3706  ;;  %3732 = vrsqrt.f32 %v6789_v5  ;;  %v2445_v29 = vmul.f32 %v3703_v13, %v2317_v25  ;;  %vm1772_vm13 = vcmp.eq.f32.partialorder %v6789_v5, 0.0 }
 0x285   :  { %v3709_v31 = vpop.eup %3708  ;;  %v2677_v9 = vmul.f32 %v3990_v41, %v2446_v60  ;;  %v2678_v53 = vmul.f32 %v3991_v51, %v2446_v60  ;;  %v2320_v19 = vsub.f32 2.0, %v2192_v38  ;;  %v2191_v14 = vmul.f32 %v3707_v11, %v1935_v23  ;;  %v3996_v41 = vld [vmem:[#allocation2 + $0x680] sm:$0xff] }
 0x286   :  { %v3711_v47 = vpop.eup %3710  ;;  %v2194_v15 = vmul.f32 %v3709_v31, %v1938_v0  ;;  %3734 = vrsqrt.f32 %v6796_v42  ;;  %v2675_v57 = vmul.f32 %v3992_v7, %v2445_v29  ;;  %v2676_v16 = vmul.f32 %v3993_v27, %v2445_v29 }
 0x287   :  { %v3713_v56 = vpop.eup %3712  ;;  %v2945_v37 = vmul.f32 %v4151_v10, %v2677_v9  ;;  %v2946_v59 = vmul.f32 %v4159_v17, %v2678_v53  ;;  %v2448_v35 = vmul.f32 %v3705_v48, %v2320_v19  ;;  %v2319_v63 = vsub.f32 2.0, %v2191_v14  ;;  %v3998_v53 = vld [vmem:[#allocation2 + $0x6b0] sm:$0xff]  ;;  %v3999_v19 = vld [vmem:[#allocation2 + $0x6b8] sm:$0xff] }
 0x288   :  { %v3715_v55 = vpop.eup %3714  ;;  %v2322_v44 = vsub.f32 2.0, %v2194_v15  ;;  %v2193_v39 = vmul.f32 %v3711_v47, %v1937_v54  ;;  %v2943_v0 = vmul.f32 %v4151_v10, %v2675_v57  ;;  %v2944_v49 = vmul.f32 %v4159_v17, %v2676_v16  ;;  %v3995_v54 = vld [vmem:[#allocation2 + $0x698] sm:$0xff] }
 0x289   :  { %v3717_v23 = vpop.eup %3716  ;;  %3201 = vst [vmem:[#allocation7 + $0x670] sm:$0xff] %v2945_v37  ;;  %3202 = vst [vmem:[#allocation7 + $0x678] sm:$0xff] %v2946_v59  ;;  %v2196_v1 = vmul.f32 %v3713_v56, %v1940_v3  ;;  %v2195_v61 = vmul.f32 %v3715_v55, %v1939_v40  ;;  %v2681_v33 = vmul.f32 %v3994_v50, %v2448_v35  ;;  %v4005_v50 = vld [vmem:[#allocation2 + $0x6c8] sm:$0xff] }
 0x28a   :  { %v6817_v22 = vpop.eup %3718  ;;  %v2682_v13 = vmul.f32 %v3995_v54, %v2448_v35  ;;  %v2447_v6 = vmul.f32 %v3707_v11, %v2319_v63  ;;  %v2450_v2 = vmul.f32 %v3709_v31, %v2322_v44  ;;  %3199 = vst [vmem:[#allocation7 + $0x660] sm:$0xff] %v2943_v0  ;;  %3200 = vst [vmem:[#allocation7 + $0x668] sm:$0xff] %v2944_v49  ;;  %v2321_v60 = vsub.f32 2.0, %v2193_v39  ;;  %v3997_v31 = vld [vmem:[#allocation2 + $0x688] sm:$0xff]  ;;  %v4000_v63 = vld [vmem:[#allocation2 + $0x6a0] sm:$0xff] }
 0x28b   :  { %v6820_v48 = vpop.eup %3720  ;;  %v2324_v28 = vsub.f32 2.0, %v2196_v1  ;;  %v2323_v3 = vsub.f32 2.0, %v2195_v61  ;;  %v1706_v62 = vmul.f32 %v3717_v23, %v6642_v46  ;;  %v2949_v25 = vmul.f32 %v4151_v10, %v2681_v33  ;;  %v4001_v39 = vld [vmem:[#allocation2 + $0x6a8] sm:$0xff]  ;;  %v4003_v0 = vld [vmem:[#allocation2 + $0x6d8] sm:$0xff]  ;;  %v4004_v1 = vld [vmem:[#allocation2 + $0x6c0] sm:$0xff] }
 0x28c   :  { %v6823_v40 = vpop.eup %3722  ;;  %v2950_v38 = vmul.f32 %v4159_v17, %v2682_v13  ;;  %v2679_v11 = vmul.f32 %v3996_v41, %v2447_v6  ;;  %v2680_v9 = vmul.f32 %v3997_v31, %v2447_v6  ;;  %v2685_v29 = vmul.f32 %v3998_v53, %v2450_v2 }
 0x28d   :  { %v6829_v51 = vpop.eup %3724  ;;  %v2686_v14 = vmul.f32 %v3999_v19, %v2450_v2  ;;  %v2449_v15 = vmul.f32 %v3711_v47, %v2321_v60  ;;  %v2452_v37 = vmul.f32 %v3713_v56, %v2324_v28  ;;  %3205 = vst [vmem:[#allocation7 + $0x690] sm:$0xff] %v2949_v25  ;;  %v2451_v27 = vmul.f32 %v3715_v55, %v2323_v3 }
 0x28e   :  { %v3727_v59 = vpop.eup %3726  ;;  %3206 = vst [vmem:[#allocation7 + $0x698] sm:$0xff] %v2950_v38  ;;  %v2947_v7 = vmul.f32 %v4151_v10, %v2679_v11  ;;  %v2948_v57 = vmul.f32 %v4159_v17, %v2680_v9  ;;  %v2198_v16 = vmul.f32 %v6820_v48, %v1942_v36  ;;  %v2953_v56 = vmul.f32 %v4151_v10, %v2685_v29 }
 0x28f   :  { %v3729_v47 = vpop.eup %3728  ;;  %v2954_v35 = vmul.f32 %v4159_v17, %v2686_v14  ;;  %v2683_v44 = vmul.f32 %v4000_v63, %v2449_v15  ;;  %v2684_v23 = vmul.f32 %v4001_v39, %v2449_v15  ;;  %v2689_v36 = vmul.f32 %v4002_v4, %v2452_v37 }
 0x290   :  { %v6844_v55 = vpop.eup %3730  ;;  %3203 = vst [vmem:[#allocation7 + $0x680] sm:$0xff] %v2947_v7  ;;  %3204 = vst [vmem:[#allocation7 + $0x688] sm:$0xff] %v2948_v57  ;;  %v2690_v49 = vmul.f32 %v4003_v0, %v2452_v37  ;;  %v2687_v61 = vmul.f32 %v4004_v1, %v2451_v27  ;;  %v2688_v33 = vmul.f32 %v4005_v50, %v2451_v27  ;;  %v2326_v2 = vsub.f32 2.0, %v2198_v16  ;;  %v6900_v57 = vpop.xlane.xlu0 %912 }
 0x291   :  { %v6848_v54 = vpop.eup %3732  ;;  %3209 = vst [vmem:[#allocation7 + $0x6b0] sm:$0xff] %v2953_v56  ;;  %3210 = vst [vmem:[#allocation7 + $0x6b8] sm:$0xff] %v2954_v35  ;;  %v2951_v13 = vmul.f32 %v4151_v10, %v2683_v44  ;;  %v2952_v6 = vmul.f32 %v4159_v17, %v2684_v23  ;;  %v1708_v60 = vsel %vm1707_vm14, %v6642_v46, %v1706_v62  ;;  %vm1763_vm14 = vcmp.eq.f32.partialorder %v6796_v42, inf }
 0x292   :  { %v2957_v28 = vmul.f32 %v4151_v10, %v2689_v36  ;;  %v2958_v3 = vmul.f32 %v4159_v17, %v2690_v49  ;;  %v2955_v25 = vmul.f32 %v4151_v10, %v2687_v61  ;;  %v2956_v38 = vmul.f32 %v4159_v17, %v2688_v33 }
 0x293   :  { %v3735_v41 = vpop.eup %3734  ;;  %3207 = vst [vmem:[#allocation7 + $0x6a0] sm:$0xff] %v2951_v13  ;;  %3208 = vst [vmem:[#allocation7 + $0x6a8] sm:$0xff] %v2952_v6  ;;  %v2454_v11 = vmul.f32 %v6820_v48, %v2326_v2  ;;  %v6866_v62 = vsel %vm1709_vm15, %v1710_v30, %v1708_v60  ;;  %v1727_v31 = vmul.f32 %v6817_v22, %v6678_v8  ;;  %v6878_v30 = vpop.xlane.xlu1 %915  ;;  %v4006_v22 = vld [vmem:[#allocation2 + $0x6f0] sm:$0xff]  ;;  %vm1765_vm15 = vcmp.eq.f32.partialorder %v6796_v42, 0.0 }
 0x294   :  { %v1720_v9 = vmul.f32 %v6823_v40, %v6690_v43  ;;  %3213 = vst [vmem:[#allocation7 + $0x6d0] sm:$0xff] %v2957_v28  ;;  %3214 = vst [vmem:[#allocation7 + $0x6d8] sm:$0xff] %v2958_v3  ;;  %v1941_v53 = vmax.f32 %v6866_v62, 5.9604645e-08  ;;  %v1741_v48 = vmul.f32 %v6829_v51, %v6727_v58  ;;  %v1734_v29 = vmul.f32 %v3727_v59, %v6757_v52  ;;  %v4007_v40 = vld [vmem:[#allocation2 + $0x6f8] sm:$0xff]  ;;  %v6951_v4 = vpop.xlane.xlu0 %918 }
 0x295   :  { %3211 = vst [vmem:[#allocation7 + $0x6c0] sm:$0xff] %v2955_v25  ;;  %3212 = vst [vmem:[#allocation7 + $0x6c8] sm:$0xff] %v2956_v38  ;;  %v1755_v46 = vmul.f32 %v3729_v47, %v6774_v45  ;;  %v2693_v19 = vmul.f32 %v4006_v22, %v2454_v11  ;;  %v2694_v14 = vmul.f32 %v4007_v40, %v2454_v11  ;;  %v1787_v50 = vand.u32 2147483648, %v6878_v30  ;;  %v4008_v22 = vld [vmem:[#allocation2 + $0x6e0] sm:$0xff]  ;;  %v4009_v40 = vld [vmem:[#allocation2 + $0x6e8] sm:$0xff] }
 0x296   :  { %v1729_v15 = vsel %vm1728_vm0, %v6678_v8, %v1727_v31  ;;  %v1722_v51 = vsel %vm1721_vm1, %v6690_v43, %v1720_v9  ;;  %3736 = vrcp.f32 %v1941_v53  ;;  %v1743_v7 = vsel %vm1742_vm4, %v6727_v58, %v1741_v48 }
 0x297   :  { %v1732_v37 = vsel %vm1730_vm2, %v1731_v21, %v1729_v15  ;;  %v6895_v59 = vsel %vm1723_vm3, %v1724_v24, %v1722_v51  ;;  %v2961_v27 = vmul.f32 %v4151_v10, %v2693_v19  ;;  %v2962_v16 = vmul.f32 %v4159_v17, %v2694_v14  ;;  %v6937_v23 = vpop.xlane.xlu1 %921 }
 0x298   :  { %v1944_v47 = vmax.f32 %v1732_v37, 5.9604645e-08  ;;  %v1943_v8 = vmax.f32 %v6895_v59, 5.9604645e-08  ;;  %v6909_v43 = vsel %vm1744_vm5, %v1745_v34, %v1743_v7  ;;  %v1736_v21 = vsel %vm1735_vm6, %v6757_v52, %v1734_v29 }
 0x299   :  { %v1757_v24 = vsel %vm1756_vm7, %v6774_v45, %v1755_v46  ;;  %v1748_v56 = vmul.f32 %v6844_v55, %v6779_v26  ;;  %3217 = vst [vmem:[#allocation7 + $0x6f0] sm:$0xff] %v2961_v27  ;;  %3218 = vst [vmem:[#allocation7 + $0x6f8] sm:$0xff] %v2962_v16  ;;  %v1946_v35 = vmax.f32 %v6909_v43, 5.9604645e-08  ;;  %v6924_v58 = vsel %vm1737_vm8, %v1738_v20, %v1736_v21 }
 0x29a   :  { %3738 = vrcp.f32 %v1944_v47  ;;  %v6930_v34 = vsel %vm1758_vm9, %v1759_v32, %v1757_v24  ;;  %v1945_v63 = vmax.f32 %v6924_v58, 5.9604645e-08  ;;  %v1769_v45 = vmul.f32 %v6848_v54, %v6789_v5  ;;  %v4010_v24 = vld [vmem:[#allocation2 + $0x710] sm:$0xff] }
 0x29b   :  { %3740 = vrcp.f32 %v1943_v8  ;;  %v1948_v44 = vmax.f32 %v6930_v34, 5.9604645e-08  ;;  %v1750_v39 = vsel %vm1749_vm10, %v6779_v26, %v1748_v56  ;;  %v1762_v20 = vmul.f32 %v3735_v41, %v6796_v42  ;;  %v6973_v61 = vpop.xlane.xlu1 %927 }
 0x29c   :  { %3742 = vrcp.f32 %v1946_v35  ;;  %v6943_v52 = vsel %vm1751_vm11, %v1752_v12, %v1750_v39  ;;  %v1766_v55 = vand.u32 2147483648, %v6796_v42  ;;  %v1771_v26 = vsel %vm1770_vm12, %v6789_v5, %v1769_v45 }
 0x29d   :  { %3744 = vrcp.f32 %v1945_v63  ;;  %v1947_v32 = vmax.f32 %v6943_v52, 5.9604645e-08  ;;  %v1764_v12 = vsel %vm1763_vm14, %v6796_v42, %v1762_v20  ;;  %v6966_v36 = vsel %vm1772_vm13, %v1773_v18, %v1771_v26  ;;  %v6979_v42 = vpop.xlane.xlu0 %924  ;;  %v4013_v20 = vld [vmem:[#allocation2 + $0x708] sm:$0xff] }
 0x29e   :  { %3746 = vrcp.f32 %v1948_v44  ;;  %v6968_v0 = vsel %vm1765_vm15, %v1766_v55, %v1764_v12  ;;  %v1950_v49 = vmax.f32 %v6966_v36, 5.9604645e-08  ;;  %v1780_v13 = vand.u32 2147483648, %v6900_v57 }
 0x29f   :  { %3748 = vrcp.f32 %v1947_v32  ;;  %v1949_v1 = vmax.f32 %v6968_v0, 5.9604645e-08  ;;  %v1801_v6 = vand.u32 2147483648, %v6937_v23  ;;  %v6987_v2 = vpop.xlane.xlu1 %933  ;;  %v1794_v3 = vand.u32 2147483648, %v6951_v4 }
 0x2a0   :  { %3750 = vrsqrt.f32 %v6878_v30  ;;  %v1815_v25 = vand.u32 2147483648, %v6973_v61  ;;  %v1808_v62 = vand.u32 2147483648, %v6979_v42  ;;  %v1829_v29 = vand.u32 2147483648, %v6987_v2 }
 0x2a1   :  { %3752 = vrcp.f32 %v1950_v49  ;;  %v6994_v31 = vpop.xlane.xlu0 %930  ;;  %vm1784_vm0 = vcmp.eq.f32.partialorder %v6878_v30, inf  ;;  %vm1777_vm1 = vcmp.eq.f32.partialorder %v6900_v57, inf  ;;  %vm1786_vm2 = vcmp.eq.f32.partialorder %v6878_v30, 0.0 }
 0x2a2   :  { %3754 = vrcp.f32 %v1949_v1  ;;  %vm1779_vm3 = vcmp.eq.f32.partialorder %v6900_v57, 0.0  ;;  %vm1798_vm4 = vcmp.eq.f32.partialorder %v6937_v23, inf  ;;  %vm1800_vm5 = vcmp.eq.f32.partialorder %v6937_v23, 0.0 }
 0x2a3   :  { %v3737_v5 = vpop.eup %3736  ;;  %3756 = vrsqrt.f32 %v6900_v57  ;;  %vm1791_vm6 = vcmp.eq.f32.partialorder %v6951_v4, inf  ;;  %vm1793_vm7 = vcmp.eq.f32.partialorder %v6951_v4, 0.0  ;;  %vm1812_vm8 = vcmp.eq.f32.partialorder %v6973_v61, inf }
 0x2a4   :  { %v2197_v18 = vmul.f32 %v3737_v5, %v1941_v53  ;;  %3758 = vrsqrt.f32 %v6937_v23  ;;  %vm1814_vm9 = vcmp.eq.f32.partialorder %v6973_v61, 0.0  ;;  %vm1805_vm10 = vcmp.eq.f32.partialorder %v6979_v42, inf }
 0x2a5   :  { %3760 = vrsqrt.f32 %v6951_v4  ;;  %vm1807_vm11 = vcmp.eq.f32.partialorder %v6979_v42, 0.0  ;;  %vm1826_vm12 = vcmp.eq.f32.partialorder %v6987_v2, inf  ;;  %vm1828_vm13 = vcmp.eq.f32.partialorder %v6987_v2, 0.0 }
 0x2a6   :  { %v2325_v54 = vsub.f32 2.0, %v2197_v18  ;;  %3762 = vrsqrt.f32 %v6973_v61  ;;  %vm1819_vm14 = vcmp.eq.f32.partialorder %v6994_v31, inf  ;;  %vm1821_vm15 = vcmp.eq.f32.partialorder %v6994_v31, 0.0 }
 0x2a7   :  { %v3739_v33 = vpop.eup %3738  ;;  %3764 = vrsqrt.f32 %v6979_v42 }
 0x2a8   :  { %v3741_v60 = vpop.eup %3740  ;;  %v2200_v28 = vmul.f32 %v3739_v33, %v1944_v47  ;;  %v2453_v41 = vmul.f32 %v3737_v5, %v2325_v54  ;;  %3766 = vrsqrt.f32 %v6987_v2  ;;  %v4014_v54 = vld [vmem:[#allocation2 + $0x730] sm:$0xff] }
 0x2a9   :  { %v3743_v38 = vpop.eup %3742  ;;  %v2199_v11 = vmul.f32 %v3741_v60, %v1943_v8  ;;  %3768 = vrsqrt.f32 %v6994_v31 }
 0x2aa   :  { %v3745_v9 = vpop.eup %3744  ;;  %v2328_v53 = vsub.f32 2.0, %v2200_v28  ;;  %v2202_v48 = vmul.f32 %v3743_v38, %v1946_v35  ;;  %v2691_v19 = vmul.f32 %v4008_v22, %v2453_v41  ;;  %v2692_v14 = vmul.f32 %v4009_v40, %v2453_v41  ;;  %v4011_v35 = vld [vmem:[#allocation2 + $0x718] sm:$0xff] }
 0x2ab   :  { %v3747_v46 = vpop.eup %3746  ;;  %v2327_v15 = vsub.f32 2.0, %v2199_v11  ;;  %v2201_v51 = vmul.f32 %v3745_v9, %v1945_v63  ;;  %v4015_v28 = vld [vmem:[#allocation2 + $0x738] sm:$0xff] }
 0x2ac   :  { %v6998_v37 = vpop.eup %3748  ;;  %v2456_v59 = vmul.f32 %v3739_v33, %v2328_v53  ;;  %v2330_v7 = vsub.f32 2.0, %v2202_v48  ;;  %v2204_v27 = vmul.f32 %v3747_v46, %v1948_v44  ;;  %v2959_v16 = vmul.f32 %v4151_v10, %v2691_v19  ;;  %v4012_v44 = vld [vmem:[#allocation2 + $0x700] sm:$0xff]  ;;  %v4017_v53 = vld [vmem:[#allocation2 + $0x728] sm:$0xff] }
 0x2ad   :  { %v2960_v47 = vmul.f32 %v4159_v17, %v2692_v14  ;;  %v2455_v8 = vmul.f32 %v3741_v60, %v2327_v15  ;;  %v2329_v43 = vsub.f32 2.0, %v2201_v51  ;;  %v3751_v21 = vpop.eup %3750  ;;  %v2203_v12 = vmul.f32 %v6998_v37, %v1947_v32 }
 0x2ae   :  { %v2697_v56 = vmul.f32 %v4010_v24, %v2456_v59  ;;  %v2698_v58 = vmul.f32 %v4011_v35, %v2456_v59  ;;  %v2458_v63 = vmul.f32 %v3743_v38, %v2330_v7  ;;  %v2332_v39 = vsub.f32 2.0, %v2204_v27  ;;  %v7007_v34 = vpop.eup %3752  ;;  %3215 = vst [vmem:[#allocation7 + $0x6e0] sm:$0xff] %v2959_v16 }
 0x2af   :  { %3216 = vst [vmem:[#allocation7 + $0x6e8] sm:$0xff] %v2960_v47  ;;  %v2695_v45 = vmul.f32 %v4012_v44, %v2455_v8  ;;  %v2696_v55 = vmul.f32 %v4013_v20, %v2455_v8  ;;  %v2457_v26 = vmul.f32 %v3745_v9, %v2329_v43  ;;  %v3755_v5 = vpop.eup %3754  ;;  %v4016_v9 = vld [vmem:[#allocation2 + $0x720] sm:$0xff]  ;;  %v2331_v15 = vsub.f32 2.0, %v2203_v12  ;;  %v4019_v8 = vld [vmem:[#allocation2 + $0x758] sm:$0xff]  ;;  %v4021_v44 = vld [vmem:[#allocation2 + $0x748] sm:$0xff] }
 0x2b0   :  { %v2965_v18 = vmul.f32 %v4151_v10, %v2697_v56  ;;  %v2966_v33 = vmul.f32 %v4159_v17, %v2698_v58  ;;  %v2701_v60 = vmul.f32 %v4014_v54, %v2458_v63  ;;  %v2702_v38 = vmul.f32 %v4015_v28, %v2458_v63  ;;  %v3757_v41 = vpop.eup %3756  ;;  %v4022_v28 = vld [vmem:[#allocation2 + $0x770] sm:$0xff] }
 0x2b1   :  { %v2963_v11 = vmul.f32 %v4151_v10, %v2695_v45  ;;  %v2964_v52 = vmul.f32 %v4159_v17, %v2696_v55  ;;  %v2699_v32 = vmul.f32 %v4016_v9, %v2457_v26  ;;  %v2700_v48 = vmul.f32 %v4017_v53, %v2457_v26  ;;  %v3759_v22 = vpop.eup %3758 }
 0x2b2   :  { %3221 = vst [vmem:[#allocation7 + $0x710] sm:$0xff] %v2965_v18  ;;  %3222 = vst [vmem:[#allocation7 + $0x718] sm:$0xff] %v2966_v33  ;;  %v2969_v19 = vmul.f32 %v4151_v10, %v2701_v60  ;;  %v2970_v40 = vmul.f32 %v4159_v17, %v2702_v38  ;;  %v2460_v14 = vmul.f32 %v3747_v46, %v2332_v39  ;;  %v3761_v16 = vpop.eup %3760  ;;  %v4018_v46 = vld [vmem:[#allocation2 + $0x750] sm:$0xff]  ;;  %v4020_v39 = vld [vmem:[#allocation2 + $0x740] sm:$0xff] }
 0x2b3   :  { %3219 = vst [vmem:[#allocation7 + $0x700] sm:$0xff] %v2963_v11  ;;  %3220 = vst [vmem:[#allocation7 + $0x708] sm:$0xff] %v2964_v52  ;;  %v2967_v51 = vmul.f32 %v4151_v10, %v2699_v32  ;;  %v2968_v59 = vmul.f32 %v4159_v17, %v2700_v48  ;;  %v2206_v7 = vmul.f32 %v7007_v34, %v1950_v49  ;;  %v3763_v49 = vpop.eup %3762  ;;  %v4024_v52 = vld [vmem:[#allocation2 + $0x760] sm:$0xff]  ;;  %v4025_v32 = vld [vmem:[#allocation2 + $0x768] sm:$0xff] }
 0x2b4   :  { %v2205_v27 = vmul.f32 %v3755_v5, %v1949_v1  ;;  %3225 = vst [vmem:[#allocation7 + $0x730] sm:$0xff] %v2969_v19  ;;  %3226 = vst [vmem:[#allocation7 + $0x738] sm:$0xff] %v2970_v40  ;;  %v2705_v47 = vmul.f32 %v4018_v46, %v2460_v14  ;;  %v2706_v43 = vmul.f32 %v4019_v8, %v2460_v14  ;;  %v3765_v58 = vpop.eup %3764 }
 0x2b5   :  { %v2459_v24 = vmul.f32 %v6998_v37, %v2331_v15  ;;  %v1783_v36 = vmul.f32 %v3751_v21, %v6878_v30  ;;  %3223 = vst [vmem:[#allocation7 + $0x720] sm:$0xff] %v2967_v51  ;;  %3224 = vst [vmem:[#allocation7 + $0x728] sm:$0xff] %v2968_v59  ;;  %v2334_v0 = vsub.f32 2.0, %v2206_v7  ;;  %v1776_v56 = vmul.f32 %v3757_v41, %v6900_v57  ;;  %v3767_v20 = vpop.eup %3766  ;;  %v4023_v41 = vld [vmem:[#allocation2 + $0x778] sm:$0xff] }
 0x2b6   :  { %v2333_v1 = vsub.f32 2.0, %v2205_v27  ;;  %v1797_v35 = vmul.f32 %v3759_v22, %v6937_v23  ;;  %v2973_v63 = vmul.f32 %v4151_v10, %v2705_v47  ;;  %v2974_v37 = vmul.f32 %v4159_v17, %v2706_v43  ;;  %v3769_v60 = vpop.eup %3768 }
 0x2b7   :  { %v2703_v21 = vmul.f32 %v4020_v39, %v2459_v24  ;;  %v2704_v45 = vmul.f32 %v4021_v44, %v2459_v24  ;;  %v2462_v55 = vmul.f32 %v7007_v34, %v2334_v0  ;;  %v1785_v12 = vsel %vm1784_vm0, %v6878_v30, %v1783_v36 }
 0x2b8   :  { %v2461_v26 = vmul.f32 %v3755_v5, %v2333_v1  ;;  %v1778_v18 = vsel %vm1777_vm1, %v6900_v57, %v1776_v56  ;;  %3229 = vst [vmem:[#allocation7 + $0x750] sm:$0xff] %v2973_v63  ;;  %3230 = vst [vmem:[#allocation7 + $0x758] sm:$0xff] %v2974_v37  ;;  %v1788_v34 = vsel %vm1786_vm2, %v1787_v50, %v1785_v12  ;;  %v4027_v12 = vld [vmem:[#allocation2 + $0x798] sm:$0xff] }
 0x2b9   :  { %v2971_v33 = vmul.f32 %v4151_v10, %v2703_v21  ;;  %v2972_v54 = vmul.f32 %v4159_v17, %v2704_v45  ;;  %v1781_v5 = vsel %vm1779_vm3, %v1780_v13, %v1778_v18  ;;  %v2709_v38 = vmul.f32 %v4022_v28, %v2462_v55  ;;  %v4029_v28 = vld [vmem:[#allocation2 + $0x788] sm:$0xff] }
 0x2ba   :  { %v2710_v11 = vmul.f32 %v4023_v41, %v2462_v55  ;;  %v2707_v9 = vmul.f32 %v4024_v52, %v2461_v26  ;;  %v2708_v53 = vmul.f32 %v4025_v32, %v2461_v26  ;;  %v1952_v30 = vmax.f32 %v1788_v34, 5.9604645e-08  ;;  %v4026_v55 = vld [vmem:[#allocation2 + $0x790] sm:$0xff] }
 0x2bb   :  { %3227 = vst [vmem:[#allocation7 + $0x740] sm:$0xff] %v2971_v33  ;;  %3228 = vst [vmem:[#allocation7 + $0x748] sm:$0xff] %v2972_v54  ;;  %v1951_v50 = vmax.f32 %v1781_v5, 5.9604645e-08  ;;  %v1799_v57 = vsel %vm1798_vm4, %v6937_v23, %v1797_v35  ;;  %v1790_v13 = vmul.f32 %v3761_v16, %v6951_v4  ;;  %v2977_v48 = vmul.f32 %v4151_v10, %v2709_v38  ;;  %v4028_v5 = vld [vmem:[#allocation2 + $0x780] sm:$0xff] }
 0x2bc   :  { %v2978_v22 = vmul.f32 %v4159_v17, %v2710_v11  ;;  %v2975_v19 = vmul.f32 %v4151_v10, %v2707_v9  ;;  %v2976_v40 = vmul.f32 %v4159_v17, %v2708_v53  ;;  %3770 = vrcp.f32 %v1952_v30 }
 0x2bd   :  { %v1802_v14 = vsel %vm1800_vm5, %v1801_v6, %v1799_v57  ;;  %v1792_v15 = vsel %vm1791_vm6, %v6951_v4, %v1790_v13  ;;  %v1811_v51 = vmul.f32 %v3763_v49, %v6973_v61  ;;  %3233 = vst [vmem:[#allocation7 + $0x770] sm:$0xff] %v2977_v48  ;;  %3772 = vrcp.f32 %v1951_v50  ;;  %v4030_v13 = vld [vmem:[#allocation2 + $0x7b0] sm:$0xff] }
 0x2be   :  { %3234 = vst [vmem:[#allocation7 + $0x778] sm:$0xff] %v2978_v22  ;;  %3231 = vst [vmem:[#allocation7 + $0x760] sm:$0xff] %v2975_v19  ;;  %v1954_v59 = vmax.f32 %v1802_v14, 5.9604645e-08  ;;  %v1795_v7 = vsel %vm1793_vm7, %v1794_v3, %v1792_v15  ;;  %v1804_v23 = vmul.f32 %v3765_v58, %v6979_v42  ;;  %v1825_v16 = vmul.f32 %v3767_v20, %v6987_v2  ;;  %v4031_v22 = vld [vmem:[#allocation2 + $0x7b8] sm:$0xff]  ;;  %v4033_v15 = vld [vmem:[#allocation2 + $0x7a8] sm:$0xff] }
 0x2bf   :  { %3232 = vst [vmem:[#allocation7 + $0x768] sm:$0xff] %v2976_v40  ;;  %v1953_v6 = vmax.f32 %v1795_v7, 5.9604645e-08  ;;  %v1813_v27 = vsel %vm1812_vm8, %v6973_v61, %v1811_v51  ;;  %v1818_v46 = vmul.f32 %v3769_v60, %v6994_v31  ;;  %v1822_v3 = vand.u32 2147483648, %v6994_v31  ;;  %v4032_v40 = vld [vmem:[#allocation2 + $0x7a0] sm:$0xff] }
 0x2c0   :  { %3774 = vrcp.f32 %v1954_v59  ;;  %v1816_v47 = vsel %vm1814_vm9, %v1815_v25, %v1813_v27  ;;  %v1806_v4 = vsel %vm1805_vm10, %v6979_v42, %v1804_v23  ;;  %v1827_v24 = vsel %vm1826_vm12, %v6987_v2, %v1825_v16 }
 0x2c1   :  { %3776 = vrcp.f32 %v1953_v6  ;;  %v1956_v8 = vmax.f32 %v1816_v47, 5.9604645e-08  ;;  %v1809_v43 = vsel %vm1807_vm11, %v1808_v62, %v1806_v4  ;;  %v1830_v61 = vsel %vm1828_vm13, %v1829_v29, %v1827_v24  ;;  %v4034_v4 = vld [vmem:[#allocation2 + $0x7d0] sm:$0xff] }
 0x2c2   :  { %v1955_v36 = vmax.f32 %v1809_v43, 5.9604645e-08  ;;  %v1820_v25 = vsel %vm1819_vm14, %v6994_v31, %v1818_v46  ;;  %v1958_v49 = vmax.f32 %v1830_v61, 5.9604645e-08 }
 0x2c3   :  { %3778 = vrcp.f32 %v1956_v8  ;;  %v1823_v42 = vsel %vm1821_vm15, %v1822_v3, %v1820_v25 }
 0x2c4   :  { %3780 = vrcp.f32 %v1955_v36  ;;  %v1957_v62 = vmax.f32 %v1823_v42, 5.9604645e-08  ;;  %v4036_v42 = vld [vmem:[#allocation2 + $0x7c0] sm:$0xff] }
 0x2c5   :  { %3782 = vrcp.f32 %v1958_v49 }
 0x2c6   :  { %3784 = vrcp.f32 %v1957_v62 }
 0x2c9   :  { %v3771_v0 = vpop.eup %3770 }
 0x2ca   :  { %v3773_v1 = vpop.eup %3772  ;;  %v2208_v56 = vmul.f32 %v3771_v0, %v1952_v30 }
 0x2cb   :  { %v2207_v35 = vmul.f32 %v3773_v1, %v1951_v50 }
 0x2cc   :  { %v2336_v2 = vsub.f32 2.0, %v2208_v56 }
 0x2cd   :  { %v3775_v58 = vpop.eup %3774  ;;  %v2335_v63 = vsub.f32 2.0, %v2207_v35 }
 0x2ce   :  { %v3777_v29 = vpop.eup %3776  ;;  %v2210_v37 = vmul.f32 %v3775_v58, %v1954_v59  ;;  %v2464_v39 = vmul.f32 %v3771_v0, %v2336_v2  ;;  %v4037_v0 = vld [vmem:[#allocation2 + $0x7c8] sm:$0xff] }
 0x2cf   :  { %v2209_v21 = vmul.f32 %v3777_v29, %v1953_v6  ;;  %v2463_v31 = vmul.f32 %v3773_v1, %v2335_v63 }
 0x2d0   :  { %v3779_v44 = vpop.eup %3778  ;;  %v2338_v45 = vsub.f32 2.0, %v2210_v37  ;;  %v2713_v26 = vmul.f32 %v4026_v55, %v2464_v39  ;;  %v2714_v18 = vmul.f32 %v4027_v12, %v2464_v39  ;;  %v4039_v37 = vld [vmem:[#allocation2 + $0x7f8] sm:$0xff] }
 0x2d1   :  { %v3781_v20 = vpop.eup %3780  ;;  %v2337_v33 = vsub.f32 2.0, %v2209_v21  ;;  %v2212_v54 = vmul.f32 %v3779_v44, %v1956_v8  ;;  %v2711_v60 = vmul.f32 %v4028_v5, %v2463_v31  ;;  %v2712_v38 = vmul.f32 %v4029_v28, %v2463_v31  ;;  %v4035_v8 = vld [vmem:[#allocation2 + $0x7d8] sm:$0xff]  ;;  %v4040_v21 = vld [vmem:[#allocation2 + $0x7e0] sm:$0xff]  ;;  %v4041_v31 = vld [vmem:[#allocation2 + $0x7e8] sm:$0xff] }
 0x2d2   :  { %v3783_v34 = vpop.eup %3782  ;;  %v2466_v41 = vmul.f32 %v3775_v58, %v2338_v45  ;;  %v2211_v11 = vmul.f32 %v3781_v20, %v1955_v36  ;;  %v2981_v9 = vmul.f32 %v4151_v10, %v2713_v26  ;;  %v2982_v32 = vmul.f32 %v4159_v17, %v2714_v18 }
 0x2d3   :  { %v3785_v52 = vpop.eup %3784  ;;  %v2465_v53 = vmul.f32 %v3777_v29, %v2337_v33  ;;  %v2340_v30 = vsub.f32 2.0, %v2212_v54  ;;  %v2979_v50 = vmul.f32 %v4151_v10, %v2711_v60  ;;  %v2980_v57 = vmul.f32 %v4159_v17, %v2712_v38  ;;  %v4038_v29 = vld [vmem:[#allocation2 + $0x7f0] sm:$0xff] }
 0x2d4   :  { %v2717_v48 = vmul.f32 %v4030_v13, %v2466_v41  ;;  %v2718_v19 = vmul.f32 %v4031_v22, %v2466_v41  ;;  %3237 = vst [vmem:[#allocation7 + $0x790] sm:$0xff] %v2981_v9  ;;  %3238 = vst [vmem:[#allocation7 + $0x798] sm:$0xff] %v2982_v32  ;;  %v2339_v7 = vsub.f32 2.0, %v2211_v11  ;;  %v2214_v27 = vmul.f32 %v3783_v34, %v1958_v49 }
 0x2d5   :  { %v2715_v14 = vmul.f32 %v4032_v40, %v2465_v53  ;;  %v2716_v51 = vmul.f32 %v4033_v15, %v2465_v53  ;;  %v2468_v59 = vmul.f32 %v3779_v44, %v2340_v30  ;;  %3235 = vst [vmem:[#allocation7 + $0x780] sm:$0xff] %v2979_v50  ;;  %3236 = vst [vmem:[#allocation7 + $0x788] sm:$0xff] %v2980_v57 }
 0x2d6   :  { %v2985_v23 = vmul.f32 %v4151_v10, %v2717_v48  ;;  %v2986_v6 = vmul.f32 %v4159_v17, %v2718_v19  ;;  %v2213_v16 = vmul.f32 %v3785_v52, %v1957_v62  ;;  %v2467_v24 = vmul.f32 %v3781_v20, %v2339_v7 }
 0x2d7   :  { %v2983_v46 = vmul.f32 %v4151_v10, %v2715_v14  ;;  %v2984_v47 = vmul.f32 %v4159_v17, %v2716_v51  ;;  %v2721_v3 = vmul.f32 %v4034_v4, %v2468_v59  ;;  %v2722_v43 = vmul.f32 %v4035_v8, %v2468_v59 }
 0x2d8   :  { %3241 = vst [vmem:[#allocation7 + $0x7b0] sm:$0xff] %v2985_v23  ;;  %3242 = vst [vmem:[#allocation7 + $0x7b8] sm:$0xff] %v2986_v6  ;;  %v2342_v36 = vsub.f32 2.0, %v2214_v27  ;;  %v2341_v61 = vsub.f32 2.0, %v2213_v16  ;;  %v2719_v62 = vmul.f32 %v4036_v42, %v2467_v24  ;;  %v2720_v1 = vmul.f32 %v4037_v0, %v2467_v24 }
 0x2d9   :  { %3239 = vst [vmem:[#allocation7 + $0x7a0] sm:$0xff] %v2983_v46  ;;  %3240 = vst [vmem:[#allocation7 + $0x7a8] sm:$0xff] %v2984_v47  ;;  %v2989_v25 = vmul.f32 %v4151_v10, %v2721_v3  ;;  %v2990_v49 = vmul.f32 %v4159_v17, %v2722_v43 }
 0x2da   :  { %v2470_v56 = vmul.f32 %v3783_v34, %v2342_v36  ;;  %v2469_v35 = vmul.f32 %v3785_v52, %v2341_v61  ;;  %v2987_v58 = vmul.f32 %v4151_v10, %v2719_v62  ;;  %v2988_v2 = vmul.f32 %v4159_v17, %v2720_v1 }
 0x2db   :  { %3245 = vst [vmem:[#allocation7 + $0x7d0] sm:$0xff] %v2989_v25  ;;  %3246 = vst [vmem:[#allocation7 + $0x7d8] sm:$0xff] %v2990_v49 }
 0x2dc   :  { %v2725_v63 = vmul.f32 %v4038_v29, %v2470_v56  ;;  %v2726_v39 = vmul.f32 %v4039_v37, %v2470_v56  ;;  %v2723_v44 = vmul.f32 %v4040_v21, %v2469_v35  ;;  %v2724_v45 = vmul.f32 %v4041_v31, %v2469_v35  ;;  %3243 = vst [vmem:[#allocation7 + $0x7c0] sm:$0xff] %v2987_v58 }
 0x2dd   :  { %3244 = vst [vmem:[#allocation7 + $0x7c8] sm:$0xff] %v2988_v2 }
 0x2de   :  { %v2993_v20 = vmul.f32 %v4151_v10, %v2725_v63  ;;  %v2994_v55 = vmul.f32 %v4159_v17, %v2726_v39  ;;  %v2991_v26 = vmul.f32 %v4151_v10, %v2723_v44  ;;  %v2992_v12 = vmul.f32 %v4159_v17, %v2724_v45 }
 0x2e0   :  { %3249 = vst [vmem:[#allocation7 + $0x7f0] sm:$0xff] %v2993_v20  ;;  %3250 = vst [vmem:[#allocation7 + $0x7f8] sm:$0xff] %v2994_v55 }
 0x2e1   :  { %3247 = vst [vmem:[#allocation7 + $0x7e0] sm:$0xff] %v2991_v26  ;;  %3248 = vst [vmem:[#allocation7 + $0x7e8] sm:$0xff] %v2992_v12 }
 0x2e2   :  { %4093 = shalt.err (!%p4090_p0)
}
 0x2e3   :  { %3262 = dma.vmem_to_hbm [thread:$0]  %s3257_s1, 32768, %s7134_s2, [#allocation4], %s4109_s12, %s4109_s12, %s4110_s13  }
 0x2e4   :  { %4106 = dma.done.wait [#allocation4], 32768  }
 0x2e5   :  { %4107 = vsyncadd [#allocation4], 4294934528 }
 0x2e6   :  { %3266 = vsyncpa [#allocation3], 1 }
 0x2e7   :  { %3267 = vsyncpa [#allocation6], 1 }
 0x2e8   :  { %3268 = vsyncpa [#allocation4], 1 }

</bundles_post_ra>
